<compile_context>
chip_gen: v6e
topology: v6e:2x2x1
jax: 0.10.0
libtpu: 0.0.40
codegen_flags: <defaults>
</compile_context>

<pallas_src>
import math

import jax
import jax.numpy as jnp
from jax import lax
from jax.experimental import pallas as pl
from jax.experimental.pallas import tpu as pltpu

BASE_DIM = 32
MAX_PARTS = 3
NHEAD = 4
NUM_LAYERS = 2
HEAD_DIM = BASE_DIM // NHEAD
LN_EPS = 1e-5
PACK_W = 128                      # lane width of the packed parameter blob
BT = 8                            # synthesizer instances per grid step
_NEG = -1e30

_BTS = BT * MAX_PARTS             # 24 rows of activations per grid step
_R = NHEAD * _BTS                 # 96 rows in the (head, batch, pos) replicated space


# ---------------------------------------------------------------------------
# Static (trace-time) layout of the packed parameter blob: name -> (r0, c0, nr, nc)
# ---------------------------------------------------------------------------
def _build_layout():
    S, H, D = MAX_PARTS, NHEAD, BASE_DIM
    Bt, BtS, R = BT, _BTS, _R
    L = {}
    # ---- block A: score mask + head lane mask share the same 96 rows -------
    L["smask"] = (0, 0, R, R)                     # additive (h,b)-block mask
    L["hmask"] = (0, R, R, D)                     # head lane selector
    # ---- block B: replicator + small constants lane-packed -----------------
    rb = R
    L["rrep"] = (rb, 0, R, BtS)                   # row replicator (96, 24)
    L["rsum"] = (rb, BtS, BtS, R)                 # head merger    (24, 96)
    L["pool"] = (rb + BtS, BtS, Bt, BtS)          # mean-pool      (8, 24)
    L["pos"] = (rb + BtS + 8, BtS, BtS, D)        # pos emb tiled over BT
    L["w_out"] = (rb + 2 * BtS + 8, BtS, D, D)
    L["b_out"] = (rb + 2 * BtS + 8, BtS + D, 1, D)
    cursor = 2 * R                                # 192
    # ---- per-layer matmul weights, lane-packed into 64-row blocks ----------
    for l in range(NUM_LAYERS):
        L[f"w2{l}"] = (cursor, 0, 2 * D, D)               # (64, 32) @ lanes 0:32
        L[f"wqkv{l}"] = (cursor, D, D, 3 * D)             # (32, 96) @ lanes 32:128
        L[f"w1{l}"] = (cursor + D, D, D, 2 * D)           # (32, 64) @ lanes 32:96
        L[f"wo{l}"] = (cursor + D, 3 * D, D, D)           # (32, 32) @ lanes 96:128
        cursor += 2 * D
    # ---- all bias / LN vectors packed into one 8-row block -----------------
    for l in range(NUM_LAYERS):
        r = cursor + 3 * l
        L[f"bqkv{l}"] = (r, 0, 1, 3 * D)
        L[f"bo{l}"] = (r, 3 * D, 1, D)
        L[f"bb1{l}"] = (r + 1, 0, 1, 2 * D)
        L[f"g1{l}"] = (r + 1, 2 * D, 1, D)
        L[f"be1{l}"] = (r + 1, 3 * D, 1, D)
        L[f"bb2{l}"] = (r + 2, 0, 1, D)
        L[f"g2{l}"] = (r + 2, D, 1, D)
        L[f"be2{l}"] = (r + 2, 2 * D, 1, D)
    cursor += 3 * NUM_LAYERS
    rows = cursor + (-cursor) % 8
    return L, rows


_LAYOUT, _BLOB_ROWS = _build_layout()


# ---------------------------------------------------------------------------
# Host-side, one-time parameter packing.
# ---------------------------------------------------------------------------
def pack_params(params):
    S, H, Dh, D = MAX_PARTS, NHEAD, HEAD_DIM, BASE_DIM
    Bt, BtS, R = BT, _BTS, _R
    scale = 1.0 / math.sqrt(Dh)

    e = {}
    eye = jnp.eye(BtS, dtype=jnp.float32)
    e["rrep"] = jnp.tile(eye, (H, 1))             # row r=h*BtS+m -> source row m
    e["rsum"] = jnp.tile(eye, (1, H))             # sum heads back to (b, i) rows
    e["pool"] = jnp.kron(jnp.eye(Bt, dtype=jnp.float32),
                         jnp.full((1, S), 1.0 / S, jnp.float32))
    row_head = jnp.arange(R)[:, None] // BtS
    e["hmask"] = (row_head == jnp.arange(D)[None, :] // Dh).astype(jnp.float32)
    blk = jnp.arange(R) // S                      # (head, batch) block id
    e["smask"] = jnp.where(blk[:, None] == blk[None, :], 0.0, _NEG).astype(jnp.float32)
    e["pos"] = jnp.tile(params["pos_embed"], (Bt, 1))
    e["w_out"] = params["w_out"]
    e["b_out"] = params["b_out"]

    qscale = jnp.concatenate([jnp.full((D,), scale, jnp.float32),
                              jnp.ones((2 * D,), jnp.float32)])
    for l, lp in enumerate(params["layers"]):
        (wqkv, bqkv, wo, bo, g1, be1, w1, bb1, w2, bb2, g2, be2) = lp
        e[f"wqkv{l}"] = wqkv * qscale[None, :]    # fold 1/sqrt(Dh) into q columns
        e[f"bqkv{l}"] = bqkv * qscale[None, :]
        e[f"wo{l}"], e[f"bo{l}"] = wo, bo
        e[f"g1{l}"], e[f"be1{l}"] = g1, be1
        e[f"w1{l}"], e[f"bb1{l}"] = w1, bb1
        e[f"w2{l}"], e[f"bb2{l}"] = w2, bb2
        e[f"g2{l}"], e[f"be2{l}"] = g2, be2

    blob = jnp.zeros((_BLOB_ROWS, PACK_W), jnp.float32)
    for name, a in e.items():
        r0, c0, nr, nc = _LAYOUT[name]
        blob = blob.at[r0:r0 + nr, c0:c0 + nc].set(
            jnp.asarray(a, jnp.float32).reshape(nr, nc))
    return blob


# ---------------------------------------------------------------------------
# Kernel.
# ---------------------------------------------------------------------------
def _ln(x, gamma, beta):
    # one-pass layernorm: var = E[x^2] - mean^2
    mu = jnp.mean(x, axis=-1, keepdims=True)
    ms = jnp.mean(x * x, axis=-1, keepdims=True)
    var = ms - mu * mu
    return (x - mu) * lax.rsqrt(var + LN_EPS) * gamma + beta


def _mm(a, b):
    return jnp.dot(a, b, preferred_element_type=jnp.float32)


def _synth_kernel(x_ref, p_ref, o_ref):
    D = BASE_DIM

    def g(name):
        # 8-row-aligned, full-lane ref load; all finer slicing is on the value.
        r0, c0, nr, nc = _LAYOUT[name]
        a0 = (r0 // 8) * 8
        a1 = r0 + nr
        a1 = a1 + (-a1) % 8
        rows = p_ref[a0:a1, :]
        return rows[r0 - a0:r0 - a0 + nr, c0:c0 + nc]

    rrep, rsum, pool = g("rrep"), g("rsum"), g("pool")
    hmask, smask = g("hmask"), g("smask")

    x = x_ref[...] + g("pos")                                    # (BT*S, D)
    for l in range(NUM_LAYERS):
        # --- fused QKV projection (q pre-scaled) -----------------------------
        qkv = _mm(x, g(f"wqkv{l}")) + g(f"bqkv{l}")              # (BT*S, 3D)
        # replicate rows once per head (MXU), then split q/k/v by lane slices
        qkv_r = _mm(rrep, qkv)                                   # (R, 3D)
        q = qkv_r[:, 0:D] * hmask                                # head-h lanes only
        k = qkv_r[:, D:2 * D]                                    # full lanes (q is masked)
        v = qkv_r[:, 2 * D:3 * D] * hmask                        # head-h lanes only
        # all (head, batch) scores in one matmul; cross-block entries masked out
        s = lax.dot_general(q, k, (((1,), (1,)), ((), ())),
                            preferred_element_type=jnp.float32) + smask
        s = s - jnp.max(s, axis=-1, keepdims=True)
        p = jnp.exp(s)
        p = p * pl.reciprocal(jnp.sum(p, axis=-1, keepdims=True), approx=True)
        # contract with V (already lane-placed per head), then merge heads
        ctx = _mm(rsum, _mm(p, v))                               # (BT*S, D)
        attn = _mm(ctx, g(f"wo{l}")) + g(f"bo{l}")
        x = _ln(x + attn, g(f"g1{l}"), g(f"be1{l}"))
        # --- feed-forward (relu), post-norm ----------------------------------
        h = jnp.maximum(_mm(x, g(f"w1{l}")) + g(f"bb1{l}"), 0.0)
        ff = _mm(h, g(f"w2{l}")) + g(f"bb2{l}")
        x = _ln(x + ff, g(f"g2{l}"), g(f"be2{l}"))

    pooled = _mm(pool, x)                                        # (BT, D) mean over parts
    o_ref[...] = _mm(pooled, g("w_out")) + g("b_out")


# ---------------------------------------------------------------------------
# Wrappers.
# ---------------------------------------------------------------------------
def _run_batched(x, blob):
    """x: (B, MAX_PARTS, BASE_DIM) -> (B, BASE_DIM)."""
    B = x.shape[0]
    Bp = ((B + BT - 1) // BT) * BT
    if Bp != B:
        x = jnp.concatenate(
            [x, jnp.zeros((Bp - B, MAX_PARTS, BASE_DIM), x.dtype)], axis=0)
    x_flat = x.reshape(Bp * MAX_PARTS, BASE_DIM).astype(jnp.float32)
    out = pl.pallas_call(
        _synth_kernel,
        out_shape=jax.ShapeDtypeStruct((Bp, BASE_DIM), jnp.float32),
        grid=(Bp // BT,),
        in_specs=[pl.BlockSpec((BT * MAX_PARTS, BASE_DIM), lambda b: (b, 0)),
                  pl.BlockSpec((_BLOB_ROWS, PACK_W), lambda b: (0, 0))],
        out_specs=pl.BlockSpec((BT, BASE_DIM), lambda b: (b, 0)),
        compiler_params=pltpu.CompilerParams(
            dimension_semantics=("parallel",)),
    )(x_flat, blob)
    return out[:B]


def transformer_synthesizer_batch(parts_batch, blob):
    """parts_batch: list of instances; each instance is a list of (1, D) parts."""
    xs = []
    for parts in parts_batch:
        parts = list(parts)
        if len(parts) < MAX_PARTS:
            parts = parts + [jnp.zeros_like(parts[0])
                             for _ in range(MAX_PARTS - len(parts))]
        xs.append(jnp.concatenate(parts, axis=0))                # (S, D)
    x = jnp.stack(xs, axis=0)                                    # (B, S, D)
    return _run_batched(x, blob)


def transformer_synthesizer(parts, blob):
    """Single-instance forward matching the original PyTorch module."""
    return transformer_synthesizer_batch([parts], blob)


# ---------------------------------------------------------------------------
# Parameter init (PyTorch-equivalent layout, weights pre-transposed) + reference.
# ---------------------------------------------------------------------------
def init_params(key):
    keys = iter(jax.random.split(key, 64))

    def rnd(shape, scale):
        return scale * jax.random.normal(next(keys), shape, dtype=jnp.float32)

    d = BASE_DIM
    params = {"pos_embed": rnd((MAX_PARTS, d), 1.0)}             # nn.Parameter(randn)
    layers = []
    for _ in range(NUM_LAYERS):
        wqkv = rnd((d, 3 * d), 1.0 / (d ** 0.5))                 # in_proj_weight.T
        bqkv = rnd((1, 3 * d), 0.01)
        wo = rnd((d, d), 1.0 / (d ** 0.5))                       # out_proj.weight.T
        bo = rnd((1, d), 0.01)
        g1 = jnp.ones((1, d), jnp.float32)                       # norm1
        be1 = jnp.zeros((1, d), jnp.float32)
        w1 = rnd((d, 2 * d), 1.0 / (d ** 0.5))                   # linear1.weight.T
        bb1 = rnd((1, 2 * d), 0.01)
        w2 = rnd((2 * d, d), 1.0 / ((2 * d) ** 0.5))             # linear2.weight.T
        bb2 = rnd((1, d), 0.01)
        g2 = jnp.ones((1, d), jnp.float32)                       # norm2
        be2 = jnp.zeros((1, d), jnp.float32)
        layers.append((wqkv, bqkv, wo, bo, g1, be1, w1, bb1, w2, bb2, g2, be2))
    params["layers"] = layers
    params["w_out"] = rnd((d, d), 1.0 / (d ** 0.5))              # output_proj.weight.T
    params["b_out"] = rnd((1, d), 0.01)
    return params


def _reference_single(parts, params):
    """Pure-JAX per-head reference for one instance (original math)."""
    parts = list(parts)
    if len(parts) < MAX_PARTS:
        parts += [jnp.zeros_like(parts[0]) for _ in range(MAX_PARTS - len(parts))]
    x = jnp.concatenate(parts, axis=0) + params["pos_embed"]
    scale = 1.0 / math.sqrt(HEAD_DIM)

    def ln(y, g, b):
        mu = jnp.mean(y, -1, keepdims=True)
        var = jnp.mean((y - mu) ** 2, -1, keepdims=True)
        return (y - mu) / jnp.sqrt(var + LN_EPS) * g + b

    for (wqkv, bqkv, wo, bo, g1, be1, w1, bb1, w2, bb2, g2, be2) in params["layers"]:
        qkv = x @ wqkv + bqkv
        q = qkv[:, :BASE_DIM]
        k = qkv[:, BASE_DIM:2 * BASE_DIM]
        v = qkv[:, 2 * BASE_DIM:]
        heads = []
        for h in range(NHEAD):
            sl = slice(h * HEAD_DIM, (h + 1) * HEAD_DIM)
            s = (q[:, sl] @ k[:, sl].T) * scale
            heads.append(jax.nn.softmax(s, axis=-1) @ v[:, sl])
        attn = jnp.concatenate(heads, axis=-1) @ wo + bo
        x = ln(x + attn, g1, be1)
        x = ln(x + jnp.maximum(x @ w1 + bb1, 0.0) @ w2 + bb2, g2, be2)
    pooled = jnp.mean(x, axis=0, keepdims=True)
    return pooled @ params["w_out"] + params["b_out"]


if __name__ == "__main__":
    key = jax.random.PRNGKey(0)
    pkey, dkey = jax.random.split(key)
    params = init_params(pkey)
    blob = pack_params(params)          # host-side, one-time packing (one operand)

    # 16 synthesizer instances; half provide 2 parts (< max_parts=3) -> zero-padded.
    B = 16
    dkeys = jax.random.split(dkey, B * MAX_PARTS)
    parts_batch = []
    for i in range(B):
        n = 2 if i % 2 == 0 else 3
        parts_batch.append([
            jax.random.normal(dkeys[i * MAX_PARTS + j], (1, BASE_DIM), jnp.float32)
            for j in range(n)])

    out = transformer_synthesizer_batch(parts_batch, blob)
    out = jax.block_until_ready(out)
    assert out.shape == (B, BASE_DIM)

    ref = jnp.concatenate([_reference_single(p, params) for p in parts_batch], axis=0)
    err = float(jnp.max(jnp.abs(out - ref)))
    assert jnp.allclose(out, ref, atol=1e-2, rtol=1e-2), f"kernel/ref mismatch: {err}"
    print("KERNEL_OK")
</pallas_src>

<mosaic_0001>
module attributes {stable_mosaic.version = 11 : i64} {
  func.func @_synth_kernel(%arg0: i32, %arg1: memref<24x32xf32, #tpu.memory_space<vmem>>, %arg2: memref<328x128xf32, #tpu.memory_space<vmem>>, %arg3: memref<8x32xf32, #tpu.memory_space<vmem>>) attributes {dimension_semantics = [#tpu.dimension_semantics<parallel>], iteration_bounds = array<i64: 2>, scalar_prefetch = 0 : i64, scratch_operands = 0 : i64, tpu.core_type = #tpu.core_type<tc>, window_params = [{transform_indices = @transform_0, window_bounds = array<i64: 24, 32>}, {pipeline_mode = #tpu.pipeline_mode<synchronous>, transform_indices = @transform_1, window_bounds = array<i64: 328, 128>}, {transform_indices = @transform_2, window_bounds = array<i64: 8, 32>}]} {
    %c96 = arith.constant 96 : index
    %c0 = arith.constant 0 : index
    %0 = vector.load %arg2[%c96, %c0] : memref<328x128xf32, #tpu.memory_space<vmem>>, vector<96x128xf32>
    %1 = vector.extract_strided_slice %0 {offsets = [0, 0], sizes = [96, 24], strides = [1, 1]} : vector<96x128xf32> to vector<96x24xf32>
    %c96_0 = arith.constant 96 : index
    %c0_1 = arith.constant 0 : index
    %2 = vector.load %arg2[%c96_0, %c0_1] : memref<328x128xf32, #tpu.memory_space<vmem>>, vector<24x128xf32>
    %3 = vector.extract_strided_slice %2 {offsets = [0, 24], sizes = [24, 96], strides = [1, 1]} : vector<24x128xf32> to vector<24x96xf32>
    %c120 = arith.constant 120 : index
    %c0_2 = arith.constant 0 : index
    %4 = vector.load %arg2[%c120, %c0_2] : memref<328x128xf32, #tpu.memory_space<vmem>>, vector<8x128xf32>
    %5 = vector.extract_strided_slice %4 {offsets = [0, 24], sizes = [8, 24], strides = [1, 1]} : vector<8x128xf32> to vector<8x24xf32>
    %c0_3 = arith.constant 0 : index
    %c0_4 = arith.constant 0 : index
    %6 = vector.load %arg2[%c0_3, %c0_4] : memref<328x128xf32, #tpu.memory_space<vmem>>, vector<96x128xf32>
    %7 = vector.extract_strided_slice %6 {offsets = [0, 96], sizes = [96, 32], strides = [1, 1]} : vector<96x128xf32> to vector<96x32xf32>
    %c0_5 = arith.constant 0 : index
    %c0_6 = arith.constant 0 : index
    %8 = vector.load %arg2[%c0_5, %c0_6] : memref<328x128xf32, #tpu.memory_space<vmem>>, vector<96x128xf32>
    %9 = vector.extract_strided_slice %8 {offsets = [0, 0], sizes = [96, 96], strides = [1, 1]} : vector<96x128xf32> to vector<96x96xf32>
    %c0_7 = arith.constant 0 : index
    %c0_8 = arith.constant 0 : index
    %10 = vector.load %arg1[%c0_7, %c0_8] : memref<24x32xf32, #tpu.memory_space<vmem>>, vector<24x32xf32>
    %c128 = arith.constant 128 : index
    %c0_9 = arith.constant 0 : index
    %11 = vector.load %arg2[%c128, %c0_9] : memref<328x128xf32, #tpu.memory_space<vmem>>, vector<24x128xf32>
    %12 = vector.extract_strided_slice %11 {offsets = [0, 24], sizes = [24, 32], strides = [1, 1]} : vector<24x128xf32> to vector<24x32xf32>
    %13 = arith.addf %10, %12 : vector<24x32xf32>
    %c192 = arith.constant 192 : index
    %c0_10 = arith.constant 0 : index
    %14 = vector.load %arg2[%c192, %c0_10] : memref<328x128xf32, #tpu.memory_space<vmem>>, vector<32x128xf32>
    %15 = vector.extract_strided_slice %14 {offsets = [0, 32], sizes = [32, 96], strides = [1, 1]} : vector<32x128xf32> to vector<32x96xf32>
    %cst = arith.constant dense<0.000000e+00> : vector<24x96xf32>
    %16 = tpu.matmul %13, %15, %cst {dimension_numbers = #tpu.dot_dimension_numbers<[1], [0], [0], [1], [0, 0, 1, 1], [], []>} : vector<24x32xf32>, vector<32x96xf32>, vector<24x96xf32> -> vector<24x96xf32>
    %c320 = arith.constant 320 : index
    %c0_11 = arith.constant 0 : index
    %17 = vector.load %arg2[%c320, %c0_11] : memref<328x128xf32, #tpu.memory_space<vmem>>, vector<8x128xf32>
    %18 = vector.extract_strided_slice %17 {offsets = [0, 0], sizes = [1, 96], strides = [1, 1]} : vector<8x128xf32> to vector<1x96xf32>
    %19 = vector.broadcast %18 : vector<1x96xf32> to vector<24x96xf32>
    %20 = arith.addf %16, %19 : vector<24x96xf32>
    %cst_12 = arith.constant dense<0.000000e+00> : vector<96x96xf32>
    %21 = tpu.matmul %1, %20, %cst_12 {dimension_numbers = #tpu.dot_dimension_numbers<[1], [0], [0], [1], [0, 0, 1, 1], [], []>} : vector<96x24xf32>, vector<24x96xf32>, vector<96x96xf32> -> vector<96x96xf32>
    %22 = vector.extract_strided_slice %21 {offsets = [0, 0], sizes = [96, 32], strides = [1, 1]} : vector<96x96xf32> to vector<96x32xf32>
    %23 = arith.mulf %22, %7 : vector<96x32xf32>
    %24 = vector.extract_strided_slice %21 {offsets = [0, 32], sizes = [96, 32], strides = [1, 1]} : vector<96x96xf32> to vector<96x32xf32>
    %25 = vector.extract_strided_slice %21 {offsets = [0, 64], sizes = [96, 32], strides = [1, 1]} : vector<96x96xf32> to vector<96x32xf32>
    %26 = arith.mulf %25, %7 : vector<96x32xf32>
    %cst_13 = arith.constant dense<0.000000e+00> : vector<96x96xf32>
    %27 = tpu.matmul %23, %24, %cst_13 {dimension_numbers = #tpu.dot_dimension_numbers<[1], [1], [0], [0], [0, 0, 1, 0], [], []>} : vector<96x32xf32>, vector<96x32xf32>, vector<96x96xf32> -> vector<96x96xf32>
    %28 = arith.addf %27, %9 : vector<96x96xf32>
    %cst_14 = arith.constant dense<0xFF800000> : vector<96xf32>
    %29 = vector.multi_reduction <maximumf>, %28, %cst_14 [1] : vector<96x96xf32> to vector<96xf32>
    %30 = vector.shape_cast %29 : vector<96xf32> to vector<96x1xf32>
    %31 = vector.broadcast %30 : vector<96x1xf32> to vector<96x96xf32>
    %32 = arith.subf %28, %31 : vector<96x96xf32>
    %33 = math.exp %32 : vector<96x96xf32>
    %cst_15 = arith.constant dense<0.000000e+00> : vector<96xf32>
    %34 = vector.multi_reduction <add>, %33, %cst_15 [1] : vector<96x96xf32> to vector<96xf32>
    %35 = vector.shape_cast %34 : vector<96xf32> to vector<96x1xf32>
    %36 = tpu.reciprocal %35 {approx = true} : vector<96x1xf32> -> vector<96x1xf32>
    %37 = vector.broadcast %36 : vector<96x1xf32> to vector<96x96xf32>
    %38 = arith.mulf %33, %37 : vector<96x96xf32>
    %cst_16 = arith.constant dense<0.000000e+00> : vector<96x32xf32>
    %39 = tpu.matmul %38, %26, %cst_16 {dimension_numbers = #tpu.dot_dimension_numbers<[1], [0], [0], [1], [0, 0, 1, 1], [], []>} : vector<96x96xf32>, vector<96x32xf32>, vector<96x32xf32> -> vector<96x32xf32>
    %cst_17 = arith.constant dense<0.000000e+00> : vector<24x32xf32>
    %40 = tpu.matmul %3, %39, %cst_17 {dimension_numbers = #tpu.dot_dimension_numbers<[1], [0], [0], [1], [0, 0, 1, 1], [], []>} : vector<24x96xf32>, vector<96x32xf32>, vector<24x32xf32> -> vector<24x32xf32>
    %c224 = arith.constant 224 : index
    %c0_18 = arith.constant 0 : index
    %41 = vector.load %arg2[%c224, %c0_18] : memref<328x128xf32, #tpu.memory_space<vmem>>, vector<32x128xf32>
    %42 = vector.extract_strided_slice %41 {offsets = [0, 96], sizes = [32, 32], strides = [1, 1]} : vector<32x128xf32> to vector<32x32xf32>
    %cst_19 = arith.constant dense<0.000000e+00> : vector<24x32xf32>
    %43 = tpu.matmul %40, %42, %cst_19 {dimension_numbers = #tpu.dot_dimension_numbers<[1], [0], [0], [1], [0, 0, 1, 1], [], []>} : vector<24x32xf32>, vector<32x32xf32>, vector<24x32xf32> -> vector<24x32xf32>
    %c320_20 = arith.constant 320 : index
    %c0_21 = arith.constant 0 : index
    %44 = vector.load %arg2[%c320_20, %c0_21] : memref<328x128xf32, #tpu.memory_space<vmem>>, vector<8x128xf32>
    %45 = vector.extract_strided_slice %44 {offsets = [0, 96], sizes = [1, 32], strides = [1, 1]} : vector<8x128xf32> to vector<1x32xf32>
    %46 = vector.broadcast %45 : vector<1x32xf32> to vector<24x32xf32>
    %47 = arith.addf %43, %46 : vector<24x32xf32>
    %48 = arith.addf %13, %47 : vector<24x32xf32>
    %c320_22 = arith.constant 320 : index
    %c0_23 = arith.constant 0 : index
    %49 = vector.load %arg2[%c320_22, %c0_23] : memref<328x128xf32, #tpu.memory_space<vmem>>, vector<8x128xf32>
    %50 = vector.extract_strided_slice %49 {offsets = [1, 64], sizes = [1, 32], strides = [1, 1]} : vector<8x128xf32> to vector<1x32xf32>
    %c320_24 = arith.constant 320 : index
    %c0_25 = arith.constant 0 : index
    %51 = vector.load %arg2[%c320_24, %c0_25] : memref<328x128xf32, #tpu.memory_space<vmem>>, vector<8x128xf32>
    %52 = vector.extract_strided_slice %51 {offsets = [1, 96], sizes = [1, 32], strides = [1, 1]} : vector<8x128xf32> to vector<1x32xf32>
    %cst_26 = arith.constant dense<0.000000e+00> : vector<24xf32>
    %53 = vector.multi_reduction <add>, %48, %cst_26 [1] : vector<24x32xf32> to vector<24xf32>
    %54 = vector.shape_cast %53 : vector<24xf32> to vector<24x1xf32>
    %cst_27 = arith.constant 3.200000e+01 : f32
    %55 = vector.broadcast %cst_27 : f32 to vector<24x1xf32>
    %56 = arith.divf %54, %55 : vector<24x1xf32>
    %57 = arith.mulf %48, %48 : vector<24x32xf32>
    %cst_28 = arith.constant dense<0.000000e+00> : vector<24xf32>
    %58 = vector.multi_reduction <add>, %57, %cst_28 [1] : vector<24x32xf32> to vector<24xf32>
    %59 = vector.shape_cast %58 : vector<24xf32> to vector<24x1xf32>
    %cst_29 = arith.constant 3.200000e+01 : f32
    %60 = vector.broadcast %cst_29 : f32 to vector<24x1xf32>
    %61 = arith.divf %59, %60 : vector<24x1xf32>
    %62 = arith.mulf %56, %56 : vector<24x1xf32>
    %63 = arith.subf %61, %62 : vector<24x1xf32>
    %64 = vector.broadcast %56 : vector<24x1xf32> to vector<24x32xf32>
    %65 = arith.subf %48, %64 : vector<24x32xf32>
    %cst_30 = arith.constant 9.99999974E-6 : f32
    %66 = vector.broadcast %cst_30 : f32 to vector<24x1xf32>
    %67 = arith.addf %63, %66 : vector<24x1xf32>
    %68 = math.rsqrt %67 : vector<24x1xf32>
    %69 = vector.broadcast %68 : vector<24x1xf32> to vector<24x32xf32>
    %70 = arith.mulf %65, %69 : vector<24x32xf32>
    %71 = vector.broadcast %50 : vector<1x32xf32> to vector<24x32xf32>
    %72 = arith.mulf %70, %71 : vector<24x32xf32>
    %73 = vector.broadcast %52 : vector<1x32xf32> to vector<24x32xf32>
    %74 = arith.addf %72, %73 : vector<24x32xf32>
    %c224_31 = arith.constant 224 : index
    %c0_32 = arith.constant 0 : index
    %75 = vector.load %arg2[%c224_31, %c0_32] : memref<328x128xf32, #tpu.memory_space<vmem>>, vector<32x128xf32>
    %76 = vector.extract_strided_slice %75 {offsets = [0, 32], sizes = [32, 64], strides = [1, 1]} : vector<32x128xf32> to vector<32x64xf32>
    %cst_33 = arith.constant dense<0.000000e+00> : vector<24x64xf32>
    %77 = tpu.matmul %74, %76, %cst_33 {dimension_numbers = #tpu.dot_dimension_numbers<[1], [0], [0], [1], [0, 0, 1, 1], [], []>} : vector<24x32xf32>, vector<32x64xf32>, vector<24x64xf32> -> vector<24x64xf32>
    %c320_34 = arith.constant 320 : index
    %c0_35 = arith.constant 0 : index
    %78 = vector.load %arg2[%c320_34, %c0_35] : memref<328x128xf32, #tpu.memory_space<vmem>>, vector<8x128xf32>
    %79 = vector.extract_strided_slice %78 {offsets = [1, 0], sizes = [1, 64], strides = [1, 1]} : vector<8x128xf32> to vector<1x64xf32>
    %80 = vector.broadcast %79 : vector<1x64xf32> to vector<24x64xf32>
    %81 = arith.addf %77, %80 : vector<24x64xf32>
    %cst_36 = arith.constant 0.000000e+00 : f32
    %82 = vector.broadcast %cst_36 : f32 to vector<24x64xf32>
    %83 = arith.maximumf %81, %82 : vector<24x64xf32>
    %c192_37 = arith.constant 192 : index
    %c0_38 = arith.constant 0 : index
    %84 = vector.load %arg2[%c192_37, %c0_38] : memref<328x128xf32, #tpu.memory_space<vmem>>, vector<64x128xf32>
    %85 = vector.extract_strided_slice %84 {offsets = [0, 0], sizes = [64, 32], strides = [1, 1]} : vector<64x128xf32> to vector<64x32xf32>
    %cst_39 = arith.constant dense<0.000000e+00> : vector<24x32xf32>
    %86 = tpu.matmul %83, %85, %cst_39 {dimension_numbers = #tpu.dot_dimension_numbers<[1], [0], [0], [1], [0, 0, 1, 1], [], []>} : vector<24x64xf32>, vector<64x32xf32>, vector<24x32xf32> -> vector<24x32xf32>
    %c320_40 = arith.constant 320 : index
    %c0_41 = arith.constant 0 : index
    %87 = vector.load %arg2[%c320_40, %c0_41] : memref<328x128xf32, #tpu.memory_space<vmem>>, vector<8x128xf32>
    %88 = vector.extract_strided_slice %87 {offsets = [2, 0], sizes = [1, 32], strides = [1, 1]} : vector<8x128xf32> to vector<1x32xf32>
    %89 = vector.broadcast %88 : vector<1x32xf32> to vector<24x32xf32>
    %90 = arith.addf %86, %89 : vector<24x32xf32>
    %91 = arith.addf %74, %90 : vector<24x32xf32>
    %c320_42 = arith.constant 320 : index
    %c0_43 = arith.constant 0 : index
    %92 = vector.load %arg2[%c320_42, %c0_43] : memref<328x128xf32, #tpu.memory_space<vmem>>, vector<8x128xf32>
    %93 = vector.extract_strided_slice %92 {offsets = [2, 32], sizes = [1, 32], strides = [1, 1]} : vector<8x128xf32> to vector<1x32xf32>
    %c320_44 = arith.constant 320 : index
    %c0_45 = arith.constant 0 : index
    %94 = vector.load %arg2[%c320_44, %c0_45] : memref<328x128xf32, #tpu.memory_space<vmem>>, vector<8x128xf32>
    %95 = vector.extract_strided_slice %94 {offsets = [2, 64], sizes = [1, 32], strides = [1, 1]} : vector<8x128xf32> to vector<1x32xf32>
    %cst_46 = arith.constant dense<0.000000e+00> : vector<24xf32>
    %96 = vector.multi_reduction <add>, %91, %cst_46 [1] : vector<24x32xf32> to vector<24xf32>
    %97 = vector.shape_cast %96 : vector<24xf32> to vector<24x1xf32>
    %cst_47 = arith.constant 3.200000e+01 : f32
    %98 = vector.broadcast %cst_47 : f32 to vector<24x1xf32>
    %99 = arith.divf %97, %98 : vector<24x1xf32>
    %100 = arith.mulf %91, %91 : vector<24x32xf32>
    %cst_48 = arith.constant dense<0.000000e+00> : vector<24xf32>
    %101 = vector.multi_reduction <add>, %100, %cst_48 [1] : vector<24x32xf32> to vector<24xf32>
    %102 = vector.shape_cast %101 : vector<24xf32> to vector<24x1xf32>
    %cst_49 = arith.constant 3.200000e+01 : f32
    %103 = vector.broadcast %cst_49 : f32 to vector<24x1xf32>
    %104 = arith.divf %102, %103 : vector<24x1xf32>
    %105 = arith.mulf %99, %99 : vector<24x1xf32>
    %106 = arith.subf %104, %105 : vector<24x1xf32>
    %107 = vector.broadcast %99 : vector<24x1xf32> to vector<24x32xf32>
    %108 = arith.subf %91, %107 : vector<24x32xf32>
    %cst_50 = arith.constant 9.99999974E-6 : f32
    %109 = vector.broadcast %cst_50 : f32 to vector<24x1xf32>
    %110 = arith.addf %106, %109 : vector<24x1xf32>
    %111 = math.rsqrt %110 : vector<24x1xf32>
    %112 = vector.broadcast %111 : vector<24x1xf32> to vector<24x32xf32>
    %113 = arith.mulf %108, %112 : vector<24x32xf32>
    %114 = vector.broadcast %93 : vector<1x32xf32> to vector<24x32xf32>
    %115 = arith.mulf %113, %114 : vector<24x32xf32>
    %116 = vector.broadcast %95 : vector<1x32xf32> to vector<24x32xf32>
    %117 = arith.addf %115, %116 : vector<24x32xf32>
    %c256 = arith.constant 256 : index
    %c0_51 = arith.constant 0 : index
    %118 = vector.load %arg2[%c256, %c0_51] : memref<328x128xf32, #tpu.memory_space<vmem>>, vector<32x128xf32>
    %119 = vector.extract_strided_slice %118 {offsets = [0, 32], sizes = [32, 96], strides = [1, 1]} : vector<32x128xf32> to vector<32x96xf32>
    %cst_52 = arith.constant dense<0.000000e+00> : vector<24x96xf32>
    %120 = tpu.matmul %117, %119, %cst_52 {dimension_numbers = #tpu.dot_dimension_numbers<[1], [0], [0], [1], [0, 0, 1, 1], [], []>} : vector<24x32xf32>, vector<32x96xf32>, vector<24x96xf32> -> vector<24x96xf32>
    %c320_53 = arith.constant 320 : index
    %c0_54 = arith.constant 0 : index
    %121 = vector.load %arg2[%c320_53, %c0_54] : memref<328x128xf32, #tpu.memory_space<vmem>>, vector<8x128xf32>
    %122 = vector.extract_strided_slice %121 {offsets = [3, 0], sizes = [1, 96], strides = [1, 1]} : vector<8x128xf32> to vector<1x96xf32>
    %123 = vector.broadcast %122 : vector<1x96xf32> to vector<24x96xf32>
    %124 = arith.addf %120, %123 : vector<24x96xf32>
    %cst_55 = arith.constant dense<0.000000e+00> : vector<96x96xf32>
    %125 = tpu.matmul %1, %124, %cst_55 {dimension_numbers = #tpu.dot_dimension_numbers<[1], [0], [0], [1], [0, 0, 1, 1], [], []>} : vector<96x24xf32>, vector<24x96xf32>, vector<96x96xf32> -> vector<96x96xf32>
    %126 = vector.extract_strided_slice %125 {offsets = [0, 0], sizes = [96, 32], strides = [1, 1]} : vector<96x96xf32> to vector<96x32xf32>
    %127 = arith.mulf %126, %7 : vector<96x32xf32>
    %128 = vector.extract_strided_slice %125 {offsets = [0, 32], sizes = [96, 32], strides = [1, 1]} : vector<96x96xf32> to vector<96x32xf32>
    %129 = vector.extract_strided_slice %125 {offsets = [0, 64], sizes = [96, 32], strides = [1, 1]} : vector<96x96xf32> to vector<96x32xf32>
    %130 = arith.mulf %129, %7 : vector<96x32xf32>
    %cst_56 = arith.constant dense<0.000000e+00> : vector<96x96xf32>
    %131 = tpu.matmul %127, %128, %cst_56 {dimension_numbers = #tpu.dot_dimension_numbers<[1], [1], [0], [0], [0, 0, 1, 0], [], []>} : vector<96x32xf32>, vector<96x32xf32>, vector<96x96xf32> -> vector<96x96xf32>
    %132 = arith.addf %131, %9 : vector<96x96xf32>
    %cst_57 = arith.constant dense<0xFF800000> : vector<96xf32>
    %133 = vector.multi_reduction <maximumf>, %132, %cst_57 [1] : vector<96x96xf32> to vector<96xf32>
    %134 = vector.shape_cast %133 : vector<96xf32> to vector<96x1xf32>
    %135 = vector.broadcast %134 : vector<96x1xf32> to vector<96x96xf32>
    %136 = arith.subf %132, %135 : vector<96x96xf32>
    %137 = math.exp %136 : vector<96x96xf32>
    %cst_58 = arith.constant dense<0.000000e+00> : vector<96xf32>
    %138 = vector.multi_reduction <add>, %137, %cst_58 [1] : vector<96x96xf32> to vector<96xf32>
    %139 = vector.shape_cast %138 : vector<96xf32> to vector<96x1xf32>
    %140 = tpu.reciprocal %139 {approx = true} : vector<96x1xf32> -> vector<96x1xf32>
    %141 = vector.broadcast %140 : vector<96x1xf32> to vector<96x96xf32>
    %142 = arith.mulf %137, %141 : vector<96x96xf32>
    %cst_59 = arith.constant dense<0.000000e+00> : vector<96x32xf32>
    %143 = tpu.matmul %142, %130, %cst_59 {dimension_numbers = #tpu.dot_dimension_numbers<[1], [0], [0], [1], [0, 0, 1, 1], [], []>} : vector<96x96xf32>, vector<96x32xf32>, vector<96x32xf32> -> vector<96x32xf32>
    %cst_60 = arith.constant dense<0.000000e+00> : vector<24x32xf32>
    %144 = tpu.matmul %3, %143, %cst_60 {dimension_numbers = #tpu.dot_dimension_numbers<[1], [0], [0], [1], [0, 0, 1, 1], [], []>} : vector<24x96xf32>, vector<96x32xf32>, vector<24x32xf32> -> vector<24x32xf32>
    %c288 = arith.constant 288 : index
    %c0_61 = arith.constant 0 : index
    %145 = vector.load %arg2[%c288, %c0_61] : memref<328x128xf32, #tpu.memory_space<vmem>>, vector<32x128xf32>
    %146 = vector.extract_strided_slice %145 {offsets = [0, 96], sizes = [32, 32], strides = [1, 1]} : vector<32x128xf32> to vector<32x32xf32>
    %cst_62 = arith.constant dense<0.000000e+00> : vector<24x32xf32>
    %147 = tpu.matmul %144, %146, %cst_62 {dimension_numbers = #tpu.dot_dimension_numbers<[1], [0], [0], [1], [0, 0, 1, 1], [], []>} : vector<24x32xf32>, vector<32x32xf32>, vector<24x32xf32> -> vector<24x32xf32>
    %c320_63 = arith.constant 320 : index
    %c0_64 = arith.constant 0 : index
    %148 = vector.load %arg2[%c320_63, %c0_64] : memref<328x128xf32, #tpu.memory_space<vmem>>, vector<8x128xf32>
    %149 = vector.extract_strided_slice %148 {offsets = [3, 96], sizes = [1, 32], strides = [1, 1]} : vector<8x128xf32> to vector<1x32xf32>
    %150 = vector.broadcast %149 : vector<1x32xf32> to vector<24x32xf32>
    %151 = arith.addf %147, %150 : vector<24x32xf32>
    %152 = arith.addf %117, %151 : vector<24x32xf32>
    %c320_65 = arith.constant 320 : index
    %c0_66 = arith.constant 0 : index
    %153 = vector.load %arg2[%c320_65, %c0_66] : memref<328x128xf32, #tpu.memory_space<vmem>>, vector<8x128xf32>
    %154 = vector.extract_strided_slice %153 {offsets = [4, 64], sizes = [1, 32], strides = [1, 1]} : vector<8x128xf32> to vector<1x32xf32>
    %c320_67 = arith.constant 320 : index
    %c0_68 = arith.constant 0 : index
    %155 = vector.load %arg2[%c320_67, %c0_68] : memref<328x128xf32, #tpu.memory_space<vmem>>, vector<8x128xf32>
    %156 = vector.extract_strided_slice %155 {offsets = [4, 96], sizes = [1, 32], strides = [1, 1]} : vector<8x128xf32> to vector<1x32xf32>
    %cst_69 = arith.constant dense<0.000000e+00> : vector<24xf32>
    %157 = vector.multi_reduction <add>, %152, %cst_69 [1] : vector<24x32xf32> to vector<24xf32>
    %158 = vector.shape_cast %157 : vector<24xf32> to vector<24x1xf32>
    %cst_70 = arith.constant 3.200000e+01 : f32
    %159 = vector.broadcast %cst_70 : f32 to vector<24x1xf32>
    %160 = arith.divf %158, %159 : vector<24x1xf32>
    %161 = arith.mulf %152, %152 : vector<24x32xf32>
    %cst_71 = arith.constant dense<0.000000e+00> : vector<24xf32>
    %162 = vector.multi_reduction <add>, %161, %cst_71 [1] : vector<24x32xf32> to vector<24xf32>
    %163 = vector.shape_cast %162 : vector<24xf32> to vector<24x1xf32>
    %cst_72 = arith.constant 3.200000e+01 : f32
    %164 = vector.broadcast %cst_72 : f32 to vector<24x1xf32>
    %165 = arith.divf %163, %164 : vector<24x1xf32>
    %166 = arith.mulf %160, %160 : vector<24x1xf32>
    %167 = arith.subf %165, %166 : vector<24x1xf32>
    %168 = vector.broadcast %160 : vector<24x1xf32> to vector<24x32xf32>
    %169 = arith.subf %152, %168 : vector<24x32xf32>
    %cst_73 = arith.constant 9.99999974E-6 : f32
    %170 = vector.broadcast %cst_73 : f32 to vector<24x1xf32>
    %171 = arith.addf %167, %170 : vector<24x1xf32>
    %172 = math.rsqrt %171 : vector<24x1xf32>
    %173 = vector.broadcast %172 : vector<24x1xf32> to vector<24x32xf32>
    %174 = arith.mulf %169, %173 : vector<24x32xf32>
    %175 = vector.broadcast %154 : vector<1x32xf32> to vector<24x32xf32>
    %176 = arith.mulf %174, %175 : vector<24x32xf32>
    %177 = vector.broadcast %156 : vector<1x32xf32> to vector<24x32xf32>
    %178 = arith.addf %176, %177 : vector<24x32xf32>
    %c288_74 = arith.constant 288 : index
    %c0_75 = arith.constant 0 : index
    %179 = vector.load %arg2[%c288_74, %c0_75] : memref<328x128xf32, #tpu.memory_space<vmem>>, vector<32x128xf32>
    %180 = vector.extract_strided_slice %179 {offsets = [0, 32], sizes = [32, 64], strides = [1, 1]} : vector<32x128xf32> to vector<32x64xf32>
    %cst_76 = arith.constant dense<0.000000e+00> : vector<24x64xf32>
    %181 = tpu.matmul %178, %180, %cst_76 {dimension_numbers = #tpu.dot_dimension_numbers<[1], [0], [0], [1], [0, 0, 1, 1], [], []>} : vector<24x32xf32>, vector<32x64xf32>, vector<24x64xf32> -> vector<24x64xf32>
    %c320_77 = arith.constant 320 : index
    %c0_78 = arith.constant 0 : index
    %182 = vector.load %arg2[%c320_77, %c0_78] : memref<328x128xf32, #tpu.memory_space<vmem>>, vector<8x128xf32>
    %183 = vector.extract_strided_slice %182 {offsets = [4, 0], sizes = [1, 64], strides = [1, 1]} : vector<8x128xf32> to vector<1x64xf32>
    %184 = vector.broadcast %183 : vector<1x64xf32> to vector<24x64xf32>
    %185 = arith.addf %181, %184 : vector<24x64xf32>
    %cst_79 = arith.constant 0.000000e+00 : f32
    %186 = vector.broadcast %cst_79 : f32 to vector<24x64xf32>
    %187 = arith.maximumf %185, %186 : vector<24x64xf32>
    %c256_80 = arith.constant 256 : index
    %c0_81 = arith.constant 0 : index
    %188 = vector.load %arg2[%c256_80, %c0_81] : memref<328x128xf32, #tpu.memory_space<vmem>>, vector<64x128xf32>
    %189 = vector.extract_strided_slice %188 {offsets = [0, 0], sizes = [64, 32], strides = [1, 1]} : vector<64x128xf32> to vector<64x32xf32>
    %cst_82 = arith.constant dense<0.000000e+00> : vector<24x32xf32>
    %190 = tpu.matmul %187, %189, %cst_82 {dimension_numbers = #tpu.dot_dimension_numbers<[1], [0], [0], [1], [0, 0, 1, 1], [], []>} : vector<24x64xf32>, vector<64x32xf32>, vector<24x32xf32> -> vector<24x32xf32>
    %c320_83 = arith.constant 320 : index
    %c0_84 = arith.constant 0 : index
    %191 = vector.load %arg2[%c320_83, %c0_84] : memref<328x128xf32, #tpu.memory_space<vmem>>, vector<8x128xf32>
    %192 = vector.extract_strided_slice %191 {offsets = [5, 0], sizes = [1, 32], strides = [1, 1]} : vector<8x128xf32> to vector<1x32xf32>
    %193 = vector.broadcast %192 : vector<1x32xf32> to vector<24x32xf32>
    %194 = arith.addf %190, %193 : vector<24x32xf32>
    %195 = arith.addf %178, %194 : vector<24x32xf32>
    %c320_85 = arith.constant 320 : index
    %c0_86 = arith.constant 0 : index
    %196 = vector.load %arg2[%c320_85, %c0_86] : memref<328x128xf32, #tpu.memory_space<vmem>>, vector<8x128xf32>
    %197 = vector.extract_strided_slice %196 {offsets = [5, 32], sizes = [1, 32], strides = [1, 1]} : vector<8x128xf32> to vector<1x32xf32>
    %c320_87 = arith.constant 320 : index
    %c0_88 = arith.constant 0 : index
    %198 = vector.load %arg2[%c320_87, %c0_88] : memref<328x128xf32, #tpu.memory_space<vmem>>, vector<8x128xf32>
    %199 = vector.extract_strided_slice %198 {offsets = [5, 64], sizes = [1, 32], strides = [1, 1]} : vector<8x128xf32> to vector<1x32xf32>
    %cst_89 = arith.constant dense<0.000000e+00> : vector<24xf32>
    %200 = vector.multi_reduction <add>, %195, %cst_89 [1] : vector<24x32xf32> to vector<24xf32>
    %201 = vector.shape_cast %200 : vector<24xf32> to vector<24x1xf32>
    %cst_90 = arith.constant 3.200000e+01 : f32
    %202 = vector.broadcast %cst_90 : f32 to vector<24x1xf32>
    %203 = arith.divf %201, %202 : vector<24x1xf32>
    %204 = arith.mulf %195, %195 : vector<24x32xf32>
    %cst_91 = arith.constant dense<0.000000e+00> : vector<24xf32>
    %205 = vector.multi_reduction <add>, %204, %cst_91 [1] : vector<24x32xf32> to vector<24xf32>
    %206 = vector.shape_cast %205 : vector<24xf32> to vector<24x1xf32>
    %cst_92 = arith.constant 3.200000e+01 : f32
    %207 = vector.broadcast %cst_92 : f32 to vector<24x1xf32>
    %208 = arith.divf %206, %207 : vector<24x1xf32>
    %209 = arith.mulf %203, %203 : vector<24x1xf32>
    %210 = arith.subf %208, %209 : vector<24x1xf32>
    %211 = vector.broadcast %203 : vector<24x1xf32> to vector<24x32xf32>
    %212 = arith.subf %195, %211 : vector<24x32xf32>
    %cst_93 = arith.constant 9.99999974E-6 : f32
    %213 = vector.broadcast %cst_93 : f32 to vector<24x1xf32>
    %214 = arith.addf %210, %213 : vector<24x1xf32>
    %215 = math.rsqrt %214 : vector<24x1xf32>
    %216 = vector.broadcast %215 : vector<24x1xf32> to vector<24x32xf32>
    %217 = arith.mulf %212, %216 : vector<24x32xf32>
    %218 = vector.broadcast %197 : vector<1x32xf32> to vector<24x32xf32>
    %219 = arith.mulf %217, %218 : vector<24x32xf32>
    %220 = vector.broadcast %199 : vector<1x32xf32> to vector<24x32xf32>
    %221 = arith.addf %219, %220 : vector<24x32xf32>
    %cst_94 = arith.constant dense<0.000000e+00> : vector<8x32xf32>
    %222 = tpu.matmul %5, %221, %cst_94 {dimension_numbers = #tpu.dot_dimension_numbers<[1], [0], [0], [1], [0, 0, 1, 1], [], []>} : vector<8x24xf32>, vector<24x32xf32>, vector<8x32xf32> -> vector<8x32xf32>
    %c152 = arith.constant 152 : index
    %c0_95 = arith.constant 0 : index
    %223 = vector.load %arg2[%c152, %c0_95] : memref<328x128xf32, #tpu.memory_space<vmem>>, vector<32x128xf32>
    %224 = vector.extract_strided_slice %223 {offsets = [0, 24], sizes = [32, 32], strides = [1, 1]} : vector<32x128xf32> to vector<32x32xf32>
    %cst_96 = arith.constant dense<0.000000e+00> : vector<8x32xf32>
    %225 = tpu.matmul %222, %224, %cst_96 {dimension_numbers = #tpu.dot_dimension_numbers<[1], [0], [0], [1], [0, 0, 1, 1], [], []>} : vector<8x32xf32>, vector<32x32xf32>, vector<8x32xf32> -> vector<8x32xf32>
    %c152_97 = arith.constant 152 : index
    %c0_98 = arith.constant 0 : index
    %226 = vector.load %arg2[%c152_97, %c0_98] : memref<328x128xf32, #tpu.memory_space<vmem>>, vector<8x128xf32>
    %227 = vector.extract_strided_slice %226 {offsets = [0, 56], sizes = [1, 32], strides = [1, 1]} : vector<8x128xf32> to vector<1x32xf32>
    %228 = vector.broadcast %227 : vector<1x32xf32> to vector<8x32xf32>
    %229 = arith.addf %225, %228 : vector<8x32xf32>
    %c0_99 = arith.constant 0 : index
    %c0_100 = arith.constant 0 : index
    %230 = vector.load %arg3[%c0_99, %c0_100] : memref<8x32xf32, #tpu.memory_space<vmem>>, vector<8x32xf32>
    tpu.vector_store %arg3[%c0_99, %c0_100], %229 {strides = array<i32>} : memref<8x32xf32, #tpu.memory_space<vmem>>, vector<8x32xf32>,
    return
  }
  func.func @transform_0(%arg0: i32) -> (i32, i32) {
    %c0_i32 = arith.constant 0 : i32
    %c0_i32_0 = arith.constant 0 : i32
    return %arg0, %c0_i32 : i32, i32
  }
  func.func @transform_1(%arg0: i32) -> (i32, i32) {
    %c0_i32 = arith.constant 0 : i32
    %c0_i32_0 = arith.constant 0 : i32
    %c0_i32_1 = arith.constant 0 : i32
    return %c0_i32, %c0_i32_0 : i32, i32
  }
  func.func @transform_2(%arg0: i32) -> (i32, i32) {
    %c0_i32 = arith.constant 0 : i32
    %c0_i32_0 = arith.constant 0 : i32
    return %arg0, %c0_i32 : i32, i32
  }
}

</mosaic_0001>

<bundles_post_ra>
// kernel: tpu_custom_call.1
= control target key start
LH: loop header
LB: loop body
LE: loop exit
PB: predicated region body
PF: predicated region fallthrough
CT: control target
= control target key end

     0   :  { %7 = vsyncpa [#allocation3], 0  ;;  %s5604_s0 = inlined_call_operand.vmem [shape: f32[48,32], index: 0, kind: input, shape index: {}]   ;;  %s5605_s1 = inlined_call_operand.hbm [shape: f32[328,128], index: 1, kind: input, shape index: {}]   ;;  %s5606_s2 = inlined_call_operand.hbm [shape: f32[16,32], index: 2, kind: output, shape index: {}]  }
   0x1   :  { %8 = vsyncpa [#allocation4], 0 }
   0x2   :  { %10 = vsyncpa [#allocation4 + $0x1], 0  ;;  %s4432_s9 = smov 0   ;;  %s4434_s10 = smov 0  }
   0x3   :  { %s4436_s11 = smov 0   ;;  %s4438_s12 = smov 0  }
   0x4 LB: > { %s4453_s13 = sadd.s32 4294967295, %s4404_s12   ;;  %s3285_s14 = sadd.s32 4294967294, %s4404_s12   ;;  %s4404_s12 = sphi %s4438_s12, %s5619_s12   ;;  %s4400_s11 = sphi %s4436_s11, %s5618_s11   ;;  %s4396_s10 = sphi %s4434_s10, %s5617_s10   ;;  %s4392_s9 = sphi %s4432_s9, %s5616_s9  }
   0x5   : > { %s4457_s15 = sadd.s32 1, %s4404_s12   ;;  %s70_s16 = sadd.s32 1, %s4400_s11 }
   0x6   : > { %s67_s17 = ssub.s32 %s4404_s12, %s4457_s15  ;;  %p80_p0 = scmp.ne.s32.totalorder %s4400_s11, %s4396_s10 }
   0x7   : > { %p68_p1 = scmp.eq.s32.totalorder %s67_s17, 0  ;;  %p81_p2 = scmp.eq.s32.totalorder %s4453_s13, 1 }
   0x8   : > { %p86_p3 = scmp.ne.s32.totalorder %s4396_s10, %s4392_s9  ;;  %p87_p4 = scmp.eq.s32.totalorder %s3285_s14, 1 }
   0x9   : > { %s4468_s18 = scalar_select %p68_p1, %s4400_s11, %s70_s16  }
   0xa   : > { %p4470_p5 = por %p81_p2, %p80_p0  ;;  %p4474_p6 = por %p87_p4, %p86_p3 }
   0xb   : > { %p3286_p7 = scmp.ge.s32.totalorder %s4404_s12, 1  ;;  %p94_p8 = scmp.lt.s32.totalorder %s4404_s12, 3 }
   0xc   : > { %s5611_s20 = scalar_select %p4474_p6, 1, 0 }
   0xd   : > { %p4122_p9 = scmp.eq.s32.totalorder %s4453_s13, 0  ;;  %p4481_p10 = pnand %p3286_p7, %p94_p8 }
   0xe   : > { %s4406_s22 = smov [#allocation2]  }
   0xf   : > { %s106_s23 = sshll.u32 %s4406_s22, 4  ;;  %p4114_p11 = pneg %p4481_p10  ;;  %s107_s23 = int_to_ptr.vmem [resolvable:$true] %s106_s23 }
  0x10   : > { %s4325_s24 = scalar_lea.vmem %s107_s23, 5248  ;;  %p4333_p3 = scmp.lt.s32.totalorder %s107_s23, %s107_s23 }
  0x11   : > { %p4115_p12 = pnand %p4122_p9, %p4114_p11  ;;  %p4326_p0 = scmp.ne.s32.totalorder %s107_s23, %s4325_s24 }
  0x12   : > { %p4334_p4 = scmp.lt.s32.totalorder %s4325_s24, %s4325_s24 }
  0x13   : > { %p4316_p13 = pneg %p4115_p12 }
  0x14   : > { %p4335_p6 = por %p4334_p4, %p4333_p3 }
  0x15   : > { %p4328_p1 = pnand %p4326_p0, %p4316_p13 }
  0x17   : > { %p4329_p2 = pneg %p4328_p1 }
  0x19   : > { %p4336_p7 = pnand %p4335_p6, %p4329_p2 }
  0x1b   : > { %4339 = shalt.err (!%p4336_p7)
}
  0x1c   : > { %s4407_s25 = smov 128   ;;  %s4408_s26 = smov 8  }
  0x1d   : > { %4117 = dma.hbm_to_vmem [thread:$0]  (!%p4115_p12), %s5605_s1, 5248, %s107_s23, [#allocation3], %s4407_s25, %s4407_s25, %s4408_s26  }
  0x1e   : > { %131 = sbr.rel (%p4481_p10) target bundleno = 5506 (0x1582), region = 28 }
  0x23   : > { %4383 = dma.done.wait (%p4122_p9), [#allocation3], 5248  }
  0x24   : > { %4385 = vsyncadd (%p4122_p9), [#allocation3], 4294962048  ;;  %v5608_v0 = vmov 0.0   ;;  %vm4410_vm0 = vmmov 0   ;;  %v204_v1 = vld [vmem:[#allocation2 + $0xd8] sm:$0xff]  ;;  %v202_v2 = vld [vmem:[#allocation2 + $0xc8] sm:$0xff]  ;;  %v206_v22 = vlaneseq }
  0x25   : > { %3654 = vmatprep.subr.mxu0 %v5608_v0  ;;  %3662 = vmatprep.mubr.msk.f32.mxu0 %vm4410_vm0, %v5608_v0  ;;  %s4411_s29 = smov 96   ;;  %v203_v3 = vld [vmem:[#allocation2 + $0xd0] sm:$0xff]  ;;  %v4503_v4 = vld [vmem:[#allocation2 + $0x80] sm:$0xff]  ;;  %s4412_s30 = smov 104   ;;  %v4508_v6 = vld [vmem:[#allocation2 + $0x88] sm:$0xff]  ;;  %vm226_vm1 = vcmask 261120  }
  0x26   : > { %220 = vrot.lane.b32.xlu0 %v204_v1, %s4411_s29  ;;  %216 = vrot.lane.b32.xlu1 %v202_v2, %s4411_s29  ;;  %v201_v5 = vld [vmem:[#allocation2 + $0xc0] sm:$0xff]  ;;  %v4513_v7 = vld [vmem:[#allocation2 + $0x90] sm:$0xff]  ;;  %s153_s3 = smul.u32 3, %s4453_s13  ;;  %vm316_vm2 = vcmask 195584   ;;  %v4544_v23 = vshrl.u32 %v206_v22, 7  ;;  %v4557_v36 = vld [vmem:[#allocation2 + $0x68] sm:$0xff] }
  0x27   : > { %v4540_v21 = vld [vmem:[#allocation2 + $0x60] sm:$0xff]  ;;  %v4559_v37 = vld [vmem:[#allocation2 + $0x70] sm:$0xff]  ;;  %v162_v38 = vld [vmem:[#allocation2 + $0x78] sm:$0xff]  ;;  %s4413_s8 = smov 32   ;;  %s4414_s14 = smov 64   ;;  %vm804_vm3 = vcmask 785408  }
  0x28   : > { %p154_p6 = scmp.lt.s32.totalorder %s153_s3, 5  ;;  %3677 = vmatprep.mubr.msk.f32.mxu1 %vm316_vm2, %v4540_v21  ;;  %v5607_v26 = vsub.s32 0, %v4544_v23  ;;  %v4547_v27 = vld [vmem:[#allocation2 + $0x140] sm:$0xff]  ;;  %v166_v39 = vld [vmem:[#allocation2 + $0x98] sm:$0xff]  ;;  %v168_v41 = vld [vmem:[#allocation2 + $0xa8] sm:$0xff]  ;;  %vm1529_vm4 = vcmask 523264  }
  0x29   : > { %v167_v40 = vld [vmem:[#allocation2 + $0xa0] sm:$0xff]  ;;  %v169_v42 = vld [vmem:[#allocation2 + $0xb0] sm:$0xff]  ;;  %v170_v43 = vld [vmem:[#allocation2 + $0xb8] sm:$0xff]  ;;  %s4415_s16 = smov 72   ;;  %s150_s17 = sand.u32 1, %s4396_s10  }
  0x2a   : > { %218 = vrot.lane.b32.xlu0 %v203_v3, %s4411_s29  ;;  %189 = vrot.lane.b32.xlu1 %v4503_v4, %s4412_s30  ;;  %s5621_s3 = smov (!%p154_p6, %s153_s3), 5  ;;  %v4552_v30 = vrot.slane %v4547_v27, %v5607_v26  ;;  %v4623_v56 = vld [vmem:[#allocation2 + $0x8] sm:$0xff]  ;;  %v4627_v57 = vld [vmem:[#allocation2] sm:$0xff]  ;;  %v4631_v58 = vld [vmem:[#allocation2 + $0x18] sm:$0xff]  ;;  %s3291_s21 = sshll.u32 %s150_s17, 3 }
  0x2b   : > { %s3292_s4 = sshll.u32 %s5621_s3, 3  ;;  %v4635_v59 = vld [vmem:[#allocation2 + $0x10] sm:$0xff]  ;;  %v4639_v60 = vld [vmem:[#allocation2 + $0x28] sm:$0xff]  ;;  %v4643_v61 = vld [vmem:[#allocation2 + $0x20] sm:$0xff]  ;;  %s3422_s22 = sshll.u32 %s4453_s13, 7 }
  0x2c   : > { %s157_s7 = scalar_lea.vmem %s5604_s0, %s3292_s4  ;;  %v4647_v62 = vld [vmem:[#allocation2 + $0x38] sm:$0xff]  ;;  %v4651_v63 = vld [vmem:[#allocation2 + $0x30] sm:$0xff]  ;;  %v4655_v1 = vld [vmem:[#allocation2 + $0x48] sm:$0xff]  ;;  %s152_s23 = scalar_lea.vmem [#allocation5], %s3291_s21 }
  0x2d   : > { %v183_v10 = vld [vmem:[%s157_s7] sm:$0xff]  ;;  %v184_v14 = vld [vmem:[%s157_s7 + $0x8] sm:$0xff]  ;;  %v185_v18 = vld [vmem:[%s157_s7 + $0x10] sm:$0xff]  ;;  %s3214_s24 = sshll.u32 %s152_s23, 4  ;;  %s5568_s27 = scalar_lea.hbm %s5606_s2, %s3422_s22  ;;  %s3215_s24 = int_to_ptr.vmem [resolvable:$true] %s3214_s24 }
  0x2e   : > { %214 = vrot.lane.b32.xlu0 %v201_v5, %s4411_s29  ;;  %191 = vrot.lane.b32.xlu1 %v4508_v6, %s4412_s30  ;;  %v4659_v2 = vld [vmem:[#allocation2 + $0x40] sm:$0xff]  ;;  %v4663_v3 = vld [vmem:[#allocation2 + $0x58] sm:$0xff]  ;;  %s3201_s28 = scalar_lea.sflag [#allocation4], %s150_s17  ;;  %s4416_s13 = smov [#allocation5]  }
  0x32   : > { %193 = vrot.lane.b32.xlu0 %v4513_v7, %s4412_s30 }
  0x98   : > { %v221_v8 = vpop.permute.xlu0 %220  ;;  %v217_v9 = vpop.permute.xlu1 %216 }
  0x99   : > { %3655 = vmatpush3.msra.mxu0 %v221_v8 }
  0x9a   : > { %3656 = vmatprep.subr.mxu0 %v5608_v0 }
  0x9c   : > { %v219_v11 = vpop.permute.xlu0 %218  ;;  %v190_v12 = vpop.permute.xlu1 %189 }
  0x9d   : > { %3657 = vmatpush3.msra.mxu0 %v219_v11  ;;  %v4523_v13 = vadd.f32 %v190_v12, %v183_v10 }
  0x9e   : > { %3658 = vmatprep.subr.mxu0 %v5608_v0 }
  0x9f   : > { %3659 = vmatpush3.msra.mxu0 %v217_v9 }
  0xa0   : > { %3660 = vmatprep.subr.mxu0 %v5608_v0  ;;  %v215_v15 = vpop.permute.xlu0 %214  ;;  %v192_v16 = vpop.permute.xlu1 %191 }
  0xa1   : > { %3661 = vmatpush3.msra.mxu0 %v215_v15  ;;  %v4528_v17 = vadd.f32 %v192_v16, %v184_v14 }
  0xa2   : > { %3663 = vmatmul.mubr.msk.f32.vlgmr.msra.gmra.mxu0 %vm226_vm1, %v4523_v13 }
  0xa3   : > { %3665 = vmatprep.mubr.msk.f32.mxu0 %vm4410_vm0, %v5608_v0 }
  0xa4   : > { %v194_v19 = vpop.permute.xlu0 %193 }
  0xa5   : > { %v4534_v20 = vadd.f32 %v194_v19, %v185_v18 }
  0xa6   : > { %3666 = vmatmul.mubr.msk.f32.gmra.mxu0 %vm226_vm1, %v4528_v17 }
  0xa7   : > { %3668 = vmatprep.mubr.msk.f32.mxu0 %vm4410_vm0, %v5608_v0 }
  0xaa   : > { %3669 = vmatmul.mubr.msk.f32.gmra.mxu0 %vm226_vm1, %v4534_v20 }
 0x162   : > { %v302_v24 = vpop.f32.mrf.mxu0 }
 0x163   : > { %v303_v35 = vadd.f32 %v302_v24, %v4552_v30 }
 0x164   : > { %v3664_v25 = vpop.f32.mrf.mxu0 }
 0x166   : > { %v307_v28 = vpop.f32.mrf.mxu0 }
 0x167   : > { %v308_v34 = vadd.f32 %v307_v28, %v4552_v30 }
 0x168   : > { %v3667_v29 = vpop.f32.mrf.mxu0 }
 0x16a   : > { %v312_v31 = vpop.f32.mrf.mxu0 }
 0x16b   : > { %v313_v32 = vadd.f32 %v312_v31, %v4552_v30 }
 0x16c   : > { %v3670_v33 = vpop.f32.mrf.mxu0 }
 0x16d   : > { %3671 = vmatprep.subr.mxu1 %v313_v32 }
 0x16e   : > { %3672 = vmatpush3.msra.mxu1 %v313_v32 }
 0x16f   : > { %3673 = vmatprep.subr.mxu1 %v308_v34 }
 0x170   : > { %3674 = vmatpush3.msra.mxu1 %v308_v34 }
 0x171   : > { %3675 = vmatprep.subr.mxu1 %v303_v35 }
 0x172   : > { %3676 = vmatpush3.msra.mxu1 %v303_v35 }
 0x173   : > { %3678 = vmatmul.mubr.msk.f32.vlgmr.msra.gmra.mxu1 %vm316_vm2, %v4557_v36 }
 0x174   : > { %3680 = vmatprep.mubr.msk.f32.mxu1 %vm316_vm2, %v4559_v37 }
 0x177   : > { %3681 = vmatmul.mubr.msk.f32.gmra.mxu1 %vm316_vm2, %v162_v38 }
 0x178   : > { %3683 = vmatprep.mubr.msk.f32.mxu1 %vm316_vm2, %v4503_v4  ;;  %v4667_v4 = vld [vmem:[#allocation2 + $0x50] sm:$0xff] }
 0x17b   : > { %3684 = vmatmul.mubr.msk.f32.gmra.mxu1 %vm316_vm2, %v4508_v6 }
 0x17c   : > { %3686 = vmatprep.mubr.msk.f32.mxu1 %vm316_vm2, %v4513_v7 }
 0x17f   : > { %3687 = vmatmul.mubr.msk.f32.gmra.mxu1 %vm316_vm2, %v166_v39 }
 0x180   : > { %3689 = vmatprep.mubr.msk.f32.mxu1 %vm316_vm2, %v167_v40 }
 0x183   : > { %3690 = vmatmul.mubr.msk.f32.gmra.mxu1 %vm316_vm2, %v168_v41 }
 0x184   : > { %3692 = vmatprep.mubr.msk.f32.mxu1 %vm316_vm2, %v169_v42 }
 0x187   : > { %3693 = vmatmul.mubr.msk.f32.gmra.mxu1 %vm316_vm2, %v170_v43 }
 0x233   : > { %v4577_v44 = vpop.f32.mrf.mxu1 }
 0x235   : > { %v4579_v45 = vpop.f32.mrf.mxu1 }
 0x237   : > { %v4581_v46 = vpop.f32.mrf.mxu1 }
 0x239   : > { %v4583_v47 = vpop.f32.mrf.mxu1 }
 0x23b   : > { %v4585_v48 = vpop.f32.mrf.mxu1 }
 0x23d   : > { %v4587_v49 = vpop.f32.mrf.mxu1 }
 0x23f   : > { %v4589_v50 = vpop.f32.mrf.mxu1 }
 0x241   : > { %v4591_v51 = vpop.f32.mrf.mxu1 }
 0x243   : > { %v4593_v52 = vpop.f32.mrf.mxu1 }
 0x245   : > { %v4595_v53 = vpop.f32.mrf.mxu1 }
 0x247   : > { %v4597_v54 = vpop.f32.mrf.mxu1 }
 0x248   : > { %617 = vrot.lane.b32.xlu1 %v4597_v54, %s4411_s29 }
 0x249   : > { %v4601_v55 = vpop.f32.mrf.mxu1 }
 0x24a   : > { %615 = vrot.lane.b32.xlu0 %v4601_v55, %s4411_s29 }
 0x24c   : > { %613 = vrot.lane.b32.xlu1 %v4593_v52, %s4411_s29 }
 0x24e   : > { %611 = vrot.lane.b32.xlu0 %v4595_v53, %s4411_s29 }
 0x250   : > { %609 = vrot.lane.b32.xlu1 %v4589_v50, %s4411_s29 }
 0x252   : > { %607 = vrot.lane.b32.xlu0 %v4591_v51, %s4411_s29 }
 0x254   : > { %605 = vrot.lane.b32.xlu1 %v4585_v48, %s4411_s29 }
 0x256   : > { %603 = vrot.lane.b32.xlu0 %v4587_v49, %s4411_s29 }
 0x258   : > { %601 = vrot.lane.b32.xlu1 %v4581_v46, %s4411_s29 }
 0x25a   : > { %599 = vrot.lane.b32.xlu0 %v4583_v47, %s4411_s29 }
 0x25c   : > { %597 = vrot.lane.b32.xlu1 %v4577_v44, %s4411_s29 }
 0x25e   : > { %595 = vrot.lane.b32.xlu0 %v4579_v45, %s4411_s29 }
 0x260   : > { %489 = vrot.lane.b32.xlu1 %v4623_v56, %s4413_s8 }
 0x262   : > { %487 = vrot.lane.b32.xlu0 %v4627_v57, %s4413_s8 }
 0x264   : > { %493 = vrot.lane.b32.xlu1 %v4631_v58, %s4413_s8 }
 0x266   : > { %491 = vrot.lane.b32.xlu0 %v4635_v59, %s4413_s8 }
 0x268   : > { %497 = vrot.lane.b32.xlu1 %v4639_v60, %s4413_s8 }
 0x26a   : > { %495 = vrot.lane.b32.xlu0 %v4643_v61, %s4413_s8 }
 0x26c   : > { %501 = vrot.lane.b32.xlu1 %v4647_v62, %s4413_s8 }
 0x26e   : > { %499 = vrot.lane.b32.xlu0 %v4651_v63, %s4413_s8 }
 0x270   : > { %505 = vrot.lane.b32.xlu1 %v4655_v1, %s4413_s8 }
 0x272   : > { %503 = vrot.lane.b32.xlu0 %v4659_v2, %s4413_s8 }
 0x274   : > { %509 = vrot.lane.b32.xlu1 %v4663_v3, %s4413_s8 }
 0x276   : > { %555 = vrot.lane.b32.xlu0 %v4667_v4, %s4411_s29 }
 0x278   : > { %557 = vrot.lane.b32.xlu1 %v4663_v3, %s4411_s29 }
 0x27a   : > { %549 = vrot.lane.b32.xlu0 %v4647_v62, %s4411_s29 }
 0x27c   : > { %553 = vrot.lane.b32.xlu1 %v4655_v1, %s4411_s29 }
 0x27e   : > { %545 = vrot.lane.b32.xlu0 %v4639_v60, %s4411_s29 }
 0x280   : > { %551 = vrot.lane.b32.xlu1 %v4659_v2, %s4411_s29 }
 0x282   : > { %541 = vrot.lane.b32.xlu0 %v4631_v58, %s4411_s29 }
 0x284   : > { %547 = vrot.lane.b32.xlu1 %v4651_v63, %s4411_s29 }
 0x286   : > { %537 = vrot.lane.b32.xlu0 %v4623_v56, %s4411_s29 }
 0x288   : > { %543 = vrot.lane.b32.xlu1 %v4643_v61, %s4411_s29 }
 0x28c   : > { %539 = vrot.lane.b32.xlu1 %v4635_v59, %s4411_s29 }
 0x290   : > { %535 = vrot.lane.b32.xlu1 %v4627_v57, %s4411_s29 }
 0x2ba   : > { %v618_v5 = vpop.permute.xlu1 %617 }
 0x2bb   : > { %3695 = vmatprep.subr.msk.mxu1 %vm226_vm1, %v618_v5 }
 0x2bc   : > { %3696 = vmatpush3.xpose.msk.msra.mxu1 %vm226_vm1, %v618_v5  ;;  %v616_v6 = vpop.permute.xlu0 %615 }
 0x2bd   : > { %3697 = vmatprep.subr.msk.mxu1 %vm226_vm1, %v616_v6 }
 0x2be   : > { %v614_v7 = vpop.permute.xlu1 %613 }
 0x2c0   : > { %3698 = vmatpush3.xpose.msk.msra.mxu1 %vm226_vm1, %v616_v6  ;;  %v612_v8 = vpop.permute.xlu0 %611 }
 0x2c1   : > { %3699 = vmatprep.subr.msk.mxu1 %vm226_vm1, %v614_v7 }
 0x2c2   : > { %v610_v9 = vpop.permute.xlu1 %609 }
 0x2c4   : > { %3700 = vmatpush3.xpose.msk.msra.mxu1 %vm226_vm1, %v614_v7  ;;  %v608_v10 = vpop.permute.xlu0 %607 }
 0x2c5   : > { %3701 = vmatprep.subr.msk.mxu1 %vm226_vm1, %v612_v8 }
 0x2c6   : > { %v606_v11 = vpop.permute.xlu1 %605 }
 0x2c8   : > { %3702 = vmatpush3.xpose.msk.msra.mxu1 %vm226_vm1, %v612_v8  ;;  %v604_v12 = vpop.permute.xlu0 %603 }
 0x2c9   : > { %3703 = vmatprep.subr.msk.mxu1 %vm226_vm1, %v610_v9 }
 0x2ca   : > { %v602_v14 = vpop.permute.xlu1 %601 }
 0x2cc   : > { %3704 = vmatpush3.xpose.msk.msra.mxu1 %vm226_vm1, %v610_v9  ;;  %v600_v15 = vpop.permute.xlu0 %599 }
 0x2cd   : > { %3705 = vmatprep.subr.msk.mxu1 %vm226_vm1, %v608_v10 }
 0x2ce   : > { %v598_v16 = vpop.permute.xlu1 %597 }
 0x2d0   : > { %3706 = vmatpush3.xpose.msk.msra.mxu1 %vm226_vm1, %v608_v10  ;;  %v596_v18 = vpop.permute.xlu0 %595 }
 0x2d1   : > { %3707 = vmatprep.subr.msk.mxu1 %vm226_vm1, %v606_v11 }
 0x2d2   : > { %v4708_v19 = vpop.permute.xlu1 %489 }
 0x2d3   : > { %v524_v39 = vmul.f32 %v4577_v44, %v4708_v19 }
 0x2d4   : > { %3708 = vmatpush3.xpose.msk.msra.mxu1 %vm226_vm1, %v606_v11  ;;  %v4711_v22 = vpop.permute.xlu0 %487 }
 0x2d5   : > { %3709 = vmatprep.subr.msk.mxu1 %vm226_vm1, %v604_v12  ;;  %v523_v40 = vmul.f32 %v4711_v22, %v4579_v45 }
 0x2d6   : > { %v4714_v24 = vpop.permute.xlu1 %493 }
 0x2d7   : > { %v526_v43 = vmul.f32 %v4581_v46, %v4714_v24 }
 0x2d8   : > { %3710 = vmatpush3.xpose.msk.msra.mxu1 %vm226_vm1, %v604_v12  ;;  %v4717_v25 = vpop.permute.xlu0 %491 }
 0x2d9   : > { %3711 = vmatprep.subr.msk.mxu1 %vm226_vm1, %v602_v14  ;;  %v525_v5 = vmul.f32 %v4717_v25, %v4583_v47 }
 0x2da   : > { %v4720_v28 = vpop.permute.xlu1 %497 }
 0x2db   : > { %v528_v8 = vmul.f32 %v4585_v48, %v4720_v28 }
 0x2dc   : > { %3712 = vmatpush3.xpose.msk.msra.mxu1 %vm226_vm1, %v602_v14  ;;  %v4723_v29 = vpop.permute.xlu0 %495 }
 0x2dd   : > { %3713 = vmatprep.subr.msk.mxu1 %vm226_vm1, %v600_v15  ;;  %v527_v9 = vmul.f32 %v4723_v29, %v4587_v49 }
 0x2de   : > { %v4726_v31 = vpop.permute.xlu1 %501 }
 0x2e0   : > { %3714 = vmatpush3.xpose.msk.msra.mxu1 %vm226_vm1, %v600_v15  ;;  %v4729_v32 = vpop.permute.xlu0 %499  ;;  %v530_v15 = vmul.f32 %v4589_v50, %v4726_v31 }
 0x2e1   : > { %3715 = vmatprep.subr.msk.mxu1 %vm226_vm1, %v598_v16 }
 0x2e2   : > { %v4732_v33 = vpop.permute.xlu1 %505 }
 0x2e4   : > { %3716 = vmatpush3.xpose.msk.msra.mxu1 %vm226_vm1, %v598_v16  ;;  %v4735_v34 = vpop.permute.xlu0 %503  ;;  %v529_v16 = vmul.f32 %v4729_v32, %v4591_v51 }
 0x2e5   : > { %3717 = vmatprep.subr.msk.mxu1 %vm226_vm1, %v596_v18 }
 0x2e6   : > { %v4738_v35 = vpop.permute.xlu1 %509 }
 0x2e8   : > { %3718 = vmatpush3.xpose.msk.msra.mxu1 %vm226_vm1, %v596_v18  ;;  %v4741_v38 = vpop.permute.xlu0 %555 }
 0x2e9   : > { %3829 = vmatprep.subr.mxu1 %v5608_v0 }
 0x2ea   : > { %v4748_v41 = vpop.permute.xlu1 %557 }
 0x2eb   : > { %3720 = vmatmul.mubr.msk.f32.vlgmr.msra.gmra.mxu1 %vm226_vm1, %v524_v39 }
 0x2ec   : > { %3719 = vmatprep.mubr.msk.f32.mxu1 %vm226_vm1, %v523_v40  ;;  %v4752_v42 = vpop.permute.xlu0 %549 }
 0x2ed   : > { %v578_v12 = vmul.f32 %v4589_v50, %v4752_v42  ;;  %v532_v50 = vmul.f32 %v4593_v52, %v4732_v33 }
 0x2ee   : > { %v4758_v6 = vpop.permute.xlu1 %553 }
 0x2ef   : > { %v580_v7 = vmul.f32 %v4593_v52, %v4758_v6  ;;  %3723 = vmatmul.mubr.msk.f32.gmra.mxu1 %vm226_vm1, %v526_v43  ;;  %v534_v52 = vmul.f32 %v4597_v54, %v4738_v35 }
 0x2f0   : > { %3722 = vmatprep.mubr.msk.f32.mxu1 %vm226_vm1, %v525_v5  ;;  %v4769_v10 = vpop.permute.xlu0 %545  ;;  %v531_v5 = vmul.f32 %v4735_v34, %v4595_v53 }
 0x2f1   : > { %967 = vrot.lane.b32.xlu1 %v580_v7, %s4414_s14  ;;  %v576_v39 = vmul.f32 %v4585_v48, %v4769_v10 }
 0x2f2   : > { %v4771_v11 = vpop.permute.xlu1 %551 }
 0x2f3   : > { %v579_v14 = vmul.f32 %v4771_v11, %v4595_v53  ;;  %3726 = vmatmul.mubr.msk.f32.gmra.mxu1 %vm226_vm1, %v528_v8  ;;  %v581_v53 = vmul.f32 %v4741_v38, %v4601_v55 }
 0x2f4   : > { %3725 = vmatprep.mubr.msk.f32.mxu1 %vm226_vm1, %v527_v9  ;;  %v4792_v43 = vpop.permute.xlu0 %541 }
 0x2f5   : > { %965 = vrot.lane.b32.xlu0 %v579_v14, %s4414_s14  ;;  %963 = vrot.lane.b32.xlu1 %v578_v12, %s4414_s14 }
 0x2f6   : > { %v4785_v18 = vpop.permute.xlu1 %547 }
 0x2f7   : > { %v577_v40 = vmul.f32 %v4785_v18, %v4591_v51  ;;  %3729 = vmatmul.mubr.msk.f32.gmra.mxu1 %vm226_vm1, %v530_v15  ;;  %v574_v51 = vmul.f32 %v4581_v46, %v4792_v43  ;;  %v582_v46 = vmul.f32 %v4597_v54, %v4748_v41 }
 0x2f8   : > { %3728 = vmatprep.mubr.msk.f32.mxu1 %vm226_vm1, %v529_v16  ;;  %v4826_v9 = vpop.permute.xlu0 %537 }
 0x2f9   : > { %961 = vrot.lane.b32.xlu0 %v577_v40, %s4414_s14  ;;  %959 = vrot.lane.b32.xlu1 %v576_v39, %s4414_s14 }
 0x2fa   : > { %v4801_v48 = vpop.permute.xlu1 %543 }
 0x2fb   : > { %v575_v7 = vmul.f32 %v4801_v48, %v4587_v49  ;;  %3732 = vmatmul.mubr.msk.f32.gmra.mxu1 %vm226_vm1, %v532_v50 }
 0x2fc   : > { %3731 = vmatprep.mubr.msk.f32.mxu1 %vm226_vm1, %v531_v5 }
 0x2fd   : > { %957 = vrot.lane.b32.xlu0 %v575_v7, %s4414_s14  ;;  %955 = vrot.lane.b32.xlu1 %v574_v51, %s4414_s14 }
 0x2fe   : > { %v4822_v49 = vpop.permute.xlu1 %539 }
 0x2ff   : > { %3735 = vmatmul.mubr.msk.f32.gmra.mxu1 %vm226_vm1, %v534_v52 }
 0x300   : > { %3837 = vmatprep.mubr.msk.f32.mxu1 %vm4410_vm0, %v5608_v0 }
 0x301   : > { %969 = vrot.lane.b32.xlu0 %v581_v53, %s4414_s14  ;;  %971 = vrot.lane.b32.xlu1 %v582_v46, %s4414_s14 }
 0x302   : > { %v4824_v8 = vpop.permute.xlu1 %535 }
 0x363   : > { %v968_v12 = vpop.permute.xlu1 %967 }
 0x367   : > { %v964_v14 = vpop.permute.xlu1 %963  ;;  %v966_v15 = vpop.permute.xlu0 %965 }
 0x36b   : > { %v960_v16 = vpop.permute.xlu1 %959  ;;  %v962_v54 = vpop.permute.xlu0 %961 }
 0x36f   : > { %v956_v39 = vpop.permute.xlu1 %955  ;;  %v958_v40 = vpop.permute.xlu0 %957 }
 0x373   : > { %v972_v50 = vpop.permute.xlu1 %971  ;;  %v970_v5 = vpop.permute.xlu0 %969 }
 0x374   : > { %3737 = vmatprep.subr.mxu0 %v972_v50 }
 0x375   : > { %3738 = vmatpush3.msra.mxu0 %v972_v50 }
 0x376   : > { %3739 = vmatprep.subr.mxu0 %v970_v5 }
 0x377   : > { %3740 = vmatpush3.msra.mxu0 %v970_v5 }
 0x378   : > { %3741 = vmatprep.subr.mxu0 %v968_v12 }
 0x379   : > { %3742 = vmatpush3.msra.mxu0 %v968_v12 }
 0x37a   : > { %3743 = vmatprep.subr.mxu0 %v966_v15 }
 0x37b   : > { %3744 = vmatpush3.msra.mxu0 %v966_v15 }
 0x37c   : > { %3745 = vmatprep.subr.mxu0 %v964_v14 }
 0x37d   : > { %3746 = vmatpush3.msra.mxu0 %v964_v14 }
 0x37e   : > { %3747 = vmatprep.subr.mxu0 %v962_v54 }
 0x37f   : > { %3748 = vmatpush3.msra.mxu0 %v962_v54 }
 0x380   : > { %3749 = vmatprep.subr.mxu0 %v960_v16 }
 0x381   : > { %3750 = vmatpush3.msra.mxu0 %v960_v16 }
 0x382   : > { %3751 = vmatprep.subr.mxu0 %v958_v40 }
 0x383   : > { %3752 = vmatpush3.msra.mxu0 %v958_v40 }
 0x384   : > { %3753 = vmatprep.subr.mxu0 %v956_v39 }
 0x385   : > { %3754 = vmatpush3.msra.mxu0 %v956_v39 }
 0x3ab   : > { %v3721_v51 = vpop.f32.mrf.mxu1 }
 0x3ac   : > { %v751_v7 = vadd.f32 %v3721_v51, %v4623_v56 }
 0x3ad   : > { %v745_v52 = vpop.f32.mrf.mxu1 }
 0x3ae   : > { %v746_v53 = vadd.f32 %v745_v52, %v4627_v57  ;;  %v808_v46 = vsel %vm804_vm3, %v751_v7, -inf }
 0x3af   : > { %v3724_v12 = vpop.f32.mrf.mxu1  ;;  %809 = vmax.xlane.f32.xlu1 %v808_v46 }
 0x3b0   : > { %v761_v14 = vadd.f32 %v3724_v12, %v4631_v58  ;;  %v805_v15 = vsel %vm804_vm3, %v746_v53, -inf }
 0x3b1   : > { %v755_v16 = vpop.f32.mrf.mxu1  ;;  %806 = vmax.xlane.f32.xlu0 %v805_v15 }
 0x3b2   : > { %v756_v39 = vadd.f32 %v755_v16, %v4635_v59  ;;  %v814_v40 = vsel %vm804_vm3, %v761_v14, -inf }
 0x3b3   : > { %v3727_v54 = vpop.f32.mrf.mxu1 }
 0x3b4   : > { %v771_v5 = vadd.f32 %v3727_v54, %v4639_v60  ;;  %v811_v51 = vsel %vm804_vm3, %v756_v39, -inf }
 0x3b5   : > { %v765_v50 = vpop.f32.mrf.mxu1  ;;  %815 = vmax.xlane.f32.xlu0 %v814_v40 }
 0x3b6   : > { %v766_v56 = vadd.f32 %v765_v50, %v4643_v61  ;;  %v820_v15 = vsel %vm804_vm3, %v771_v5, -inf }
 0x3b7   : > { %v3730_v57 = vpop.f32.mrf.mxu1 }
 0x3b8   : > { %v817_v58 = vsel %vm804_vm3, %v766_v56, -inf  ;;  %v781_v59 = vadd.f32 %v3730_v57, %v4647_v62 }
 0x3b9   : > { %v775_v52 = vpop.f32.mrf.mxu1  ;;  %812 = vmax.xlane.f32.xlu0 %v811_v51  ;;  %818 = vmax.xlane.f32.xlu1 %v817_v58 }
 0x3ba   : > { %v776_v46 = vadd.f32 %v775_v52, %v4651_v63  ;;  %v826_v50 = vsel %vm804_vm3, %v781_v59, -inf  ;;  %v573_v52 = vmul.f32 %v4822_v49, %v4583_v47 }
 0x3bb   : > { %v3733_v12 = vpop.f32.mrf.mxu1 }
 0x3bc   : > { %v823_v16 = vsel %vm804_vm3, %v776_v46, -inf  ;;  %v4845_v40 = vadd.f32 %v3733_v12, %v4655_v1 }
 0x3bd   : > { %v785_v61 = vpop.f32.mrf.mxu1  ;;  %821 = vmax.xlane.f32.xlu0 %v820_v15  ;;  %824 = vmax.xlane.f32.xlu1 %v823_v16 }
 0x3be   : > { %v786_v60 = vadd.f32 %v785_v61, %v4659_v2  ;;  %v832_v58 = vsel %vm804_vm3, %v4845_v40, -inf }
 0x3bf   : > { %v3736_v54 = vpop.f32.mrf.mxu1 }
 0x3c0   : > { %v829_v63 = vsel %vm804_vm3, %v786_v60, -inf  ;;  %v4851_v57 = vadd.f32 %v3736_v54, %v4663_v3 }
 0x3c1   : > { %v795_v51 = vpop.f32.mrf.mxu1  ;;  %827 = vmax.xlane.f32.xlu0 %v826_v50  ;;  %830 = vmax.xlane.f32.xlu1 %v829_v63 }
 0x3c2   : > { %v796_v62 = vadd.f32 %v795_v51, %v4667_v4  ;;  %v838_v1 = vsel %vm804_vm3, %v4851_v57, -inf }
 0x3c4   : > { %v835_v2 = vsel %vm804_vm3, %v796_v62, -inf }
 0x3c5   : > { %833 = vmax.xlane.f32.xlu0 %v832_v58  ;;  %836 = vmax.xlane.f32.xlu1 %v835_v2 }
 0x3c9   : > { %839 = vmax.xlane.f32.xlu0 %v838_v1 }
 0x3d6   : > { %507 = vrot.lane.b32.xlu1 %v4667_v4, %s4413_s8 }
 0x3df   : > { %953 = vrot.lane.b32.xlu0 %v573_v52, %s4414_s14 }
 0x438   : > { %v810_v3 = vpop.xlane.xlu1 %809 }
 0x439   : > { %v842_v12 = vsub.f32 %v751_v7, %v810_v3 }
 0x43a   : > { %v807_v15 = vpop.xlane.xlu0 %806 }
 0x43b   : > { %v855_v16 = vmul.f32 1.442695, %v842_v12  ;;  %v841_v61 = vsub.f32 %v746_v53, %v807_v15 }
 0x43d   : > { %4167 = vpow2.f32 %v855_v16  ;;  %v853_v54 = vmul.f32 1.442695, %v841_v61 }
 0x43e   : > { %v816_v50 = vpop.xlane.xlu0 %815 }
 0x43f   : > { %4169 = vpow2.f32 %v853_v54  ;;  %v844_v63 = vsub.f32 %v761_v14, %v816_v50 }
 0x441   : > { %v859_v51 = vmul.f32 1.442695, %v844_v63 }
 0x442   : > { %v819_v58 = vpop.xlane.xlu1 %818  ;;  %v813_v2 = vpop.xlane.xlu0 %812 }
 0x443   : > { %4171 = vpow2.f32 %v859_v51  ;;  %v845_v4 = vsub.f32 %v766_v56, %v819_v58  ;;  %v843_v1 = vsub.f32 %v756_v39, %v813_v2 }
 0x445   : > { %v861_v26 = vmul.f32 1.442695, %v845_v4  ;;  %v857_v47 = vmul.f32 1.442695, %v843_v1 }
 0x446   : > { %v825_v0 = vpop.xlane.xlu1 %824  ;;  %v822_v52 = vpop.xlane.xlu0 %821 }
 0x447   : > { %4173 = vpow2.f32 %v861_v26  ;;  %v847_v7 = vsub.f32 %v776_v46, %v825_v0  ;;  %v846_v3 = vsub.f32 %v771_v5, %v822_v52 }
 0x448   : > { %4175 = vpow2.f32 %v857_v47 }
 0x449   : > { %v865_v53 = vmul.f32 1.442695, %v847_v7  ;;  %v863_v12 = vmul.f32 1.442695, %v846_v3 }
 0x44a   : > { %v4863_v15 = vpop.eup %4167  ;;  %v831_v16 = vpop.xlane.xlu1 %830 }
 0x44b   : > { %v828_v14 = vpop.xlane.xlu0 %827  ;;  %4177 = vpow2.f32 %v865_v53  ;;  %v849_v61 = vsub.f32 %v786_v60, %v831_v16  ;;  %v880_v39 = vsel %vm804_vm3, %v4863_v15, 0.0 }
 0x44c   : > { %v848_v54 = vsub.f32 %v781_v59, %v828_v14  ;;  %v4867_v56 = vpop.eup %4169  ;;  %4179 = vpow2.f32 %v863_v12  ;;  %881 = vadd.xlane.f32.xlu1 %v880_v39 }
 0x44d   : > { %v869_v26 = vmul.f32 1.442695, %v849_v61  ;;  %v877_v5 = vsel %vm804_vm3, %v4867_v56, 0.0 }
 0x44e   : > { %v867_v0 = vmul.f32 1.442695, %v848_v54  ;;  %v837_v46 = vpop.xlane.xlu1 %836  ;;  %878 = vadd.xlane.f32.xlu0 %v877_v5 }
 0x44f   : > { %v834_v50 = vpop.xlane.xlu0 %833  ;;  %4181 = vpow2.f32 %v869_v26  ;;  %v851_v63 = vsub.f32 %v796_v62, %v837_v46 }
 0x450   : > { %v850_v60 = vsub.f32 %v4845_v40, %v834_v50  ;;  %v4872_v59 = vpop.eup %4171  ;;  %4183 = vpow2.f32 %v867_v0 }
 0x451   : > { %v873_v51 = vmul.f32 1.442695, %v851_v63  ;;  %v886_v2 = vsel %vm804_vm3, %v4872_v59, 0.0 }
 0x452   : > { %v871_v58 = vmul.f32 1.442695, %v850_v60  ;;  %v4876_v4 = vpop.permute.xlu1 %507  ;;  %887 = vadd.xlane.f32.xlu0 %v886_v2 }
 0x453   : > { %v840_v1 = vpop.xlane.xlu0 %839  ;;  %4185 = vpow2.f32 %v873_v51  ;;  %v533_v47 = vmul.f32 %v4876_v4, %v4601_v55  ;;  %v572_v51 = vmul.f32 %v4577_v44, %v4826_v9 }
 0x454   : > { %v852_v62 = vsub.f32 %v4851_v57, %v840_v1  ;;  %v4881_v52 = vpop.eup %4173  ;;  %4187 = vpow2.f32 %v871_v58  ;;  %v571_v58 = vmul.f32 %v4824_v8, %v4579_v45 }
 0x455   : > { %v4883_v40 = vpop.eup %4175  ;;  %3734 = vmatprep.mubr.msk.f32.mxu0 %vm226_vm1, %v533_v47  ;;  %v889_v3 = vsel %vm804_vm3, %v4881_v52, 0.0 }
 0x456   : > { %v875_v7 = vmul.f32 1.442695, %v852_v62  ;;  %890 = vadd.xlane.f32.xlu1 %v889_v3  ;;  %v883_v53 = vsel %vm804_vm3, %v4883_v40, 0.0 }
 0x457   : > { %v954_v12 = vpop.permute.xlu0 %953  ;;  %884 = vadd.xlane.f32.xlu0 %v883_v53 }
 0x458   : > { %4189 = vpow2.f32 %v875_v7  ;;  %3755 = vmatprep.subr.mxu0 %v954_v12  ;;  %v4890_v55 = vpop.eup %4177 }
 0x459   : > { %3756 = vmatpush3.msra.mxu0 %v954_v12  ;;  %v4892_v57 = vpop.eup %4179  ;;  %v895_v16 = vsel %vm804_vm3, %v4890_v55, 0.0 }
 0x45a   : > { %896 = vadd.xlane.f32.xlu1 %v895_v16  ;;  %v892_v14 = vsel %vm804_vm3, %v4892_v57, 0.0 }
 0x45b   : > { %893 = vadd.xlane.f32.xlu0 %v892_v14 }
 0x45c   : > { %v4898_v61 = vpop.eup %4181 }
 0x45d   : > { %v4900_v54 = vpop.eup %4183  ;;  %v901_v39 = vsel %vm804_vm3, %v4898_v61, 0.0 }
 0x45e   : > { %902 = vadd.xlane.f32.xlu1 %v901_v39  ;;  %v898_v26 = vsel %vm804_vm3, %v4900_v54, 0.0 }
 0x45f   : > { %899 = vadd.xlane.f32.xlu0 %v898_v26 }
 0x460   : > { %v4906_v0 = vpop.eup %4185 }
 0x461   : > { %v4908_v5 = vpop.eup %4187  ;;  %v907_v46 = vsel %vm804_vm3, %v4906_v0, 0.0 }
 0x462   : > { %908 = vadd.xlane.f32.xlu1 %v907_v46  ;;  %v904_v50 = vsel %vm804_vm3, %v4908_v5, 0.0 }
 0x463   : > { %905 = vadd.xlane.f32.xlu0 %v904_v50 }
 0x465   : > { %v4914_v63 = vpop.eup %4189 }
 0x466   : > { %v910_v60 = vsel %vm804_vm3, %v4914_v63, 0.0 }
 0x467   : > { %911 = vadd.xlane.f32.xlu0 %v910_v60 }
 0x473   : > { %951 = vrot.lane.b32.xlu1 %v572_v51, %s4414_s14 }
 0x477   : > { %1146 = vrot.lane.b32.xlu1 %v4540_v21, %s4412_s30 }
 0x47b   : > { %1150 = vrot.lane.b32.xlu1 %v4559_v37, %s4412_s30 }
 0x47d   : > { %949 = vrot.lane.b32.xlu0 %v571_v58, %s4414_s14  ;;  %v5613_v58 = vmov 0.0  }
 0x481   : > { %1148 = vrot.lane.b32.xlu0 %v4557_v36, %s4412_s30 }
 0x4d5   : > { %v882_v1 = vpop.xlane.xlu1 %881 }
 0x4d7   : > { %v879_v2 = vpop.xlane.xlu0 %878 }
 0x4d8   : > { %4191 = vrcp.f32 %v879_v2 }
 0x4d9   : > { %4193 = vrcp.f32 %v882_v1 }
 0x4db   : > { %v888_v44 = vpop.xlane.xlu0 %887 }
 0x4df   : > { %v891_v47 = vpop.xlane.xlu1 %890 }
 0x4e0   : > { %v885_v62 = vpop.xlane.xlu0 %884 }
 0x4e1   : > { %4195 = vrcp.f32 %v885_v62 }
 0x4e2   : > { %4197 = vrcp.f32 %v888_v44 }
 0x4e3   : > { %v897_v7 = vpop.xlane.xlu1 %896  ;;  %4199 = vrcp.f32 %v891_v47 }
 0x4e4   : > { %v894_v3 = vpop.xlane.xlu0 %893 }
 0x4e5   : > { %v4192_v21 = vpop.eup %4191  ;;  %4201 = vrcp.f32 %v894_v3 }
 0x4e6   : > { %v925_v45 = vmul.f32 %v4192_v21, %v4867_v56  ;;  %4203 = vrcp.f32 %v897_v7  ;;  %v4194_v39 = vpop.eup %4193 }
 0x4e7   : > { %v903_v53 = vpop.xlane.xlu1 %902  ;;  %v926_v56 = vmul.f32 %v4194_v39, %v4863_v15 }
 0x4e8   : > { %v900_v37 = vpop.xlane.xlu0 %899  ;;  %3761 = vmatprep.mubr.msk.f32.mxu0 %vm804_vm3, %v925_v45 }
 0x4e9   : > { %4205 = vrcp.f32 %v900_v37 }
 0x4ea   : > { %4207 = vrcp.f32 %v903_v53 }
 0x4eb   : > { %v909_v36 = vpop.xlane.xlu1 %908 }
 0x4ec   : > { %v906_v12 = vpop.xlane.xlu0 %905 }
 0x4ed   : > { %4209 = vrcp.f32 %v906_v12 }
 0x4ee   : > { %v4196_v26 = vpop.eup %4195  ;;  %4211 = vrcp.f32 %v909_v36 }
 0x4ef   : > { %v952_v16 = vpop.permute.xlu1 %951  ;;  %v4198_v50 = vpop.eup %4197  ;;  %v927_v60 = vmul.f32 %v4196_v26, %v4883_v40 }
 0x4f0   : > { %v912_v14 = vpop.xlane.xlu0 %911  ;;  %3757 = vmatprep.subr.mxu0 %v952_v16  ;;  %v4200_v51 = vpop.eup %4199  ;;  %v928_v2 = vmul.f32 %v4198_v50, %v4872_v59 }
 0x4f1   : > { %3758 = vmatpush3.msra.mxu0 %v952_v16  ;;  %4213 = vrcp.f32 %v912_v14  ;;  %v929_v15 = vmul.f32 %v4200_v51, %v4881_v52 }
 0x4f2   : > { %v4202_v1 = vpop.eup %4201 }
 0x4f3   : > { %v4204_v44 = vpop.eup %4203  ;;  %v930_v40 = vmul.f32 %v4202_v1, %v4892_v57 }
 0x4f4   : > { %v950_v46 = vpop.permute.xlu0 %949  ;;  %v931_v62 = vmul.f32 %v4204_v44, %v4890_v55 }
 0x4f5   : > { %3759 = vmatprep.subr.mxu0 %v950_v46 }
 0x4f6   : > { %3760 = vmatpush3.msra.mxu0 %v950_v46  ;;  %v4206_v47 = vpop.eup %4205 }
 0x4f7   : > { %3762 = vmatmul.mubr.msk.f32.vlgmr.msra.gmra.mxu0 %vm804_vm3, %v926_v56  ;;  %3779 = vmatprep.subr.mxu0 %v5613_v58  ;;  %v4208_v7 = vpop.eup %4207  ;;  %v932_v59 = vmul.f32 %v4206_v47, %v4900_v54  ;;  %v4959_v54 = vld [vmem:[#allocation2 + $0xf0] sm:$0xff]  ;;  %v1402_v47 = vsub.s32 1, %v4544_v23 }
 0x4f8   : > { %3764 = vmatprep.mubr.msk.f32.mxu0 %vm804_vm3, %v927_v60  ;;  %v933_v52 = vmul.f32 %v4208_v7, %v4898_v61  ;;  %v4957_v61 = vld [vmem:[#allocation2 + $0xf8] sm:$0xff]  ;;  %1250 = vrot.lane.b32.xlu1 %v4959_v54, %s4413_s8  ;;  %v4988_v60 = vpop.permute.xlu1 %1146  ;;  %v4991_v51 = vpop.permute.xlu0 %1148 }
 0x4f9   : > { %1252 = vrot.lane.b32.xlu0 %v4957_v61, %s4413_s8 }
 0x4fa   : > { %v4210_v3 = vpop.eup %4209 }
 0x4fb   : > { %3765 = vmatmul.mubr.msk.f32.gmra.mxu0 %vm804_vm3, %v928_v2  ;;  %v4212_v21 = vpop.eup %4211  ;;  %v934_v57 = vmul.f32 %v4210_v3, %v4908_v5  ;;  %v4967_v5 = vld [vmem:[#allocation2 + $0xe0] sm:$0xff] }
 0x4fc   : > { %3767 = vmatprep.mubr.msk.f32.mxu0 %vm804_vm3, %v929_v15  ;;  %v935_v55 = vmul.f32 %v4212_v21, %v4906_v0  ;;  %v4965_v0 = vld [vmem:[#allocation2 + $0xe8] sm:$0xff]  ;;  %1246 = vrot.lane.b32.xlu1 %v4967_v5, %s4413_s8  ;;  %v4994_v2 = vpop.permute.xlu1 %1150 }
 0x4fd   : > { %1248 = vrot.lane.b32.xlu0 %v4965_v0, %s4413_s8 }
 0x4fe   : > { %v4214_v45 = vpop.eup %4213 }
 0x4ff   : > { %3768 = vmatmul.mubr.msk.f32.gmra.mxu0 %vm804_vm3, %v930_v40  ;;  %v936_v53 = vmul.f32 %v4214_v45, %v4914_v63 }
 0x500   : > { %3770 = vmatprep.mubr.msk.f32.mxu0 %vm804_vm3, %v931_v62  ;;  %1421 = vrot.lane.b32.xlu1 %v4959_v54, %s4411_s29  ;;  %v5017_v62 = vrot.slane %v4547_v27, %v1402_v47 }
 0x501   : > { %1259 = vrot.lane.b32.xlu0 %v4552_v30, %s4413_s8 }
 0x503   : > { %3771 = vmatmul.mubr.msk.f32.gmra.mxu0 %vm804_vm3, %v932_v59 }
 0x504   : > { %3773 = vmatprep.mubr.msk.f32.mxu0 %vm804_vm3, %v933_v52  ;;  %1405 = vrot.lane.b32.xlu1 %v5017_v62, %s4414_s14 }
 0x505   : > { %1423 = vrot.lane.b32.xlu0 %v4957_v61, %s4411_s29 }
 0x507   : > { %3774 = vmatmul.mubr.msk.f32.gmra.mxu0 %vm804_vm3, %v934_v57 }
 0x508   : > { %3776 = vmatprep.mubr.msk.f32.mxu0 %vm804_vm3, %v935_v55 }
 0x509   : > { %1419 = vrot.lane.b32.xlu0 %v4965_v0, %s4411_s29 }
 0x50b   : > { %3777 = vmatmul.mubr.msk.f32.gmra.mxu0 %vm804_vm3, %v936_v53 }
 0x50c   : > { %3803 = vmatprep.mubr.msk.f32.mxu0 %vm4410_vm0, %v5613_v58 }
 0x56a   : > { %v1251_v15 = vpop.permute.xlu1 %1250 }
 0x56b   : > { %v1253_v1 = vpop.permute.xlu0 %1252 }
 0x56e   : > { %v1247_v40 = vpop.permute.xlu1 %1246 }
 0x56f   : > { %v1249_v44 = vpop.permute.xlu0 %1248 }
 0x572   : > { %v1422_v55 = vpop.permute.xlu1 %1421 }
 0x573   : > { %v1260_v57 = vpop.permute.xlu0 %1259 }
 0x576   : > { %v1406_v47 = vpop.permute.xlu1 %1405 }
 0x577   : > { %v1424_v45 = vpop.permute.xlu0 %1423 }
 0x578   : > { %3830 = vmatpush3.msra.mxu1 %v1424_v45 }
 0x579   : > { %3831 = vmatprep.subr.mxu1 %v5613_v58 }
 0x57a   : > { %3832 = vmatpush3.msra.mxu1 %v1422_v55 }
 0x57b   : > { %3833 = vmatprep.subr.mxu1 %v5613_v58  ;;  %v1420_v53 = vpop.permute.xlu0 %1419 }
 0x57c   : > { %3834 = vmatpush3.msra.mxu1 %v1420_v53 }
 0x57d   : > { %3835 = vmatprep.subr.mxu1 %v5613_v58 }
 0x5b7   : > { %v3763_v63 = vpop.f32.mrf.mxu0 }
 0x5b9   : > { %v1087_v37 = vpop.f32.mrf.mxu0 }
 0x5bb   : > { %v3766_v36 = vpop.f32.mrf.mxu0 }
 0x5bd   : > { %v1097_v12 = vpop.f32.mrf.mxu0 }
 0x5bf   : > { %v3769_v16 = vpop.f32.mrf.mxu0 }
 0x5c1   : > { %v1107_v14 = vpop.f32.mrf.mxu0 }
 0x5c3   : > { %v3772_v39 = vpop.f32.mrf.mxu0 }
 0x5c5   : > { %v1117_v26 = vpop.f32.mrf.mxu0 }
 0x5c7   : > { %v3775_v46 = vpop.f32.mrf.mxu0 }
 0x5c9   : > { %v1127_v56 = vpop.f32.mrf.mxu0 }
 0x5cb   : > { %v3778_v30 = vpop.f32.mrf.mxu0 }
 0x5cc   : > { %3780 = vmatpush3.msra.mxu0 %v3778_v30 }
 0x5cd   : > { %v1137_v50 = vpop.f32.mrf.mxu0  ;;  %3781 = vmatprep.subr.mxu0 %v5613_v58 }
 0x5ce   : > { %3782 = vmatpush3.msra.mxu0 %v1137_v50 }
 0x5cf   : > { %3783 = vmatprep.subr.mxu0 %v5613_v58 }
 0x5d0   : > { %3784 = vmatpush3.msra.mxu0 %v3775_v46 }
 0x5d1   : > { %3785 = vmatprep.subr.mxu0 %v5613_v58 }
 0x5d2   : > { %3786 = vmatpush3.msra.mxu0 %v1127_v56 }
 0x5d3   : > { %3787 = vmatprep.subr.mxu0 %v5613_v58 }
 0x5d4   : > { %3788 = vmatpush3.msra.mxu0 %v3772_v39 }
 0x5d5   : > { %3789 = vmatprep.subr.mxu0 %v5613_v58 }
 0x5d6   : > { %3790 = vmatpush3.msra.mxu0 %v1117_v26 }
 0x5d7   : > { %3791 = vmatprep.subr.mxu0 %v5613_v58 }
 0x5d8   : > { %3792 = vmatpush3.msra.mxu0 %v3769_v16 }
 0x5d9   : > { %3793 = vmatprep.subr.mxu0 %v5613_v58 }
 0x5da   : > { %3794 = vmatpush3.msra.mxu0 %v1107_v14 }
 0x5db   : > { %3795 = vmatprep.subr.mxu0 %v5613_v58 }
 0x5dc   : > { %3796 = vmatpush3.msra.mxu0 %v3766_v36 }
 0x5dd   : > { %3797 = vmatprep.subr.mxu0 %v5613_v58 }
 0x5de   : > { %3798 = vmatpush3.msra.mxu0 %v1097_v12 }
 0x5df   : > { %3799 = vmatprep.subr.mxu0 %v5613_v58 }
 0x5e0   : > { %3800 = vmatpush3.msra.mxu0 %v3763_v63 }
 0x5e1   : > { %3801 = vmatprep.subr.mxu0 %v5613_v58 }
 0x5e2   : > { %3802 = vmatpush3.msra.mxu0 %v1087_v37 }
 0x5e3   : > { %3804 = vmatmul.mubr.msk.f32.vlgmr.msra.gmra.mxu0 %vm804_vm3, %v4988_v60  ;;  %3812 = vmatprep.subr.mxu0 %v5613_v58 }
 0x5e4   : > { %3806 = vmatprep.mubr.msk.f32.mxu0 %vm4410_vm0, %v5613_v58  ;;  %3813 = vmatpush3.msra.mxu0 %v1253_v1 }
 0x5e5   : > { %3814 = vmatprep.subr.mxu0 %v5613_v58 }
 0x5e6   : > { %3815 = vmatpush3.msra.mxu0 %v1251_v15 }
 0x5e7   : > { %3807 = vmatmul.mubr.msk.f32.gmra.mxu0 %vm804_vm3, %v4991_v51  ;;  %3816 = vmatprep.subr.mxu0 %v5613_v58 }
 0x5e8   : > { %3809 = vmatprep.mubr.msk.f32.mxu0 %vm4410_vm0, %v5613_v58  ;;  %3817 = vmatpush3.msra.mxu0 %v1249_v44 }
 0x5e9   : > { %3818 = vmatprep.subr.mxu0 %v5613_v58 }
 0x5ea   : > { %3819 = vmatpush3.msra.mxu0 %v1247_v40 }
 0x5eb   : > { %3810 = vmatmul.mubr.msk.f32.gmra.mxu0 %vm804_vm3, %v4994_v2  ;;  %3846 = vmatprep.subr.mxu0 %v5613_v58 }
 0x5ec   : > { %3820 = vmatprep.mubr.msk.f32.mxu0 %vm4410_vm0, %v5613_v58 }
 0x6a3   : > { %v1224_v7 = vpop.f32.mrf.mxu0 }
 0x6a4   : > { %3821 = vmatmul.mubr.msk.f32.vlgmr.msra.gmra.mxu0 %vm226_vm1, %v1224_v7 }
 0x6a5   : > { %v3805_v59 = vpop.f32.mrf.mxu0  ;;  %3823 = vmatprep.mubr.msk.f32.mxu0 %vm4410_vm0, %v5613_v58  ;;  %3847 = vmatpush3.msra.mxu0 %v4957_v61 }
 0x6a6   : > { %3848 = vmatprep.subr.mxu0 %v5613_v58 }
 0x6a7   : > { %v1229_v3 = vpop.f32.mrf.mxu0  ;;  %3849 = vmatpush3.msra.mxu0 %v4959_v54 }
 0x6a8   : > { %3824 = vmatmul.mubr.msk.f32.gmra.mxu0 %vm226_vm1, %v1229_v3  ;;  %3850 = vmatprep.subr.mxu0 %v5613_v58 }
 0x6a9   : > { %v3808_v27 = vpop.f32.mrf.mxu0  ;;  %3826 = vmatprep.mubr.msk.f32.mxu0 %vm4410_vm0, %v5613_v58  ;;  %3851 = vmatpush3.msra.mxu0 %v4965_v0 }
 0x6aa   : > { %3852 = vmatprep.subr.mxu0 %v5613_v58 }
 0x6ab   : > { %v1234_v52 = vpop.f32.mrf.mxu0  ;;  %3853 = vmatpush3.msra.mxu0 %v4967_v5 }
 0x6ac   : > { %3827 = vmatmul.mubr.msk.f32.gmra.mxu0 %vm226_vm1, %v1234_v52  ;;  %3854 = vmatprep.subr.mxu0 %v5613_v58 }
 0x6ad   : > { %v3811_v21 = vpop.f32.mrf.mxu0  ;;  %3862 = vmatprep.mubr.msk.f32.mxu0 %vm4410_vm0, %v5613_v58 }
 0x764   : > { %v1337_v61 = vpop.f32.mrf.mxu0 }
 0x765   : > { %v1338_v54 = vadd.f32 %v1337_v61, %v1260_v57 }
 0x766   : > { %v3822_v0 = vpop.f32.mrf.mxu0 }
 0x767   : > { %v1351_v63 = vadd.f32 %v1338_v54, %v4523_v13 }
 0x768   : > { %v1342_v37 = vpop.f32.mrf.mxu0 }
 0x769   : > { %v1343_v36 = vadd.f32 %v1342_v37, %v1260_v57  ;;  %v1354_v12 = vsel %vm226_vm1, %v1351_v63, 0.0  ;;  %v1367_v16 = vmul.f32 %v1351_v63, %v1351_v63 }
 0x76a   : > { %v3825_v14 = vpop.f32.mrf.mxu0  ;;  %1355 = vadd.xlane.f32.xlu1 %v1354_v12 }
 0x76b   : > { %v1352_v39 = vadd.f32 %v1343_v36, %v4528_v17  ;;  %v1370_v26 = vsel %vm226_vm1, %v1367_v16, 0.0 }
 0x76c   : > { %v1347_v46 = vpop.f32.mrf.mxu0  ;;  %1371 = vadd.xlane.f32.xlu0 %v1370_v26 }
 0x76d   : > { %v1348_v56 = vadd.f32 %v1347_v46, %v1260_v57  ;;  %v1368_v30 = vmul.f32 %v1352_v39, %v1352_v39  ;;  %v1357_v13 = vsel %vm226_vm1, %v1352_v39, 0.0 }
 0x76e   : > { %v3828_v50 = vpop.f32.mrf.mxu0 }
 0x76f   : > { %v1353_v1 = vadd.f32 %v1348_v56, %v4534_v20  ;;  %v1373_v15 = vsel %vm226_vm1, %v1368_v30, 0.0  ;;  %v1524_v20 = vld [vmem:[#allocation2 + $0xd8] sm:$0xff] }
 0x770   : > { %1358 = vadd.xlane.f32.xlu0 %v1357_v13  ;;  %1374 = vadd.xlane.f32.xlu1 %v1373_v15 }
 0x771   : > { %v1369_v44 = vmul.f32 %v1353_v1, %v1353_v1  ;;  %v1360_v40 = vsel %vm226_vm1, %v1353_v1, 0.0  ;;  %3855 = vmatpush3.msra.mxu0 %v1524_v20 }
 0x772   : > { %3856 = vmatprep.subr.mxu0 %v5613_v58 }
 0x773   : > { %v1376_v17 = vsel %vm226_vm1, %v1369_v44, 0.0 }
 0x774   : > { %1361 = vadd.xlane.f32.xlu0 %v1360_v40  ;;  %1377 = vadd.xlane.f32.xlu1 %v1376_v17 }
 0x785   : > { %1411 = vrot.lane.b32.xlu1 %v5017_v62, %s4413_s8 }
 0x78a   : > { %1417 = vrot.lane.b32.xlu0 %v4967_v5, %s4411_s29 }
 0x7f3   : > { %v1356_v7 = vpop.xlane.xlu1 %1355 }
 0x7f4   : > { %v1364_v59 = vmul.f32 0.03125, %v1356_v7 }
 0x7f5   : > { %v1372_v3 = vpop.xlane.xlu0 %1371 }
 0x7f6   : > { %v1382_v27 = vmul.f32 %v1364_v59, %v1364_v59  ;;  %v1379_v52 = vmul.f32 0.03125, %v1372_v3  ;;  %v1388_v30 = vsub.f32 %v1351_v63, %v1364_v59 }
 0x7f8   : > { %v1385_v21 = vsub.f32 %v1379_v52, %v1382_v27 }
 0x7f9   : > { %v1375_v57 = vpop.xlane.xlu1 %1374  ;;  %v1359_v45 = vpop.xlane.xlu0 %1358 }
 0x7fa   : > { %v1391_v55 = vadd.f32 1e-05, %v1385_v21  ;;  %v1365_v53 = vmul.f32 0.03125, %v1359_v45  ;;  %v1380_v61 = vmul.f32 0.03125, %v1375_v57  ;;  %v1522_v57 = vld [vmem:[#allocation2 + $0xc8] sm:$0xff]  ;;  %v1683_v45 = vld [vmem:[#allocation2 + $0x118] sm:$0xff] }
 0x7fb   : > { %1698 = vrot.lane.b32.xlu0 %v1683_v45, %s4411_s29 }
 0x7fc   : > { %4215 = vrsqrt.f32 %v1391_v55  ;;  %v1383_v54 = vmul.f32 %v1365_v53, %v1365_v53  ;;  %v1389_v40 = vsub.f32 %v1352_v39, %v1365_v53  ;;  %v1682_v55 = vld [vmem:[#allocation2 + $0x110] sm:$0xff]  ;;  %v1527_v53 = vsub.s32 2, %v4544_v23 }
 0x7fd   : > { %v1378_v0 = vpop.xlane.xlu1 %1377  ;;  %v1362_v5 = vpop.xlane.xlu0 %1361  ;;  %1696 = vrot.lane.b32.xlu1 %v1682_v55, %s4411_s29 }
 0x7fe   : > { %v1386_v37 = vsub.f32 %v1380_v61, %v1383_v54  ;;  %v1366_v36 = vmul.f32 0.03125, %v1362_v5  ;;  %v1381_v16 = vmul.f32 0.03125, %v1378_v0  ;;  %v5079_v61 = vld [vmem:[#allocation2 + $0x140] sm:$0xff]  ;;  %v1681_v0 = vld [vmem:[#allocation2 + $0x108] sm:$0xff] }
 0x7ff   : > { %v1528_v54 = vrot.slane %v5079_v61, %v1527_v53  ;;  %1694 = vrot.lane.b32.xlu0 %v1681_v0, %s4411_s29 }
 0x800   : > { %v1392_v12 = vadd.f32 1e-05, %v1386_v37  ;;  %v1384_v14 = vmul.f32 %v1366_v36, %v1366_v36  ;;  %v1390_v3 = vsub.f32 %v1353_v1, %v1366_v36  ;;  %v1523_v1 = vld [vmem:[#allocation2 + $0xd0] sm:$0xff] }
 0x801   : > { %v1418_v26 = vpop.permute.xlu0 %1417  ;;  %v1412_v15 = vpop.permute.xlu1 %1411  ;;  %3857 = vmatpush3.msra.mxu0 %v1523_v1  ;;  %1668 = vrot.lane.b32.xlu1 %v1528_v54, %s4411_s29 }
 0x802   : > { %4217 = vrsqrt.f32 %v1392_v12  ;;  %v1387_v46 = vsub.f32 %v1381_v16, %v1384_v14  ;;  %3836 = vmatpush3.msra.mxu1 %v1418_v26  ;;  %3858 = vmatprep.subr.mxu0 %v5613_v58 }
 0x803   : > { %3871 = vmatprep.subr.mxu1 %v5613_v58  ;;  %3859 = vmatpush3.msra.mxu0 %v1522_v57 }
 0x804   : > { %v1393_v56 = vadd.f32 1e-05, %v1387_v46  ;;  %3860 = vmatprep.subr.mxu0 %v5613_v58 }
 0x806   : > { %4219 = vrsqrt.f32 %v1393_v56 }
 0x809   : > { %v4216_v50 = vpop.eup %4215 }
 0x80a   : > { %v1397_v13 = vmul.f32 %v4216_v50, %v1388_v30 }
 0x80c   : > { %v1408_v44 = vmul.f32 %v1406_v47, %v1397_v13 }
 0x80e   : > { %v5056_v17 = vadd.f32 %v1412_v15, %v1408_v44 }
 0x80f   : > { %v4218_v20 = vpop.eup %4217 }
 0x810   : > { %v1398_v7 = vmul.f32 %v4218_v20, %v1389_v40  ;;  %3838 = vmatmul.mubr.msk.f32.vlgmr.msra.gmra.mxu1 %vm226_vm1, %v5056_v17 }
 0x811   : > { %3840 = vmatprep.mubr.msk.f32.mxu1 %vm4410_vm0, %v5613_v58 }
 0x812   : > { %v1409_v27 = vmul.f32 %v1406_v47, %v1398_v7 }
 0x813   : > { %v4220_v52 = vpop.eup %4219 }
 0x814   : > { %v1399_v21 = vmul.f32 %v4220_v52, %v1390_v3  ;;  %v5062_v63 = vadd.f32 %v1412_v15, %v1409_v27 }
 0x816   : > { %v1410_v59 = vmul.f32 %v1406_v47, %v1399_v21  ;;  %3841 = vmatmul.mubr.msk.f32.gmra.mxu1 %vm226_vm1, %v5062_v63  ;;  %v1521_v47 = vld [vmem:[#allocation2 + $0xc0] sm:$0xff] }
 0x817   : > { %3843 = vmatprep.mubr.msk.f32.mxu1 %vm4410_vm0, %v5613_v58  ;;  %3861 = vmatpush3.msra.mxu0 %v1521_v47 }
 0x818   : > { %v5068_v39 = vadd.f32 %v1412_v15, %v1410_v59  ;;  %v4288_v15 = vld [vmem:[#allocation2 + $0x60] sm:$0xff] }
 0x81a   : > { %3844 = vmatmul.mubr.msk.f32.gmra.mxu1 %vm226_vm1, %v5068_v39 }
 0x81b   : > { %3879 = vmatprep.mubr.msk.f32.mxu1 %vm4410_vm0, %v5613_v58 }
 0x86d   : > { %v1699_v44 = vpop.permute.xlu0 %1698 }
 0x86e   : > { %3872 = vmatpush3.msra.mxu1 %v1699_v44 }
 0x86f   : > { %v1697_v40 = vpop.permute.xlu1 %1696  ;;  %3873 = vmatprep.subr.mxu1 %v5613_v58 }
 0x870   : > { %3874 = vmatpush3.msra.mxu1 %v1697_v40 }
 0x871   : > { %3875 = vmatprep.subr.mxu1 %v5613_v58 }
 0x8d0   : > { %v1504_v5 = vpop.f32.mrf.mxu1 }
 0x8d1   : > { %v1505_v37 = vadd.f32 %v1504_v5, %v5017_v62 }
 0x8d2   : > { %v3839_v36 = vpop.f32.mrf.mxu1 }
 0x8d3   : > { %v1518_v12 = vmax.f32 %v1505_v37, 0.0 }
 0x8d5   : > { %3863 = vmatmul.mubr.msk.f32.vlgmr.msra.gmra.mxu0 %vm1529_vm4, %v1518_v12 }
 0x8d6   : > { %v1509_v16 = vpop.f32.mrf.mxu1  ;;  %3865 = vmatprep.mubr.msk.f32.mxu0 %vm4410_vm0, %v5613_v58 }
 0x8d7   : > { %v1510_v14 = vadd.f32 %v1509_v16, %v5017_v62 }
 0x8d8   : > { %v3842_v26 = vpop.f32.mrf.mxu1 }
 0x8d9   : > { %v1519_v46 = vmax.f32 %v1510_v14, 0.0  ;;  %v1669_v26 = vpop.permute.xlu1 %1668 }
 0x8da   : > { %v1514_v56 = vpop.f32.mrf.mxu1 }
 0x8db   : > { %v1515_v30 = vadd.f32 %v1514_v56, %v5017_v62  ;;  %3866 = vmatmul.mubr.msk.f32.gmra.mxu0 %vm1529_vm4, %v1519_v46  ;;  %v1695_v62 = vpop.permute.xlu0 %1694 }
 0x8dc   : > { %v3845_v50 = vpop.f32.mrf.mxu1  ;;  %3868 = vmatprep.mubr.msk.f32.mxu0 %vm4410_vm0, %v5613_v58  ;;  %3876 = vmatpush3.msra.mxu1 %v1695_v62 }
 0x8dd   : > { %v1520_v13 = vmax.f32 %v1515_v30, 0.0  ;;  %3877 = vmatprep.subr.mxu1 %v5613_v58 }
 0x8df   : > { %3869 = vmatmul.mubr.msk.f32.gmra.mxu0 %vm1529_vm4, %v1520_v13 }
 0x8e0   : > { %3894 = vmatprep.mubr.msk.f32.mxu0 %vm316_vm2, %v4288_v15 }
 0x995   : > { %v1605_v20 = vpop.f32.mrf.mxu0 }
 0x996   : > { %v1606_v7 = vadd.f32 %v1605_v20, %v1528_v54 }
 0x997   : > { %v3864_v3 = vpop.f32.mrf.mxu0 }
 0x998   : > { %v1619_v27 = vadd.f32 %v1606_v7, %v5056_v17 }
 0x99a   : > { %v1622_v52 = vsel %vm226_vm1, %v1619_v27, 0.0  ;;  %v1634_v21 = vmul.f32 %v1619_v27, %v1619_v27 }
 0x99b   : > { %1623 = vadd.xlane.f32.xlu1 %v1622_v52  ;;  %v1610_v59 = vpop.f32.mrf.mxu0 }
 0x99c   : > { %v1611_v1 = vadd.f32 %v1610_v59, %v1528_v54  ;;  %v1637_v57 = vsel %vm226_vm1, %v1634_v21, 0.0 }
 0x99d   : > { %1638 = vadd.xlane.f32.xlu0 %v1637_v57  ;;  %v3867_v47 = vpop.f32.mrf.mxu0 }
 0x99e   : > { %v1620_v45 = vadd.f32 %v1611_v1, %v5062_v63  ;;  %v1680_v63 = vld [vmem:[#allocation2 + $0x100] sm:$0xff] }
 0x99f   : > { %v1615_v55 = vpop.f32.mrf.mxu0 }
 0x9a0   : > { %v1616_v53 = vadd.f32 %v1615_v55, %v1528_v54  ;;  %v1625_v0 = vsel %vm226_vm1, %v1620_v45, 0.0  ;;  %v1635_v5 = vmul.f32 %v1620_v45, %v1620_v45 }
 0x9a1   : > { %1626 = vadd.xlane.f32.xlu0 %v1625_v0  ;;  %v3870_v37 = vpop.f32.mrf.mxu0 }
 0x9a2   : > { %v1621_v17 = vadd.f32 %v1616_v53, %v5068_v39  ;;  %v1640_v36 = vsel %vm226_vm1, %v1635_v5, 0.0 }
 0x9a3   : > { %1641 = vadd.xlane.f32.xlu1 %v1640_v36 }
 0x9a4   : > { %v1628_v12 = vsel %vm226_vm1, %v1621_v17, 0.0  ;;  %v1636_v16 = vmul.f32 %v1621_v17, %v1621_v17 }
 0x9a5   : > { %1629 = vadd.xlane.f32.xlu0 %v1628_v12 }
 0x9a6   : > { %v1643_v14 = vsel %vm226_vm1, %v1636_v16, 0.0 }
 0x9a7   : > { %1644 = vadd.xlane.f32.xlu1 %v1643_v14 }
 0x9b8   : > { %1674 = vrot.lane.b32.xlu1 %v1528_v54, %s4414_s14 }
 0x9bb   : > { %1692 = vrot.lane.b32.xlu0 %v1680_v63, %s4411_s29 }
 0xa24   : > { %v1624_v46 = vpop.xlane.xlu1 %1623 }
 0xa25   : > { %v1631_v56 = vmul.f32 0.03125, %v1624_v46 }
 0xa26   : > { %v1639_v30 = vpop.xlane.xlu0 %1638 }
 0xa27   : > { %v1649_v39 = vmul.f32 %v1631_v56, %v1631_v56  ;;  %v1646_v50 = vmul.f32 0.03125, %v1639_v30  ;;  %v1655_v0 = vsub.f32 %v1619_v27, %v1631_v56 }
 0xa29   : > { %v1652_v13 = vsub.f32 %v1646_v50, %v1649_v39 }
 0xa2a   : > { %v1627_v15 = vpop.xlane.xlu0 %1626 }
 0xa2b   : > { %v1658_v44 = vadd.f32 1e-05, %v1652_v13  ;;  %v1632_v40 = vmul.f32 0.03125, %v1627_v15 }
 0xa2c   : > { %v1642_v62 = vpop.xlane.xlu1 %1641 }
 0xa2d   : > { %4221 = vrsqrt.f32 %v1658_v44  ;;  %v1650_v20 = vmul.f32 %v1632_v40, %v1632_v40  ;;  %v1647_v7 = vmul.f32 0.03125, %v1642_v62  ;;  %v1656_v16 = vsub.f32 %v1620_v45, %v1632_v40 }
 0xa2e   : > { %v1630_v3 = vpop.xlane.xlu0 %1629 }
 0xa2f   : > { %v1653_v52 = vsub.f32 %v1647_v7, %v1650_v20  ;;  %v1633_v54 = vmul.f32 0.03125, %v1630_v3 }
 0xa30   : > { %v1645_v21 = vpop.xlane.xlu1 %1644 }
 0xa31   : > { %v1659_v59 = vadd.f32 1e-05, %v1653_v52  ;;  %v1651_v1 = vmul.f32 %v1633_v54, %v1633_v54  ;;  %v1648_v57 = vmul.f32 0.03125, %v1645_v21  ;;  %v1657_v30 = vsub.f32 %v1621_v17, %v1633_v54  ;;  %v4289_v21 = vld [vmem:[#allocation2 + $0x68] sm:$0xff] }
 0xa32   : > { %v1693_v47 = vpop.permute.xlu0 %1692  ;;  %v1686_v17 = vsub.s32 3, %v4544_v23 }
 0xa33   : > { %4223 = vrsqrt.f32 %v1659_v59  ;;  %v1654_v55 = vsub.f32 %v1648_v57, %v1651_v1  ;;  %3878 = vmatpush3.msra.mxu1 %v1693_v47  ;;  %v4290_v59 = vld [vmem:[#allocation2 + $0x70] sm:$0xff]  ;;  %v4292_v1 = vld [vmem:[#allocation2 + $0x80] sm:$0xff]  ;;  %v4293_v57 = vld [vmem:[#allocation2 + $0x88] sm:$0xff] }
 0xa34   : > { %v1675_v36 = vpop.permute.xlu1 %1674  ;;  %v5127_v20 = vrot.slane %v5079_v61, %v1686_v17  ;;  %v4291_v61 = vld [vmem:[#allocation2 + $0x78] sm:$0xff]  ;;  %v4294_v47 = vld [vmem:[#allocation2 + $0x90] sm:$0xff] }
 0xa35   : > { %v1660_v53 = vadd.f32 1e-05, %v1654_v55  ;;  %v4295_v55 = vld [vmem:[#allocation2 + $0x98] sm:$0xff] }
 0xa37   : > { %4225 = vrsqrt.f32 %v1660_v53  ;;  %v4296_v53 = vld [vmem:[#allocation2 + $0xa0] sm:$0xff] }
 0xa3a   : > { %v4222_v5 = vpop.eup %4221 }
 0xa3b   : > { %v1664_v37 = vmul.f32 %v4222_v5, %v1655_v0  ;;  %v4297_v0 = vld [vmem:[#allocation2 + $0xa8] sm:$0xff]  ;;  %v4298_v5 = vld [vmem:[#allocation2 + $0xb0] sm:$0xff] }
 0xa3d   : > { %v1671_v12 = vmul.f32 %v1669_v26, %v1664_v37  ;;  %v4299_v37 = vld [vmem:[#allocation2 + $0xb8] sm:$0xff] }
 0xa3f   : > { %v5109_v14 = vadd.f32 %v1675_v36, %v1671_v12 }
 0xa40   : > { %v4224_v63 = vpop.eup %4223 }
 0xa41   : > { %v1665_v46 = vmul.f32 %v4224_v63, %v1656_v16  ;;  %3880 = vmatmul.mubr.msk.f32.vlgmr.msra.gmra.mxu1 %vm226_vm1, %v5109_v14 }
 0xa42   : > { %3882 = vmatprep.mubr.msk.f32.mxu1 %vm4410_vm0, %v5613_v58 }
 0xa43   : > { %v1672_v39 = vmul.f32 %v1669_v26, %v1665_v46 }
 0xa44   : > { %v4226_v50 = vpop.eup %4225 }
 0xa45   : > { %v1666_v13 = vmul.f32 %v4226_v50, %v1657_v30  ;;  %v5115_v27 = vadd.f32 %v1675_v36, %v1672_v39 }
 0xa47   : > { %v1673_v56 = vmul.f32 %v1669_v26, %v1666_v13  ;;  %3883 = vmatmul.mubr.msk.f32.gmra.mxu1 %vm226_vm1, %v5115_v27 }
 0xa48   : > { %3885 = vmatprep.mubr.msk.f32.mxu1 %vm4410_vm0, %v5613_v58 }
 0xa49   : > { %v5121_v45 = vadd.f32 %v1675_v36, %v1673_v56 }
 0xa4b   : > { %3886 = vmatmul.mubr.msk.f32.gmra.mxu1 %vm226_vm1, %v5121_v45 }
 0xb01   : > { %v1779_v15 = vpop.f32.mrf.mxu1 }
 0xb02   : > { %v1780_v54 = vadd.f32 %v1779_v15, %v5127_v20 }
 0xb03   : > { %v3881_v44 = vpop.f32.mrf.mxu1 }
 0xb07   : > { %v1784_v40 = vpop.f32.mrf.mxu1 }
 0xb08   : > { %v1785_v52 = vadd.f32 %v1784_v40, %v5127_v20 }
 0xb09   : > { %v3884_v62 = vpop.f32.mrf.mxu1 }
 0xb0b   : > { %v1789_v26 = vpop.f32.mrf.mxu1 }
 0xb0c   : > { %v1790_v7 = vadd.f32 %v1789_v26, %v5127_v20 }
 0xb0d   : > { %v3887_v3 = vpop.f32.mrf.mxu1 }
 0xb0e   : > { %3888 = vmatprep.subr.mxu0 %v1790_v7 }
 0xb0f   : > { %3889 = vmatpush3.msra.mxu0 %v1790_v7 }
 0xb10   : > { %3890 = vmatprep.subr.mxu0 %v1785_v52 }
 0xb11   : > { %3891 = vmatpush3.msra.mxu0 %v1785_v52 }
 0xb12   : > { %3892 = vmatprep.subr.mxu0 %v1780_v54 }
 0xb13   : > { %3893 = vmatpush3.msra.mxu0 %v1780_v54 }
 0xb14   : > { %3895 = vmatmul.mubr.msk.f32.vlgmr.msra.gmra.mxu0 %vm316_vm2, %v4289_v21 }
 0xb15   : > { %3897 = vmatprep.mubr.msk.f32.mxu0 %vm316_vm2, %v4290_v59 }
 0xb18   : > { %3898 = vmatmul.mubr.msk.f32.gmra.mxu0 %vm316_vm2, %v4291_v61 }
 0xb19   : > { %3900 = vmatprep.mubr.msk.f32.mxu0 %vm316_vm2, %v4292_v1 }
 0xb1c   : > { %3901 = vmatmul.mubr.msk.f32.gmra.mxu0 %vm316_vm2, %v4293_v57 }
 0xb1d   : > { %3903 = vmatprep.mubr.msk.f32.mxu0 %vm316_vm2, %v4294_v47 }
 0xb20   : > { %3904 = vmatmul.mubr.msk.f32.gmra.mxu0 %vm316_vm2, %v4295_v55 }
 0xb21   : > { %3906 = vmatprep.mubr.msk.f32.mxu0 %vm316_vm2, %v4296_v53 }
 0xb24   : > { %3907 = vmatmul.mubr.msk.f32.gmra.mxu0 %vm316_vm2, %v4297_v0 }
 0xb25   : > { %3909 = vmatprep.mubr.msk.f32.mxu0 %vm316_vm2, %v4298_v5 }
 0xb28   : > { %3910 = vmatmul.mubr.msk.f32.gmra.mxu0 %vm316_vm2, %v4299_v37 }
 0xbd4   : > { %v5143_v36 = vpop.f32.mrf.mxu0 }
 0xbd6   : > { %v5145_v12 = vpop.f32.mrf.mxu0 }
 0xbd7   : > { %v1918_v16 = vmul.f32 %v5145_v12, %v4711_v22 }
 0xbd8   : > { %v5149_v63 = vpop.f32.mrf.mxu0 }
 0xbd9   : > { %3936 = vmatprep.mubr.msk.f32.mxu1 %vm226_vm1, %v1918_v16 }
 0xbda   : > { %v5152_v46 = vpop.f32.mrf.mxu0 }
 0xbdc   : > { %v5154_v30 = vpop.f32.mrf.mxu0 }
 0xbde   : > { %v5156_v39 = vpop.f32.mrf.mxu0 }
 0xbe0   : > { %v5158_v50 = vpop.f32.mrf.mxu0 }
 0xbe1   : > { %v1937_v26 = vmul.f32 %v5158_v50, %v4752_v42 }
 0xbe2   : > { %v5160_v13 = vpop.f32.mrf.mxu0 }
 0xbe3   : > { %v1936_v62 = vmul.f32 %v5160_v13, %v4785_v18 }
 0xbe4   : > { %v5162_v56 = vpop.f32.mrf.mxu0 }
 0xbe5   : > { %v1939_v40 = vmul.f32 %v5162_v56, %v4758_v6  ;;  %v1935_v6 = vmul.f32 %v5154_v30, %v4769_v10 }
 0xbe6   : > { %v5164_v15 = vpop.f32.mrf.mxu0 }
 0xbe7   : > { %v1938_v17 = vmul.f32 %v5164_v15, %v4771_v11  ;;  %v1934_v11 = vmul.f32 %v5156_v39, %v4801_v48 }
 0xbe8   : > { %v5166_v44 = vpop.f32.mrf.mxu0 }
 0xbe9   : > { %1976 = vrot.lane.b32.xlu1 %v5166_v44, %s4411_s29  ;;  %v1941_v42 = vmul.f32 %v5166_v44, %v4748_v41 }
 0xbea   : > { %v5170_v22 = vpop.f32.mrf.mxu0 }
 0xbeb   : > { %1974 = vrot.lane.b32.xlu0 %v5170_v22, %s4411_s29  ;;  %v1940_v18 = vmul.f32 %v5170_v22, %v4741_v38 }
 0xbed   : > { %1972 = vrot.lane.b32.xlu1 %v5162_v56, %s4411_s29 }
 0xbef   : > { %1970 = vrot.lane.b32.xlu0 %v5164_v15, %s4411_s29 }
 0xbf1   : > { %1968 = vrot.lane.b32.xlu1 %v5158_v50, %s4411_s29 }
 0xbf3   : > { %1966 = vrot.lane.b32.xlu0 %v5160_v13, %s4411_s29 }
 0xbf5   : > { %1964 = vrot.lane.b32.xlu1 %v5154_v30, %s4411_s29 }
 0xbf7   : > { %1962 = vrot.lane.b32.xlu0 %v5156_v39, %s4411_s29 }
 0xbf9   : > { %1960 = vrot.lane.b32.xlu1 %v5149_v63, %s4411_s29 }
 0xbfb   : > { %1958 = vrot.lane.b32.xlu0 %v5152_v46, %s4411_s29 }
 0xbfd   : > { %1956 = vrot.lane.b32.xlu1 %v5143_v36, %s4411_s29 }
 0xbff   : > { %1954 = vrot.lane.b32.xlu0 %v5145_v12, %s4411_s29 }
 0xc01   : > { %2323 = vrot.lane.b32.xlu1 %v1938_v17, %s4414_s14  ;;  %v1919_v17 = vmul.f32 %v5143_v36, %v4708_v19  ;;  %v1922_v19 = vmul.f32 %v5156_v39, %v4723_v29  ;;  %v1926_v29 = vmul.f32 %v5164_v15, %v4735_v34  ;;  %v4302_v15 = vld [vmem:[#allocation2 + $0x18] sm:$0xff] }
 0xc03   : > { %2325 = vrot.lane.b32.xlu0 %v1939_v40, %s4414_s14  ;;  %v1920_v40 = vmul.f32 %v5152_v46, %v4717_v25  ;;  %v1923_v25 = vmul.f32 %v5154_v30, %v4720_v28  ;;  %v1927_v28 = vmul.f32 %v5162_v56, %v4732_v33  ;;  %v4300_v30 = vld [vmem:[#allocation2 + $0x8] sm:$0xff] }
 0xc05   : > { %2319 = vrot.lane.b32.xlu1 %v1936_v62, %s4414_s14  ;;  %v1921_v62 = vmul.f32 %v5149_v63, %v4714_v24  ;;  %v1925_v24 = vmul.f32 %v5158_v50, %v4726_v31  ;;  %v1929_v31 = vmul.f32 %v5166_v44, %v4738_v35  ;;  %v4301_v50 = vld [vmem:[#allocation2] sm:$0xff] }
 0xc07   : > { %2321 = vrot.lane.b32.xlu0 %v1937_v26, %s4414_s14  ;;  %v1924_v26 = vmul.f32 %v5160_v13, %v4729_v32  ;;  %v1928_v32 = vmul.f32 %v5170_v22, %v4876_v4 }
 0xc09   : > { %2315 = vrot.lane.b32.xlu1 %v1934_v11, %s4414_s14  ;;  %v4303_v11 = vld [vmem:[#allocation2 + $0x10] sm:$0xff] }
 0xc0b   : > { %2317 = vrot.lane.b32.xlu0 %v1935_v6, %s4414_s14 }
 0xc0d   : > { %2327 = vrot.lane.b32.xlu1 %v1940_v18, %s4414_s14 }
 0xc0f   : > { %2329 = vrot.lane.b32.xlu0 %v1941_v42, %s4414_s14  ;;  %v4304_v42 = vld [vmem:[#allocation2 + $0x28] sm:$0xff] }
 0xc5b   : > { %v1977_v48 = vpop.permute.xlu1 %1976 }
 0xc5c   : > { %3912 = vmatprep.subr.msk.mxu1 %vm226_vm1, %v1977_v48 }
 0xc5d   : > { %3913 = vmatpush3.xpose.msk.msra.mxu1 %vm226_vm1, %v1977_v48  ;;  %v1975_v10 = vpop.permute.xlu0 %1974 }
 0xc5e   : > { %3914 = vmatprep.subr.msk.mxu1 %vm226_vm1, %v1975_v10 }
 0xc5f   : > { %v1973_v7 = vpop.permute.xlu1 %1972 }
 0xc61   : > { %3915 = vmatpush3.xpose.msk.msra.mxu1 %vm226_vm1, %v1975_v10  ;;  %v1971_v38 = vpop.permute.xlu0 %1970 }
 0xc62   : > { %3916 = vmatprep.subr.msk.mxu1 %vm226_vm1, %v1973_v7 }
 0xc63   : > { %v1969_v3 = vpop.permute.xlu1 %1968 }
 0xc65   : > { %3917 = vmatpush3.xpose.msk.msra.mxu1 %vm226_vm1, %v1973_v7  ;;  %v1967_v41 = vpop.permute.xlu0 %1966 }
 0xc66   : > { %3918 = vmatprep.subr.msk.mxu1 %vm226_vm1, %v1971_v38 }
 0xc67   : > { %v1965_v52 = vpop.permute.xlu1 %1964 }
 0xc69   : > { %3919 = vmatpush3.xpose.msk.msra.mxu1 %vm226_vm1, %v1971_v38  ;;  %v1963_v54 = vpop.permute.xlu0 %1962 }
 0xc6a   : > { %3920 = vmatprep.subr.msk.mxu1 %vm226_vm1, %v1969_v3 }
 0xc6b   : > { %v1961_v21 = vpop.permute.xlu1 %1960 }
 0xc6d   : > { %3921 = vmatpush3.xpose.msk.msra.mxu1 %vm226_vm1, %v1969_v3  ;;  %v1959_v59 = vpop.permute.xlu0 %1958  ;;  %v4305_v3 = vld [vmem:[#allocation2 + $0x20] sm:$0xff] }
 0xc6e   : > { %3922 = vmatprep.subr.msk.mxu1 %vm226_vm1, %v1967_v41 }
 0xc6f   : > { %v1957_v61 = vpop.permute.xlu1 %1956 }
 0xc71   : > { %3923 = vmatpush3.xpose.msk.msra.mxu1 %vm226_vm1, %v1967_v41  ;;  %v1955_v1 = vpop.permute.xlu0 %1954 }
 0xc72   : > { %3924 = vmatprep.subr.msk.mxu1 %vm226_vm1, %v1965_v52 }
 0xc73   : > { %v2324_v57 = vpop.permute.xlu1 %2323 }
 0xc75   : > { %3925 = vmatpush3.xpose.msk.msra.mxu1 %vm226_vm1, %v1965_v52  ;;  %v2326_v47 = vpop.permute.xlu0 %2325 }
 0xc76   : > { %3926 = vmatprep.subr.msk.mxu1 %vm226_vm1, %v1963_v54 }
 0xc77   : > { %v2320_v55 = vpop.permute.xlu1 %2319 }
 0xc79   : > { %3927 = vmatpush3.xpose.msk.msra.mxu1 %vm226_vm1, %v1963_v54  ;;  %v2322_v53 = vpop.permute.xlu0 %2321  ;;  %v4306_v54 = vld [vmem:[#allocation2 + $0x38] sm:$0xff] }
 0xc7a   : > { %3928 = vmatprep.subr.msk.mxu1 %vm226_vm1, %v1961_v21 }
 0xc7b   : > { %v2316_v0 = vpop.permute.xlu1 %2315 }
 0xc7d   : > { %3929 = vmatpush3.xpose.msk.msra.mxu1 %vm226_vm1, %v1961_v21  ;;  %v2318_v5 = vpop.permute.xlu0 %2317 }
 0xc7e   : > { %3930 = vmatprep.subr.msk.mxu1 %vm226_vm1, %v1959_v59 }
 0xc7f   : > { %v2328_v16 = vpop.permute.xlu1 %2327 }
 0xc81   : > { %3931 = vmatpush3.xpose.msk.msra.mxu1 %vm226_vm1, %v1959_v59  ;;  %v2330_v37 = vpop.permute.xlu0 %2329 }
 0xc82   : > { %3932 = vmatprep.subr.msk.mxu1 %vm226_vm1, %v1957_v61  ;;  %3954 = vmatprep.subr.mxu0 %v2330_v37 }
 0xc83   : > { %3955 = vmatpush3.msra.mxu0 %v2330_v37 }
 0xc84   : > { %3956 = vmatprep.subr.mxu0 %v2328_v16 }
 0xc85   : > { %3933 = vmatpush3.xpose.msk.msra.mxu1 %vm226_vm1, %v1957_v61  ;;  %3957 = vmatpush3.msra.mxu0 %v2328_v16 }
 0xc86   : > { %3934 = vmatprep.subr.msk.mxu1 %vm226_vm1, %v1955_v1  ;;  %3958 = vmatprep.subr.mxu0 %v2326_v47 }
 0xc87   : > { %3959 = vmatpush3.msra.mxu0 %v2326_v47 }
 0xc88   : > { %3960 = vmatprep.subr.mxu0 %v2324_v57 }
 0xc89   : > { %3935 = vmatpush3.xpose.msk.msra.mxu1 %vm226_vm1, %v1955_v1  ;;  %3961 = vmatpush3.msra.mxu0 %v2324_v57  ;;  %v4307_v57 = vld [vmem:[#allocation2 + $0x30] sm:$0xff] }
 0xc8a   : > { %3962 = vmatprep.subr.mxu0 %v2322_v53  ;;  %4046 = vmatprep.subr.mxu1 %v5613_v58 }
 0xc8b   : > { %3963 = vmatpush3.msra.mxu0 %v2322_v53  ;;  %v4308_v53 = vld [vmem:[#allocation2 + $0x48] sm:$0xff] }
 0xc8c   : > { %3937 = vmatmul.mubr.msk.f32.vlgmr.msra.gmra.mxu1 %vm226_vm1, %v1919_v17  ;;  %3964 = vmatprep.subr.mxu0 %v2320_v55  ;;  %v4309_v17 = vld [vmem:[#allocation2 + $0x40] sm:$0xff] }
 0xc8d   : > { %3939 = vmatprep.mubr.msk.f32.mxu1 %vm226_vm1, %v1920_v40  ;;  %3965 = vmatpush3.msra.mxu0 %v2320_v55 }
 0xc8e   : > { %3966 = vmatprep.subr.mxu0 %v2318_v5 }
 0xc8f   : > { %3967 = vmatpush3.msra.mxu0 %v2318_v5 }
 0xc90   : > { %3940 = vmatmul.mubr.msk.f32.gmra.mxu1 %vm226_vm1, %v1921_v62  ;;  %3968 = vmatprep.subr.mxu0 %v2316_v0 }
 0xc91   : > { %3942 = vmatprep.mubr.msk.f32.mxu1 %vm226_vm1, %v1922_v19  ;;  %3969 = vmatpush3.msra.mxu0 %v2316_v0  ;;  %v4310_v19 = vld [vmem:[#allocation2 + $0x58] sm:$0xff] }
 0xc94   : > { %3943 = vmatmul.mubr.msk.f32.gmra.mxu1 %vm226_vm1, %v1923_v25 }
 0xc95   : > { %3945 = vmatprep.mubr.msk.f32.mxu1 %vm226_vm1, %v1924_v26 }
 0xc98   : > { %3946 = vmatmul.mubr.msk.f32.gmra.mxu1 %vm226_vm1, %v1925_v24 }
 0xc99   : > { %3948 = vmatprep.mubr.msk.f32.mxu1 %vm226_vm1, %v1926_v29 }
 0xc9c   : > { %3949 = vmatmul.mubr.msk.f32.gmra.mxu1 %vm226_vm1, %v1927_v28  ;;  %v4311_v28 = vld [vmem:[#allocation2 + $0x50] sm:$0xff] }
 0xc9d   : > { %3951 = vmatprep.mubr.msk.f32.mxu1 %vm226_vm1, %v1928_v32 }
 0xca0   : > { %3952 = vmatmul.mubr.msk.f32.gmra.mxu1 %vm226_vm1, %v1929_v31 }
 0xca1   : > { %4054 = vmatprep.mubr.msk.f32.mxu1 %vm4410_vm0, %v5613_v58 }
 0xd4c   : > { %v3938_v34 = vpop.f32.mrf.mxu1 }
 0xd4d   : > { %v5278_v39 = vadd.f32 %v4300_v30, %v3938_v34  ;;  %v1932_v30 = vmul.f32 %v5152_v46, %v4822_v49 }
 0xd4e   : > { %v2104_v33 = vpop.f32.mrf.mxu1 }
 0xd4f   : > { %v5280_v13 = vadd.f32 %v4301_v50, %v2104_v33  ;;  %v2166_v4 = vsel %vm804_vm3, %v5278_v39, -inf  ;;  %v1933_v33 = vmul.f32 %v5149_v63, %v4792_v43 }
 0xd50   : > { %2167 = vmax.xlane.f32.xlu0 %v2166_v4  ;;  %v3941_v56 = vpop.f32.mrf.mxu1 }
 0xd51   : > { %v5284_v35 = vadd.f32 %v4302_v15, %v3941_v56  ;;  %v2163_v44 = vsel %vm804_vm3, %v5280_v13, -inf }
 0xd52   : > { %v2114_v22 = vpop.f32.mrf.mxu1  ;;  %2164 = vmax.xlane.f32.xlu1 %v2163_v44 }
 0xd53   : > { %v2115_v6 = vadd.f32 %v4303_v11, %v2114_v22  ;;  %v2172_v7 = vsel %vm804_vm3, %v5284_v35, -inf }
 0xd54   : > { %v3944_v18 = vpop.f32.mrf.mxu1 }
 0xd55   : > { %v5288_v48 = vadd.f32 %v4304_v42, %v3944_v18  ;;  %v2169_v10 = vsel %vm804_vm3, %v2115_v6, -inf }
 0xd56   : > { %v2124_v38 = vpop.f32.mrf.mxu1  ;;  %2170 = vmax.xlane.f32.xlu0 %v2169_v10  ;;  %2173 = vmax.xlane.f32.xlu1 %v2172_v7 }
 0xd57   : > { %v2125_v41 = vadd.f32 %v4305_v3, %v2124_v38  ;;  %v2178_v61 = vsel %vm804_vm3, %v5288_v48, -inf }
 0xd58   : > { %v3947_v52 = vpop.f32.mrf.mxu1 }
 0xd59   : > { %v5293_v21 = vadd.f32 %v4306_v54, %v3947_v52  ;;  %v2175_v59 = vsel %vm804_vm3, %v2125_v41, -inf }
 0xd5a   : > { %v2134_v1 = vpop.f32.mrf.mxu1  ;;  %2176 = vmax.xlane.f32.xlu0 %v2175_v59  ;;  %2179 = vmax.xlane.f32.xlu1 %v2178_v61 }
 0xd5b   : > { %v2135_v47 = vadd.f32 %v4307_v57, %v2134_v1  ;;  %v2184_v37 = vsel %vm804_vm3, %v5293_v21, -inf }
 0xd5c   : > { %v3950_v55 = vpop.f32.mrf.mxu1 }
 0xd5d   : > { %v5298_v0 = vadd.f32 %v4308_v53, %v3950_v55  ;;  %v2181_v5 = vsel %vm804_vm3, %v2135_v47, -inf }
 0xd5e   : > { %v2144_v16 = vpop.f32.mrf.mxu1  ;;  %2182 = vmax.xlane.f32.xlu0 %v2181_v5  ;;  %2185 = vmax.xlane.f32.xlu1 %v2184_v37 }
 0xd5f   : > { %v2145_v40 = vadd.f32 %v4309_v17, %v2144_v16  ;;  %v2190_v24 = vsel %vm804_vm3, %v5298_v0, -inf }
 0xd60   : > { %v3953_v62 = vpop.f32.mrf.mxu1 }
 0xd61   : > { %v5303_v25 = vadd.f32 %v4310_v19, %v3953_v62  ;;  %v2187_v26 = vsel %vm804_vm3, %v2145_v40, -inf }
 0xd62   : > { %v2154_v29 = vpop.f32.mrf.mxu1  ;;  %2188 = vmax.xlane.f32.xlu0 %v2187_v26  ;;  %2191 = vmax.xlane.f32.xlu1 %v2190_v24 }
 0xd63   : > { %v2155_v32 = vadd.f32 %v4311_v28, %v2154_v29  ;;  %v2196_v34 = vsel %vm804_vm3, %v5303_v25, -inf }
 0xd65   : > { %v2193_v31 = vsel %vm804_vm3, %v2155_v32, -inf }
 0xd66   : > { %2194 = vmax.xlane.f32.xlu0 %v2193_v31  ;;  %2197 = vmax.xlane.f32.xlu1 %v2196_v34 }
 0xd77   : > { %2311 = vrot.lane.b32.xlu1 %v1932_v30, %s4414_s14 }
 0xd7c   : > { %2313 = vrot.lane.b32.xlu0 %v1933_v33, %s4414_s14 }
 0xdd9   : > { %v2168_v50 = vpop.xlane.xlu0 %2167 }
 0xdda   : > { %v2200_v4 = vsub.f32 %v5278_v39, %v2168_v50 }
 0xddb   : > { %v2165_v56 = vpop.xlane.xlu1 %2164 }
 0xddc   : > { %v2213_v15 = vmul.f32 1.442695, %v2200_v4  ;;  %v2199_v44 = vsub.f32 %v5280_v13, %v2165_v56 }
 0xdde   : > { %4227 = vpow2.f32 %v2213_v15  ;;  %v2211_v22 = vmul.f32 1.442695, %v2199_v44 }
 0xddf   : > { %v2171_v11 = vpop.xlane.xlu0 %2170  ;;  %v2174_v18 = vpop.xlane.xlu1 %2173 }
 0xde0   : > { %4229 = vpow2.f32 %v2211_v22  ;;  %v2201_v49 = vsub.f32 %v2115_v6, %v2171_v11  ;;  %v2202_v46 = vsub.f32 %v5284_v35, %v2174_v18 }
 0xde2   : > { %v2215_v42 = vmul.f32 1.442695, %v2201_v49  ;;  %v2217_v10 = vmul.f32 1.442695, %v2202_v46 }
 0xde3   : > { %v2177_v43 = vpop.xlane.xlu0 %2176  ;;  %v2180_v63 = vpop.xlane.xlu1 %2179 }
 0xde4   : > { %4231 = vpow2.f32 %v2215_v42  ;;  %v2203_v7 = vsub.f32 %v2125_v41, %v2177_v43  ;;  %v2204_v39 = vsub.f32 %v5288_v48, %v2180_v63  ;;  %v1930_v43 = vmul.f32 %v5145_v12, %v4824_v8 }
 0xde5   : > { %4233 = vpow2.f32 %v2217_v10  ;;  %v1931_v10 = vmul.f32 %v5143_v36, %v4826_v9 }
 0xde6   : > { %v2219_v38 = vmul.f32 1.442695, %v2203_v7  ;;  %v2221_v3 = vmul.f32 1.442695, %v2204_v39 }
 0xde7   : > { %v2183_v13 = vpop.xlane.xlu0 %2182  ;;  %v2186_v52 = vpop.xlane.xlu1 %2185 }
 0xde8   : > { %4235 = vpow2.f32 %v2219_v38  ;;  %v2205_v54 = vsub.f32 %v2135_v47, %v2183_v13  ;;  %v2206_v59 = vsub.f32 %v5293_v21, %v2186_v52 }
 0xde9   : > { %4237 = vpow2.f32 %v2221_v3 }
 0xdea   : > { %v2223_v6 = vmul.f32 1.442695, %v2205_v54  ;;  %v2225_v35 = vmul.f32 1.442695, %v2206_v59 }
 0xdeb   : > { %v5322_v61 = vpop.eup %4227  ;;  %v2189_v1 = vpop.xlane.xlu0 %2188 }
 0xdec   : > { %v2192_v57 = vpop.xlane.xlu1 %2191  ;;  %4239 = vpow2.f32 %v2223_v6  ;;  %v2207_v41 = vsub.f32 %v2145_v40, %v2189_v1  ;;  %v2238_v55 = vsel %vm804_vm3, %v5322_v61, 0.0 }
 0xded   : > { %v2208_v48 = vsub.f32 %v5298_v0, %v2192_v57  ;;  %v5327_v53 = vpop.eup %4229  ;;  %4241 = vpow2.f32 %v2225_v35  ;;  %2239 = vadd.xlane.f32.xlu1 %v2238_v55 }
 0xdee   : > { %v2227_v47 = vmul.f32 1.442695, %v2207_v41  ;;  %v2235_v5 = vsel %vm804_vm3, %v5327_v53, 0.0 }
 0xdef   : > { %v2229_v21 = vmul.f32 1.442695, %v2208_v48  ;;  %v2195_v37 = vpop.xlane.xlu0 %2194  ;;  %2236 = vadd.xlane.f32.xlu0 %v2235_v5 }
 0xdf0   : > { %v2198_v16 = vpop.xlane.xlu1 %2197  ;;  %4243 = vpow2.f32 %v2227_v47  ;;  %v2209_v17 = vsub.f32 %v2155_v32, %v2195_v37 }
 0xdf1   : > { %v2210_v40 = vsub.f32 %v5303_v25, %v2198_v16  ;;  %v5332_v0 = vpop.eup %4231  ;;  %4245 = vpow2.f32 %v2229_v21 }
 0xdf2   : > { %v5334_v62 = vpop.eup %4233  ;;  %v2231_v19 = vmul.f32 1.442695, %v2209_v17  ;;  %v2241_v24 = vsel %vm804_vm3, %v5332_v0, 0.0 }
 0xdf3   : > { %v2233_v26 = vmul.f32 1.442695, %v2210_v40  ;;  %v2314_v29 = vpop.permute.xlu0 %2313  ;;  %2242 = vadd.xlane.f32.xlu0 %v2241_v24  ;;  %v2244_v28 = vsel %vm804_vm3, %v5334_v62, 0.0 }
 0xdf4   : > { %4247 = vpow2.f32 %v2231_v19  ;;  %2245 = vadd.xlane.f32.xlu1 %v2244_v28  ;;  %3970 = vmatprep.subr.mxu0 %v2314_v29  ;;  %v2312_v25 = vpop.permute.xlu1 %2311 }
 0xdf5   : > { %v5340_v32 = vpop.eup %4235  ;;  %4249 = vpow2.f32 %v2233_v26  ;;  %3971 = vmatpush3.msra.mxu0 %v2314_v29 }
 0xdf6   : > { %v5342_v31 = vpop.eup %4237  ;;  %3972 = vmatprep.subr.mxu0 %v2312_v25  ;;  %v2247_v34 = vsel %vm804_vm3, %v5340_v32, 0.0 }
 0xdf7   : > { %v2250_v30 = vsel %vm804_vm3, %v5342_v31, 0.0  ;;  %3973 = vmatpush3.msra.mxu0 %v2312_v25 }
 0xdf8   : > { %2248 = vadd.xlane.f32.xlu1 %v2247_v34  ;;  %2251 = vadd.xlane.f32.xlu0 %v2250_v30  ;;  %v5407_v34 = vld [vmem:[#allocation2 + $0x130] sm:$0xff]  ;;  %v5413_v30 = vld [vmem:[#allocation2 + $0x128] sm:$0xff] }
 0xdf9   : > { %v5348_v33 = vpop.eup %4239 }
 0xdfa   : > { %v5350_v50 = vpop.eup %4241  ;;  %v2253_v4 = vsel %vm804_vm3, %v5348_v33, 0.0 }
 0xdfb   : > { %v2256_v56 = vsel %vm804_vm3, %v5350_v50, 0.0 }
 0xdfc   : > { %2254 = vadd.xlane.f32.xlu1 %v2253_v4  ;;  %2257 = vadd.xlane.f32.xlu0 %v2256_v56 }
 0xdfd   : > { %v5356_v15 = vpop.eup %4243 }
 0xdfe   : > { %v5358_v44 = vpop.eup %4245  ;;  %v2259_v22 = vsel %vm804_vm3, %v5356_v15, 0.0 }
 0xdff   : > { %v2262_v11 = vsel %vm804_vm3, %v5358_v44, 0.0 }
 0xe00   : > { %2260 = vadd.xlane.f32.xlu1 %v2259_v22  ;;  %2263 = vadd.xlane.f32.xlu0 %v2262_v11 }
 0xe01   : > { %v5364_v18 = vpop.eup %4247 }
 0xe02   : > { %v5366_v49 = vpop.eup %4249  ;;  %v2265_v46 = vsel %vm804_vm3, %v5364_v18, 0.0 }
 0xe03   : > { %v2268_v42 = vsel %vm804_vm3, %v5366_v49, 0.0 }
 0xe04   : > { %2266 = vadd.xlane.f32.xlu1 %v2265_v46  ;;  %2269 = vadd.xlane.f32.xlu0 %v2268_v42 }
 0xe15   : > { %2309 = vrot.lane.b32.xlu1 %v1931_v10, %s4414_s14 }
 0xe1a   : > { %2307 = vrot.lane.b32.xlu0 %v1930_v43, %s4414_s14 }
 0xe1e   : > { %2596 = vrot.lane.b32.xlu0 %v5407_v34, %s4413_s8 }
 0xe76   : > { %v2240_v7 = vpop.xlane.xlu1 %2239 }
 0xe78   : > { %v2237_v63 = vpop.xlane.xlu0 %2236 }
 0xe79   : > { %4251 = vrcp.f32 %v2237_v63 }
 0xe7a   : > { %4253 = vrcp.f32 %v2240_v7 }
 0xe7c   : > { %v2243_v39 = vpop.xlane.xlu0 %2242 }
 0xe7d   : > { %v2246_v38 = vpop.xlane.xlu1 %2245  ;;  %4255 = vrcp.f32 %v2243_v39 }
 0xe7e   : > { %4257 = vrcp.f32 %v2246_v38 }
 0xe81   : > { %v2252_v3 = vpop.xlane.xlu0 %2251  ;;  %v2249_v13 = vpop.xlane.xlu1 %2248 }
 0xe82   : > { %4259 = vrcp.f32 %v2249_v13 }
 0xe83   : > { %4261 = vrcp.f32 %v2252_v3 }
 0xe85   : > { %v2258_v52 = vpop.xlane.xlu0 %2257  ;;  %v2255_v54 = vpop.xlane.xlu1 %2254 }
 0xe86   : > { %v4252_v59 = vpop.eup %4251  ;;  %4263 = vrcp.f32 %v2255_v54 }
 0xe87   : > { %v2283_v9 = vmul.f32 %v4252_v59, %v5327_v53  ;;  %4265 = vrcp.f32 %v2258_v52  ;;  %v4254_v35 = vpop.eup %4253 }
 0xe88   : > { %v2284_v48 = vmul.f32 %v4254_v35, %v5322_v61 }
 0xe89   : > { %v2264_v36 = vpop.xlane.xlu0 %2263  ;;  %v2261_v8 = vpop.xlane.xlu1 %2260  ;;  %3978 = vmatprep.mubr.msk.f32.mxu0 %vm804_vm3, %v2283_v9 }
 0xe8a   : > { %4267 = vrcp.f32 %v2261_v8  ;;  %v4256_v57 = vpop.eup %4255 }
 0xe8b   : > { %4269 = vrcp.f32 %v2264_v36  ;;  %v4258_v55 = vpop.eup %4257  ;;  %v2285_v53 = vmul.f32 %v4256_v57, %v5332_v0 }
 0xe8c   : > { %v2286_v21 = vmul.f32 %v4258_v55, %v5334_v62 }
 0xe8d   : > { %v2270_v12 = vpop.xlane.xlu0 %2269  ;;  %v2267_v6 = vpop.xlane.xlu1 %2266 }
 0xe8e   : > { %4271 = vrcp.f32 %v2267_v6 }
 0xe8f   : > { %v4260_v47 = vpop.eup %4259  ;;  %4273 = vrcp.f32 %v2270_v12 }
 0xe90   : > { %v4262_v5 = vpop.eup %4261  ;;  %v2287_v61 = vmul.f32 %v4260_v47, %v5340_v32 }
 0xe91   : > { %v2310_v1 = vpop.permute.xlu1 %2309  ;;  %v2308_v41 = vpop.permute.xlu0 %2307  ;;  %v2288_v16 = vmul.f32 %v4262_v5, %v5342_v31  ;;  %v5405_v31 = vld [vmem:[#allocation2 + $0x138] sm:$0xff] }
 0xe92   : > { %3974 = vmatprep.subr.mxu0 %v2310_v1  ;;  %2598 = vrot.lane.b32.xlu1 %v5405_v31, %s4413_s8 }
 0xe93   : > { %3975 = vmatpush3.msra.mxu0 %v2310_v1  ;;  %v4264_v37 = vpop.eup %4263 }
 0xe94   : > { %3976 = vmatprep.subr.mxu0 %v2308_v41  ;;  %v4266_v17 = vpop.eup %4265  ;;  %v2289_v40 = vmul.f32 %v4264_v37, %v5348_v33  ;;  %v5415_v33 = vld [vmem:[#allocation2 + $0x120] sm:$0xff] }
 0xe95   : > { %3977 = vmatpush3.msra.mxu0 %v2308_v41  ;;  %v2290_v62 = vmul.f32 %v4266_v17, %v5350_v50  ;;  %2592 = vrot.lane.b32.xlu0 %v5415_v33, %s4413_s8  ;;  %v2597_v43 = vpop.permute.xlu0 %2596 }
 0xe96   : > { %3979 = vmatmul.mubr.msk.f32.vlgmr.msra.gmra.mxu0 %vm804_vm3, %v2284_v48  ;;  %3996 = vmatprep.subr.mxu0 %v5613_v58 }
 0xe97   : > { %3981 = vmatprep.mubr.msk.f32.mxu0 %vm804_vm3, %v2285_v53  ;;  %v4268_v0 = vpop.eup %4267  ;;  %2594 = vrot.lane.b32.xlu1 %v5413_v30, %s4413_s8 }
 0xe98   : > { %v4270_v19 = vpop.eup %4269  ;;  %v2291_v26 = vmul.f32 %v4268_v0, %v5356_v15 }
 0xe99   : > { %v2292_v29 = vmul.f32 %v4270_v19, %v5358_v44  ;;  %2766 = vrot.lane.b32.xlu0 %v5407_v34, %s4411_s29 }
 0xe9a   : > { %3982 = vmatmul.mubr.msk.f32.gmra.mxu0 %vm804_vm3, %v2286_v21 }
 0xe9b   : > { %3984 = vmatprep.mubr.msk.f32.mxu0 %vm804_vm3, %v2287_v61  ;;  %v4272_v24 = vpop.eup %4271  ;;  %2605 = vrot.lane.b32.xlu1 %v5127_v20, %s4413_s8 }
 0xe9c   : > { %v4274_v28 = vpop.eup %4273  ;;  %v2293_v32 = vmul.f32 %v4272_v24, %v5364_v18 }
 0xe9d   : > { %v2294_v25 = vmul.f32 %v4274_v28, %v5366_v49 }
 0xe9e   : > { %3985 = vmatmul.mubr.msk.f32.gmra.mxu0 %vm804_vm3, %v2288_v16 }
 0xe9f   : > { %3987 = vmatprep.mubr.msk.f32.mxu0 %vm804_vm3, %v2289_v40  ;;  %2768 = vrot.lane.b32.xlu1 %v5405_v31, %s4411_s29 }
 0xea2   : > { %3988 = vmatmul.mubr.msk.f32.gmra.mxu0 %vm804_vm3, %v2290_v62 }
 0xea3   : > { %3990 = vmatprep.mubr.msk.f32.mxu0 %vm804_vm3, %v2291_v26  ;;  %v2869_v26 = vld [vmem:[#allocation2 + $0x118] sm:$0xff] }
 0xea6   : > { %3991 = vmatmul.mubr.msk.f32.gmra.mxu0 %vm804_vm3, %v2292_v29 }
 0xea7   : > { %3993 = vmatprep.mubr.msk.f32.mxu0 %vm804_vm3, %v2293_v32 }
 0xeaa   : > { %3994 = vmatmul.mubr.msk.f32.gmra.mxu0 %vm804_vm3, %v2294_v25 }
 0xeab   : > { %4020 = vmatprep.mubr.msk.f32.mxu0 %vm4410_vm0, %v5613_v58 }
 0xf04   : > { %v2599_v20 = vpop.permute.xlu1 %2598 }
 0xf07   : > { %v2593_v7 = vpop.permute.xlu0 %2592 }
 0xf09   : > { %v2595_v63 = vpop.permute.xlu1 %2594 }
 0xf0b   : > { %v2767_v36 = vpop.permute.xlu0 %2766 }
 0xf0d   : > { %v2606_v59 = vpop.permute.xlu1 %2605 }
 0xf11   : > { %v2769_v9 = vpop.permute.xlu1 %2768 }
 0xf12   : > { %4047 = vmatpush3.msra.mxu1 %v2769_v9 }
 0xf13   : > { %4048 = vmatprep.subr.mxu1 %v5613_v58 }
 0xf14   : > { %4049 = vmatpush3.msra.mxu1 %v2767_v36 }
 0xf15   : > { %4050 = vmatprep.subr.mxu1 %v5613_v58 }
 0xf56   : > { %v3980_v50 = vpop.f32.mrf.mxu0 }
 0xf58   : > { %v2445_v4 = vpop.f32.mrf.mxu0 }
 0xf5a   : > { %v3983_v56 = vpop.f32.mrf.mxu0 }
 0xf5c   : > { %v2455_v15 = vpop.f32.mrf.mxu0 }
 0xf5e   : > { %v3986_v44 = vpop.f32.mrf.mxu0 }
 0xf60   : > { %v2465_v22 = vpop.f32.mrf.mxu0 }
 0xf62   : > { %v3989_v11 = vpop.f32.mrf.mxu0 }
 0xf64   : > { %v2475_v18 = vpop.f32.mrf.mxu0 }
 0xf66   : > { %v3992_v49 = vpop.f32.mrf.mxu0 }
 0xf68   : > { %v2485_v46 = vpop.f32.mrf.mxu0 }
 0xf6a   : > { %v3995_v42 = vpop.f32.mrf.mxu0 }
 0xf6b   : > { %3997 = vmatpush3.msra.mxu0 %v3995_v42 }
 0xf6c   : > { %v2495_v10 = vpop.f32.mrf.mxu0  ;;  %3998 = vmatprep.subr.mxu0 %v5613_v58 }
 0xf6d   : > { %3999 = vmatpush3.msra.mxu0 %v2495_v10 }
 0xf6e   : > { %4000 = vmatprep.subr.mxu0 %v5613_v58 }
 0xf6f   : > { %4001 = vmatpush3.msra.mxu0 %v3992_v49 }
 0xf70   : > { %4002 = vmatprep.subr.mxu0 %v5613_v58 }
 0xf71   : > { %4003 = vmatpush3.msra.mxu0 %v2485_v46 }
 0xf72   : > { %4004 = vmatprep.subr.mxu0 %v5613_v58 }
 0xf73   : > { %4005 = vmatpush3.msra.mxu0 %v3989_v11 }
 0xf74   : > { %4006 = vmatprep.subr.mxu0 %v5613_v58 }
 0xf75   : > { %4007 = vmatpush3.msra.mxu0 %v2475_v18 }
 0xf76   : > { %4008 = vmatprep.subr.mxu0 %v5613_v58 }
 0xf77   : > { %4009 = vmatpush3.msra.mxu0 %v3986_v44 }
 0xf78   : > { %4010 = vmatprep.subr.mxu0 %v5613_v58 }
 0xf79   : > { %4011 = vmatpush3.msra.mxu0 %v2465_v22 }
 0xf7a   : > { %4012 = vmatprep.subr.mxu0 %v5613_v58 }
 0xf7b   : > { %4013 = vmatpush3.msra.mxu0 %v3983_v56 }
 0xf7c   : > { %4014 = vmatprep.subr.mxu0 %v5613_v58 }
 0xf7d   : > { %4015 = vmatpush3.msra.mxu0 %v2455_v15 }
 0xf7e   : > { %4016 = vmatprep.subr.mxu0 %v5613_v58 }
 0xf7f   : > { %4017 = vmatpush3.msra.mxu0 %v3980_v50 }
 0xf80   : > { %4018 = vmatprep.subr.mxu0 %v5613_v58 }
 0xf81   : > { %4019 = vmatpush3.msra.mxu0 %v2445_v4 }
 0xf82   : > { %4021 = vmatmul.mubr.msk.f32.vlgmr.msra.gmra.mxu0 %vm804_vm3, %v4988_v60  ;;  %4029 = vmatprep.subr.mxu0 %v5613_v58  ;;  %v2747_v60 = vsub.s32 4, %v4544_v23 }
 0xf83   : > { %4023 = vmatprep.mubr.msk.f32.mxu0 %vm4410_vm0, %v5613_v58  ;;  %4030 = vmatpush3.msra.mxu0 %v2599_v20 }
 0xf84   : > { %4031 = vmatprep.subr.mxu0 %v5613_v58 }
 0xf85   : > { %4032 = vmatpush3.msra.mxu0 %v2597_v43 }
 0xf86   : > { %4024 = vmatmul.mubr.msk.f32.gmra.mxu0 %vm804_vm3, %v4991_v51  ;;  %4033 = vmatprep.subr.mxu0 %v5613_v58  ;;  %v5456_v51 = vld [vmem:[#allocation2 + $0x140] sm:$0xff] }
 0xf87   : > { %4026 = vmatprep.mubr.msk.f32.mxu0 %vm4410_vm0, %v5613_v58  ;;  %4034 = vmatpush3.msra.mxu0 %v2595_v63  ;;  %v5459_v39 = vrot.slane %v5456_v51, %v2747_v60 }
 0xf88   : > { %4035 = vmatprep.subr.mxu0 %v5613_v58 }
 0xf89   : > { %4036 = vmatpush3.msra.mxu0 %v2593_v7  ;;  %2750 = vrot.lane.b32.xlu1 %v5459_v39, %s4414_s14 }
 0xf8a   : > { %4027 = vmatmul.mubr.msk.f32.gmra.mxu0 %vm804_vm3, %v4994_v2  ;;  %4063 = vmatprep.subr.mxu0 %v5613_v58 }
 0xf8b   : > { %4037 = vmatprep.mubr.msk.f32.mxu0 %vm4410_vm0, %v5613_v58 }
 0xf8d   : > { %2764 = vrot.lane.b32.xlu1 %v5413_v30, %s4411_s29 }
 0xffb   : > { %v5483_v8 = vpop.permute.xlu1 %2750 }
 0xfff   : > { %v2765_v12 = vpop.permute.xlu1 %2764 }
0x1000   : > { %4051 = vmatpush3.msra.mxu1 %v2765_v12 }
0x1001   : > { %4052 = vmatprep.subr.mxu1 %v5613_v58 }
0x1042   : > { %v2570_v38 = vpop.f32.mrf.mxu0 }
0x1043   : > { %4038 = vmatmul.mubr.msk.f32.vlgmr.msra.gmra.mxu0 %vm226_vm1, %v2570_v38 }
0x1044   : > { %v4022_v2 = vpop.f32.mrf.mxu0  ;;  %4040 = vmatprep.mubr.msk.f32.mxu0 %vm4410_vm0, %v5613_v58  ;;  %4064 = vmatpush3.msra.mxu0 %v5405_v31 }
0x1045   : > { %4065 = vmatprep.subr.mxu0 %v5613_v58 }
0x1046   : > { %v2575_v3 = vpop.f32.mrf.mxu0  ;;  %4066 = vmatpush3.msra.mxu0 %v5407_v34 }
0x1047   : > { %4041 = vmatmul.mubr.msk.f32.gmra.mxu0 %vm226_vm1, %v2575_v3  ;;  %4067 = vmatprep.subr.mxu0 %v5613_v58 }
0x1048   : > { %v4025_v13 = vpop.f32.mrf.mxu0  ;;  %4043 = vmatprep.mubr.msk.f32.mxu0 %vm4410_vm0, %v5613_v58  ;;  %4068 = vmatpush3.msra.mxu0 %v5413_v30 }
0x1049   : > { %4069 = vmatprep.subr.mxu0 %v5613_v58 }
0x104a   : > { %v2580_v52 = vpop.f32.mrf.mxu0  ;;  %4070 = vmatpush3.msra.mxu0 %v5415_v33 }
0x104b   : > { %4044 = vmatmul.mubr.msk.f32.gmra.mxu0 %vm226_vm1, %v2580_v52  ;;  %4071 = vmatprep.subr.mxu0 %v5613_v58 }
0x104c   : > { %v4028_v54 = vpop.f32.mrf.mxu0  ;;  %4079 = vmatprep.mubr.msk.f32.mxu0 %vm4410_vm0, %v5613_v58  ;;  %4072 = vmatpush3.msra.mxu0 %v2869_v26 }
0x104d   : > { %4073 = vmatprep.subr.mxu0 %v5613_v58 }
0x1103   : > { %v2683_v6 = vpop.f32.mrf.mxu0 }
0x1104   : > { %v2684_v35 = vadd.f32 %v2683_v6, %v2606_v59 }
0x1105   : > { %v4039_v1 = vpop.f32.mrf.mxu0 }
0x1106   : > { %v2697_v57 = vadd.f32 %v2684_v35, %v5109_v14  ;;  %v2868_v35 = vld [vmem:[#allocation2 + $0x110] sm:$0xff]  ;;  %v2867_v1 = vld [vmem:[#allocation2 + $0x108] sm:$0xff] }
0x1107   : > { %v2688_v41 = vpop.f32.mrf.mxu0  ;;  %4074 = vmatpush3.msra.mxu0 %v2868_v35 }
0x1108   : > { %v2689_v48 = vadd.f32 %v2688_v41, %v2606_v59  ;;  %v2700_v55 = vsel %vm226_vm1, %v2697_v57, 0.0  ;;  %v2712_v53 = vmul.f32 %v2697_v57, %v2697_v57  ;;  %4075 = vmatprep.subr.mxu0 %v5613_v58 }
0x1109   : > { %v4042_v47 = vpop.f32.mrf.mxu0  ;;  %2701 = vadd.xlane.f32.xlu0 %v2700_v55  ;;  %4076 = vmatpush3.msra.mxu0 %v2867_v1 }
0x110a   : > { %v2698_v21 = vadd.f32 %v2689_v48, %v5115_v27  ;;  %v2715_v5 = vsel %vm226_vm1, %v2712_v53, 0.0  ;;  %4077 = vmatprep.subr.mxu0 %v5613_v58 }
0x110b   : > { %v2693_v61 = vpop.f32.mrf.mxu0  ;;  %2716 = vadd.xlane.f32.xlu1 %v2715_v5 }
0x110c   : > { %v2694_v37 = vadd.f32 %v2693_v61, %v2606_v59  ;;  %v2703_v16 = vsel %vm226_vm1, %v2698_v21, 0.0  ;;  %v2713_v17 = vmul.f32 %v2698_v21, %v2698_v21 }
0x110d   : > { %v4045_v40 = vpop.f32.mrf.mxu0  ;;  %2704 = vadd.xlane.f32.xlu0 %v2703_v16 }
0x110e   : > { %v2699_v14 = vadd.f32 %v2694_v37, %v5121_v45  ;;  %v2718_v62 = vsel %vm226_vm1, %v2713_v17, 0.0  ;;  %v2872_v40 = vsub.s32 5, %v4544_v23 }
0x1110   : > { %v2706_v0 = vsel %vm226_vm1, %v2699_v14, 0.0  ;;  %v2714_v19 = vmul.f32 %v2699_v14, %v2699_v14 }
0x1111   : > { %2707 = vadd.xlane.f32.xlu1 %v2706_v0  ;;  %2719 = vadd.xlane.f32.xlu0 %v2718_v62 }
0x1112   : > { %v2721_v27 = vsel %vm226_vm1, %v2714_v19, 0.0 }
0x1115   : > { %2722 = vadd.xlane.f32.xlu0 %v2721_v27 }
0x1122   : > { %2762 = vrot.lane.b32.xlu1 %v5415_v33, %s4411_s29 }
0x112b   : > { %2756 = vrot.lane.b32.xlu0 %v5459_v39, %s4413_s8 }
0x1192   : > { %v2702_v45 = vpop.xlane.xlu0 %2701 }
0x1193   : > { %v2709_v24 = vmul.f32 0.03125, %v2702_v45 }
0x1194   : > { %v2717_v29 = vpop.xlane.xlu1 %2716 }
0x1195   : > { %v2727_v28 = vmul.f32 %v2709_v24, %v2709_v24  ;;  %v2724_v32 = vmul.f32 0.03125, %v2717_v29  ;;  %v2733_v20 = vsub.f32 %v2697_v57, %v2709_v24  ;;  %v2866_v57 = vld [vmem:[#allocation2 + $0x100] sm:$0xff] }
0x1196   : > { %v2705_v25 = vpop.xlane.xlu0 %2704  ;;  %4078 = vmatpush3.msra.mxu0 %v2866_v57 }
0x1197   : > { %v2730_v31 = vsub.f32 %v2724_v32, %v2727_v28  ;;  %v2710_v34 = vmul.f32 0.03125, %v2705_v25 }
0x1199   : > { %v2736_v30 = vadd.f32 1e-05, %v2730_v31  ;;  %v2728_v33 = vmul.f32 %v2710_v34, %v2710_v34  ;;  %v2734_v38 = vsub.f32 %v2698_v21, %v2710_v34 }
0x119a   : > { %v2720_v50 = vpop.xlane.xlu0 %2719  ;;  %v2708_v4 = vpop.xlane.xlu1 %2707 }
0x119b   : > { %4275 = vrsqrt.f32 %v2736_v30  ;;  %v2725_v56 = vmul.f32 0.03125, %v2720_v50  ;;  %v2711_v15 = vmul.f32 0.03125, %v2708_v4 }
0x119d   : > { %v2731_v44 = vsub.f32 %v2725_v56, %v2728_v33  ;;  %v2729_v49 = vmul.f32 %v2711_v15, %v2711_v15  ;;  %v2735_v52 = vsub.f32 %v2699_v14, %v2711_v15  ;;  %v2873_v14 = vrot.slane %v5456_v51, %v2872_v40 }
0x119e   : > { %v2723_v22 = vpop.xlane.xlu0 %2722  ;;  %v2763_v11 = vpop.permute.xlu1 %2762 }
0x119f   : > { %v2737_v18 = vadd.f32 1e-05, %v2731_v44  ;;  %v2726_v46 = vmul.f32 0.03125, %v2723_v22  ;;  %4053 = vmatpush3.msra.mxu1 %v2763_v11  ;;  %v4313_v44 = vld [vmem:[#allocation2 + $0x78] sm:$0xff]  ;;  %v3101_v22 = vld [vmem:[#allocation2 + $0xb0] sm:$0xff]  ;;  %v3100_v11 = vld [vmem:[#allocation2 + $0xa8] sm:$0xff] }
0x11a0   : > { %4088 = vmatprep.subr.mxu1 %v5613_v58 }
0x11a1   : > { %4277 = vrsqrt.f32 %v2737_v18  ;;  %v2732_v42 = vsub.f32 %v2726_v46, %v2729_v49  ;;  %v3099_v18 = vld [vmem:[#allocation2 + $0xa0] sm:$0xff]  ;;  %v5544_v49 = vld [vmem:[#allocation2 + $0x98] sm:$0xff] }
0x11a2   : > { %v2757_v7 = vpop.permute.xlu0 %2756 }
0x11a3   : > { %v2738_v10 = vadd.f32 1e-05, %v2732_v42 }
0x11a5   : > { %4279 = vrsqrt.f32 %v2738_v10 }
0x11a8   : > { %v4276_v43 = vpop.eup %4275 }
0x11a9   : > { %v2742_v63 = vmul.f32 %v4276_v43, %v2733_v20 }
0x11ab   : > { %v2753_v60 = vmul.f32 %v5483_v8, %v2742_v63 }
0x11ad   : > { %v2759_v2 = vadd.f32 %v2757_v7, %v2753_v60 }
0x11ae   : > { %v4278_v3 = vpop.eup %4277 }
0x11af   : > { %v2743_v13 = vmul.f32 %v4278_v3, %v2734_v38  ;;  %4055 = vmatmul.mubr.msk.f32.vlgmr.msra.gmra.mxu1 %vm226_vm1, %v2759_v2 }
0x11b0   : > { %4057 = vmatprep.mubr.msk.f32.mxu1 %vm4410_vm0, %v5613_v58 }
0x11b1   : > { %v2754_v54 = vmul.f32 %v5483_v8, %v2743_v13 }
0x11b2   : > { %v4280_v59 = vpop.eup %4279 }
0x11b3   : > { %v2744_v9 = vmul.f32 %v4280_v59, %v2735_v52  ;;  %v2760_v36 = vadd.f32 %v2757_v7, %v2754_v54 }
0x11b5   : > { %v2755_v12 = vmul.f32 %v5483_v8, %v2744_v9  ;;  %4058 = vmatmul.mubr.msk.f32.gmra.mxu1 %vm226_vm1, %v2760_v36 }
0x11b6   : > { %4060 = vmatprep.mubr.msk.f32.mxu1 %vm4410_vm0, %v5613_v58 }
0x11b7   : > { %v2761_v6 = vadd.f32 %v2757_v7, %v2755_v12 }
0x11b9   : > { %4061 = vmatmul.mubr.msk.f32.gmra.mxu1 %vm226_vm1, %v2761_v6 }
0x11ba   : > { %4094 = vmatprep.mubr.msk.f32.mxu1 %vm4410_vm0, %v5613_v58 }
0x126f   : > { %v2849_v8 = vpop.f32.mrf.mxu1 }
0x1270   : > { %v2850_v41 = vadd.f32 %v2849_v8, %v5459_v39 }
0x1271   : > { %v4056_v48 = vpop.f32.mrf.mxu1 }
0x1272   : > { %v2863_v55 = vmax.f32 %v2850_v41, 0.0 }
0x1274   : > { %4080 = vmatmul.mubr.msk.f32.vlgmr.msra.gmra.mxu0 %vm1529_vm4, %v2863_v55 }
0x1275   : > { %v2854_v53 = vpop.f32.mrf.mxu1  ;;  %4082 = vmatprep.mubr.msk.f32.mxu0 %vm4410_vm0, %v5613_v58 }
0x1276   : > { %v2855_v47 = vadd.f32 %v2854_v53, %v5459_v39 }
0x1277   : > { %v4059_v21 = vpop.f32.mrf.mxu1 }
0x1278   : > { %v2864_v5 = vmax.f32 %v2855_v47, 0.0 }
0x1279   : > { %v2859_v61 = vpop.f32.mrf.mxu1 }
0x127a   : > { %v2860_v37 = vadd.f32 %v2859_v61, %v5459_v39  ;;  %4083 = vmatmul.mubr.msk.f32.gmra.mxu0 %vm1529_vm4, %v2864_v5 }
0x127b   : > { %v4062_v16 = vpop.f32.mrf.mxu1  ;;  %4085 = vmatprep.mubr.msk.f32.mxu0 %vm4410_vm0, %v5613_v58 }
0x127c   : > { %v2865_v17 = vmax.f32 %v2860_v37, 0.0 }
0x127e   : > { %4086 = vmatmul.mubr.msk.f32.gmra.mxu0 %vm1529_vm4, %v2865_v17 }
0x1334   : > { %v2949_v0 = vpop.f32.mrf.mxu0 }
0x1335   : > { %v2950_v62 = vadd.f32 %v2949_v0, %v2873_v14 }
0x1336   : > { %v4081_v19 = vpop.f32.mrf.mxu0 }
0x1337   : > { %v5528_v27 = vadd.f32 %v2950_v62, %v2759_v2 }
0x1339   : > { %v2966_v39 = vsel %vm226_vm1, %v5528_v27, 0.0  ;;  %v2978_v56 = vmul.f32 %v5528_v27, %v5528_v27 }
0x133a   : > { %2967 = vadd.xlane.f32.xlu0 %v2966_v39  ;;  %v2954_v26 = vpop.f32.mrf.mxu0 }
0x133b   : > { %v2955_v45 = vadd.f32 %v2954_v26, %v2873_v14  ;;  %v2981_v15 = vsel %vm226_vm1, %v2978_v56, 0.0 }
0x133c   : > { %v4084_v24 = vpop.f32.mrf.mxu0 }
0x133d   : > { %v2964_v29 = vadd.f32 %v2955_v45, %v2760_v36  ;;  %v5614_v24 = vsub.s32 0, %v4544_v23 }
0x133e   : > { %v2959_v28 = vpop.f32.mrf.mxu0 }
0x133f   : > { %v2960_v32 = vadd.f32 %v2959_v28, %v2873_v14  ;;  %v2969_v25 = vsel %vm226_vm1, %v2964_v29, 0.0  ;;  %v2979_v31 = vmul.f32 %v2964_v29, %v2964_v29 }
0x1340   : > { %2970 = vadd.xlane.f32.xlu1 %v2969_v25  ;;  %v4087_v51 = vpop.f32.mrf.mxu0 }
0x1341   : > { %v2965_v34 = vadd.f32 %v2960_v32, %v2761_v6  ;;  %v2984_v30 = vsel %vm226_vm1, %v2979_v31, 0.0 }
0x1343   : > { %v2972_v50 = vsel %vm226_vm1, %v2965_v34, 0.0  ;;  %v2980_v4 = vmul.f32 %v2965_v34, %v2965_v34 }
0x1344   : > { %2985 = vadd.xlane.f32.xlu1 %v2984_v30  ;;  %2973 = vadd.xlane.f32.xlu0 %v2972_v50 }
0x1345   : > { %v2987_v33 = vsel %vm226_vm1, %v2980_v4, 0.0 }
0x1348   : > { %2988 = vadd.xlane.f32.xlu0 %v2987_v33 }
0x134c   : > { %2982 = vadd.xlane.f32.xlu0 %v2981_v15 }
0x1355   : > { %3012 = vrot.lane.b32.xlu1 %v2873_v14, %s4411_s29  ;;  %s4340_s29 = scalar_lea.vmem %s3215_s24, 128 }
0x1356   : > { %p4341_p8 = scmp.ne.s32.totalorder %s3215_s24, %s4340_s29 }
0x1358   : > { %p4342_p9 = pnand %p4341_p8, %p4470_p5 }
0x1359   : > { %3024 = vrot.lane.b32.xlu1 %v4313_v44, %s4412_s30 }
0x135a   : > { %p4343_p10 = pneg %p4342_p9 }
0x135d   : > { %3116 = vrot.lane.b32.xlu1 %v3101_v22, %s4412_s30 }
0x1361   : > { %3112 = vrot.lane.b32.xlu1 %v3099_v18, %s4412_s30 }
0x1362   : > { %3018 = vrot.lane.b32.xlu0 %v2873_v14, %s4414_s14 }
0x1366   : > { %3114 = vrot.lane.b32.xlu0 %v3100_v11, %s4412_s30 }
0x136a   : > { %3110 = vrot.lane.b32.xlu0 %v5544_v49, %s4412_s30  ;;  %s4344_s30 = sshll.u32 %s4416_s13, 4  ;;  %s4345_s30 = int_to_ptr.vmem [resolvable:$false] %s4344_s30 }
0x136b   : > { %s4346_s3 = scalar_lea.vmem %s4345_s30, 256  ;;  %p4347_p11 = scmp.lt.s32.totalorder %s3215_s24, %s4345_s30 }
0x136c   : > { %p4348_p12 = scmp.lt.s32.totalorder %s4346_s3, %s4340_s29 }
0x136e   : > { %p4349_p13 = por %p4348_p12, %p4347_p11 }
0x1370   : > { %p4350_p0 = pnand %p4349_p13, %p4343_p10 }
0x13c3   : > { %v2968_v46 = vpop.xlane.xlu0 %2967 }
0x13c4   : > { %v2975_v3 = vmul.f32 0.03125, %v2968_v46 }
0x13c6   : > { %v2993_v36 = vmul.f32 %v2975_v3, %v2975_v3  ;;  %v2999_v21 = vsub.f32 %v5528_v27, %v2975_v3 }
0x13c9   : > { %v2971_v42 = vpop.xlane.xlu1 %2970 }
0x13ca   : > { %v2976_v10 = vmul.f32 0.03125, %v2971_v42 }
0x13cc   : > { %v2994_v63 = vmul.f32 %v2976_v10, %v2976_v10  ;;  %v3000_v8 = vsub.f32 %v2964_v29, %v2976_v10  ;;  %v3105_v29 = vrot.slane %v5544_v49, %v5614_v24 }
0x13cd   : > { %v2986_v20 = vpop.xlane.xlu1 %2985  ;;  %v2974_v43 = vpop.xlane.xlu0 %2973 }
0x13ce   : > { %v2991_v7 = vmul.f32 0.03125, %v2986_v20  ;;  %v2977_v60 = vmul.f32 0.03125, %v2974_v43  ;;  %3123 = vrot.lane.b32.xlu1 %v3105_v29, %s4415_s16 }
0x13d0   : > { %v2997_v38 = vsub.f32 %v2991_v7, %v2994_v63  ;;  %v2995_v52 = vmul.f32 %v2977_v60, %v2977_v60  ;;  %v3001_v41 = vsub.f32 %v2965_v34, %v2977_v60 }
0x13d1   : > { %v2989_v2 = vpop.xlane.xlu0 %2988  ;;  %v3013_v53 = vpop.permute.xlu1 %3012 }
0x13d2   : > { %v3003_v13 = vadd.f32 1e-05, %v2997_v38  ;;  %v2992_v54 = vmul.f32 0.03125, %v2989_v2 }
0x13d4   : > { %4281 = vrsqrt.f32 %v3003_v13  ;;  %v2998_v59 = vsub.f32 %v2992_v54, %v2995_v52 }
0x13d5   : > { %v2983_v9 = vpop.xlane.xlu0 %2982  ;;  %v3025_v17 = vpop.permute.xlu1 %3024 }
0x13d6   : > { %v3004_v12 = vadd.f32 1e-05, %v2998_v59  ;;  %v2990_v6 = vmul.f32 0.03125, %v2983_v9 }
0x13d8   : > { %4283 = vrsqrt.f32 %v3004_v12  ;;  %v2996_v35 = vsub.f32 %v2990_v6, %v2993_v36 }
0x13d9   : > { %v3019_v16 = vpop.permute.xlu0 %3018  ;;  %v3117_v19 = vpop.permute.xlu1 %3116 }
0x13da   : > { %v3002_v1 = vadd.f32 1e-05, %v2996_v35 }
0x13dc   : > { %4285 = vrsqrt.f32 %v3002_v1 }
0x13dd   : > { %v3115_v26 = vpop.permute.xlu0 %3114  ;;  %v3113_v27 = vpop.permute.xlu1 %3112 }
0x13e1   : > { %v4282_v57 = vpop.eup %4281  ;;  %v3111_v45 = vpop.permute.xlu0 %3110 }
0x13e2   : > { %v3009_v48 = vmul.f32 %v4282_v57, %v3000_v8 }
0x13e4   : > { %v3016_v5 = vmul.f32 %v3013_v53, %v3009_v48 }
0x13e5   : > { %v4284_v55 = vpop.eup %4283 }
0x13e6   : > { %v3010_v47 = vmul.f32 %v4284_v55, %v3001_v41  ;;  %v3022_v62 = vadd.f32 %v3019_v16, %v3016_v5 }
0x13e8   : > { %v3017_v61 = vmul.f32 %v3013_v53, %v3010_v47 }
0x13e9   : > { %v4286_v37 = vpop.eup %4285 }
0x13ea   : > { %v3008_v40 = vmul.f32 %v4286_v37, %v2999_v21  ;;  %v3023_v14 = vadd.f32 %v3019_v16, %v3017_v61 }
0x13ec   : > { %v3015_v0 = vmul.f32 %v3013_v53, %v3008_v40  ;;  %4089 = vmatpush3.msra.mxu1 %v3023_v14 }
0x13ed   : > { %4090 = vmatprep.subr.mxu1 %v5613_v58 }
0x13ee   : > { %v3021_v39 = vadd.f32 %v3019_v16, %v3015_v0  ;;  %4091 = vmatpush3.msra.mxu1 %v3022_v62 }
0x13ef   : > { %4092 = vmatprep.subr.mxu1 %v5613_v58 }
0x13f0   : > { %4093 = vmatpush3.msra.mxu1 %v3021_v39 }
0x13f1   : > { %4095 = vmatmul.mubr.msk.f32.vlgmr.msra.gmra.mxu1 %vm316_vm2, %v3025_v17  ;;  %4097 = vmatprep.subr.mxu1 %v5613_v58 }
0x13f2   : > { %4098 = vmatpush3.msra.mxu1 %v3117_v19  ;;  %4105 = vmatprep.mubr.msk.f32.mxu1 %vm4410_vm0, %v5613_v58 }
0x13f3   : > { %4099 = vmatprep.subr.mxu1 %v5613_v58 }
0x13f4   : > { %4100 = vmatpush3.msra.mxu1 %v3115_v26 }
0x13f5   : > { %4101 = vmatprep.subr.mxu1 %v5613_v58 }
0x13f6   : > { %4102 = vmatpush3.msra.mxu1 %v3113_v27 }
0x13f7   : > { %4103 = vmatprep.subr.mxu1 %v5613_v58 }
0x13f8   : > { %4104 = vmatpush3.msra.mxu1 %v3111_v45 }
0x1440   : > { %v3124_v25 = vpop.permute.xlu1 %3123 }
0x14b1   : > { %v3094_v28 = vpop.f32.mrf.mxu1 }
0x14b2   : > { %4106 = vmatmul.mubr.msk.f32.vlgmr.msra.gmra.mxu1 %vm226_vm1, %v3094_v28 }
0x14b3   : > { %v4096_v32 = vpop.f32.mrf.mxu1 }
0x1572   : > { %v3195_v31 = vpop.f32.mrf.mxu1 }
0x1573   : > { %v3196_v58 = vadd.f32 %v3195_v31, %v3124_v25 }
0x1574   : > { %v4107_v23 = vpop.f32.mrf.mxu1 }
0x1575   : > { %3199 = vst.msk [vmem:[%s152_s23] sm:$0xff] %vm226_vm1, %v3196_v58 }
0x1576   : > { %4353 = shalt.err (!%p4350_p0)
}
0x1577   : > { %s4354_s4 = scalar_lea.hbm %s5568_s27, 128  ;;  %s4358_s7 = scalar_lea.hbm %s5606_s2, 256 }
0x1578   : > { %p4355_p1 = scmp.ne.s32.totalorder %s5568_s27, %s4354_s4  ;;  %p4359_p4 = scmp.lt.s32.totalorder %s5568_s27, %s5606_s2 }
0x1579   : > { %p4360_p7 = scmp.lt.s32.totalorder %s4358_s7, %s4354_s4 }
0x157a   : > { %p4356_p2 = pnand %p4355_p1, %p4470_p5 }
0x157b   : > { %p4361_p6 = por %p4360_p7, %p4359_p4 }
0x157c   : > { %p4357_p3 = pneg %p4356_p2 }
0x157e   : > { %p4362_p8 = pnand %p4361_p6, %p4357_p3 }
0x1580   : > { %4365 = shalt.err (!%p4362_p8)
}
0x1581   : > { %4112 = dma.vmem_to_hbm [thread:$0]  (%p4470_p5), %s3215_s24, 128, %s5568_s27, %s3201_s28  }
0x1582 PF: > { %p4124_p9 = scmp.ge.s32.totalorder %s4404_s12, 2  ;;  %s3226_s16 = sand.u32 1, %s4392_s9  }
0x1583   : > { %p5615_p10 = scmp.ne.s32.totalorder %s5611_s20, 0  ;;  %s3227_s17 = scalar_lea.sflag [#allocation4], %s3226_s16 }
0x1585   : > { %p4119_p11 = pnand %p4124_p9, %p5615_p10 }
0x1587   : > { %p4120_p12 = pneg %p4119_p11 }
0x1589   : > { %4387 = dma.done.wait (%p4120_p12), %s3227_s17, 128  }
0x158a   : > { %4389 = vsyncadd (%p4120_p12), %s3227_s17, 4294967168  ;;  %p13_p13 = scmp.ge.s32.totalorder %s4457_s15, 4   ;;  %s5616_s9 = smov %s4396_s10 }
0x158b   : > { %s5617_s10 = smov %s4400_s11  ;;  %s5618_s11 = smov %s4468_s18 }
0x158c   : > { %s5619_s12 = smov %s4457_s15  ;;  %15 = sbr.rel (!%p13_p13) target bundleno = 4 (0x4), region = 68 }
0x1591   :  { %3232 = vsyncpa [#allocation3], 1 }
0x1592   :  { %3234 = vsyncpa [#allocation3 + $0x1], 1 }
0x1593   :  { %3235 = vsyncpa [#allocation4], 1 }
0x1594   :  { %3237 = vsyncpa [#allocation4 + $0x1], 1 }

</bundles_post_ra>
